<compile_context>
chip_gen: v7x
topology: tpu7x:2x2x1
jax: 0.10.0
libtpu: 0.0.40
codegen_flags: <defaults>
</compile_context>

<pallas_src>
import jax
import jax.numpy as jnp
from jax.experimental import pallas as pl
from jax.experimental.pallas import tpu as pltpu

INPUT_DIM = 28 * 28   # 784, forced by x.view(-1, 28*28)
H1 = 512
H2 = 256
OUTPUT_DIM = 10       # MNIST classes
OUT_PAD = 128         # lane-dense padded output width
W1_ROWS = 112         # 784 = 7 * 112 sampling row-blocks (112 % 16 == 0)


def _softplus(r):
    # numerically-stable log1p(exp(r))
    return jnp.log1p(jnp.exp(-jnp.abs(r))) + jnp.maximum(r, 0.0)


# --------------------------------------------------------------------------
# Kernel 1: fused reparameterization sampling for all Bayesian params
#   w = mu + softplus(rho) * eps
# Gridded over w1 rows; the small b1 / w3 / b3 triples are resident
# (constant block index) and computed once at grid step 0.
# --------------------------------------------------------------------------
def _sample_kernel(w1m, w1r, w1e, b1m, b1r, b1e,
                   w3m, w3r, w3e, b3m, b3r, b3e,
                   w1_o, b1_o, w3_o, b3_o):
    w1_o[...] = (w1m[...] + _softplus(w1r[...]) * w1e[...]).astype(w1_o.dtype)

    @pl.when(pl.program_id(0) == 0)
    def _():
        b1_o[...] = b1m[...] + _softplus(b1r[...]) * b1e[...]
        w3_o[...] = (w3m[...] + _softplus(w3r[...]) * w3e[...]).astype(w3_o.dtype)
        b3_o[...] = b3m[...] + _softplus(b3r[...]) * b3e[...]


def _sample_all(params, eps):
    """One pallas_call producing (w1 bf16, b1 f32, w3 bf16, b3 f32)."""
    w1_block = pl.BlockSpec((W1_ROWS, H1), lambda i: (i, 0))
    b1_block = pl.BlockSpec((1, H1), lambda i: (0, 0))
    w3_block = pl.BlockSpec((H2, OUT_PAD), lambda i: (0, 0))
    b3_block = pl.BlockSpec((1, OUT_PAD), lambda i: (0, 0))

    n_total = (INPUT_DIM * H1) + H1 + (H2 * OUT_PAD) + OUT_PAD
    out_bytes = (INPUT_DIM * H1 * 2 + H1 * 4 + H2 * OUT_PAD * 2 + OUT_PAD * 4)

    return pl.pallas_call(
        _sample_kernel,
        grid=(INPUT_DIM // W1_ROWS,),
        out_shape=(
            jax.ShapeDtypeStruct((INPUT_DIM, H1), jnp.bfloat16),
            jax.ShapeDtypeStruct((1, H1), jnp.float32),
            jax.ShapeDtypeStruct((H2, OUT_PAD), jnp.bfloat16),
            jax.ShapeDtypeStruct((1, OUT_PAD), jnp.float32),
        ),
        in_specs=[
            w1_block, w1_block, w1_block,       # w1 mu / rho / eps (tiled)
            b1_block, b1_block, b1_block,       # b1 triple (resident)
            w3_block, w3_block, w3_block,       # w3 triple (resident, padded)
            b3_block, b3_block, b3_block,       # b3 triple (resident, padded)
        ],
        out_specs=(w1_block, b1_block, w3_block, b3_block),
        compiler_params=pltpu.CompilerParams(
            # b1/w3/b3 outputs are revisited (constant index) across the axis.
            dimension_semantics=("arbitrary",),
        ),
        cost_estimate=pl.CostEstimate(
            flops=int(3 * n_total),
            transcendentals=int(2 * n_total),
            bytes_accessed=int(3 * n_total * 4 + out_bytes),
        ),
    )(
        params["w1_mu"], params["w1_rho"], eps["w1"],
        params["b1_mu"], params["b1_rho"], eps["b1"],
        params["w3_mu"], params["w3_rho"], eps["w3"],
        params["b3_mu"], params["b3_rho"], eps["b3"],
    )


# --------------------------------------------------------------------------
# Kernel 2: fused 3-layer MLP over one batch tile (weights VMEM-resident).
# x arrives f32 and is cast to bf16 in-kernel (cheaper than a wrapper-side
# cast pass); all matmuls hit the MXU with f32 accumulation.
# --------------------------------------------------------------------------
def mlp_kernel(x_ref, w1_ref, b1_ref, w2_ref, b2_ref, w3_ref, b3_ref, o_ref):
    x = x_ref[...].astype(jnp.bfloat16)
    # layer 1: Bayesian (pre-sampled) linear + ReLU
    h = jnp.dot(x, w1_ref[...], preferred_element_type=jnp.float32)
    h = jnp.maximum(h + b1_ref[...], 0.0).astype(jnp.bfloat16)
    # layer 2: deterministic nn.Linear + ReLU
    h = jnp.dot(h, w2_ref[...], preferred_element_type=jnp.float32)
    h = jnp.maximum(h + b2_ref[...], 0.0).astype(jnp.bfloat16)
    # layer 3: Bayesian (pre-sampled) linear, lane-dense padded output
    o_ref[...] = (
        jnp.dot(h, w3_ref[...], preferred_element_type=jnp.float32) + b3_ref[...]
    )


def _batch_tile(B):
    """Pick the batch tile.

    Large B: 512 (>=2 grid steps for v7x's two cores, fills the 256-row MXU,
    amortizes ~0.35us/step grid overhead).  Medium B: 256.  Small B: one tile
    rounded up to a multiple of 16 (bf16 sublane tile; never 8)."""
    if B >= 1024:
        return 512
    if B >= 512:
        return 256
    return max(16, -(-B // 16) * 16)


def bayesian_mlp_forward(x, params, eps):
    """x: [B, 1, 28, 28] (NCHW) or [B, 784]. Returns [B, OUTPUT_DIM] f32."""
    B = x.shape[0]
    x2d = x.reshape(B, INPUT_DIM).astype(jnp.float32)

    # ---- sample all Bayesian weights once per forward (1 fused launch) ----
    w1, b1, w3, b3 = _sample_all(params, eps)
    w2 = params["w2"].astype(jnp.bfloat16)
    b2 = params["b2"]

    # ---- batch tiling (parallel grid; weights stay resident) ----
    TB = _batch_tile(B)
    Bp = -(-B // TB) * TB
    if Bp != B:
        # pad only the ragged last tile (no-op branch when TB | B)
        x2d = jnp.pad(x2d, ((0, Bp - B), (0, 0)))

    flops = 2 * Bp * (INPUT_DIM * H1 + H1 * H2 + H2 * OUT_PAD)
    bytes_accessed = (
        Bp * INPUT_DIM * 4                      # x tiles (f32 in HBM)
        + w1.size * 2 + w2.size * 2 + w3.size * 2
        + b1.size * 4 + b2.size * 4 + b3.size * 4
        + Bp * OUT_PAD * 4                      # output writeback
    )

    out = pl.pallas_call(
        mlp_kernel,
        out_shape=jax.ShapeDtypeStruct((Bp, OUT_PAD), jnp.float32),
        grid=(Bp // TB,),
        in_specs=[
            pl.BlockSpec((TB, INPUT_DIM), lambda i: (i, 0)),   # x tile (f32)
            pl.BlockSpec((INPUT_DIM, H1), lambda i: (0, 0)),   # w1 (resident)
            pl.BlockSpec((1, H1), lambda i: (0, 0)),           # b1
            pl.BlockSpec((H1, H2), lambda i: (0, 0)),          # w2
            pl.BlockSpec((1, H2), lambda i: (0, 0)),           # b2
            pl.BlockSpec((H2, OUT_PAD), lambda i: (0, 0)),     # w3 (padded)
            pl.BlockSpec((1, OUT_PAD), lambda i: (0, 0)),      # b3 (padded)
        ],
        out_specs=pl.BlockSpec((TB, OUT_PAD), lambda i: (i, 0)),
        compiler_params=pltpu.CompilerParams(
            dimension_semantics=("parallel",),
        ),
        cost_estimate=pl.CostEstimate(
            flops=int(flops), transcendentals=0,
            bytes_accessed=int(bytes_accessed)),
    )(x2d, w1, b1, w2, b2, w3, b3)

    return out[:B, :OUTPUT_DIM]


# --------------------------------------------------------------------------
# Parameter / noise init and pure-JAX reference
# --------------------------------------------------------------------------
def init_params(key):
    """Deterministic parameter init.

    Weights are stored in (in, out) layout; the last Bayesian layer's mu /
    rho / eps are pre-padded to OUT_PAD columns ONCE here (padded columns are
    mu=rho=eps=0, so the sampled pad weights/biases are exactly 0)."""
    ks = jax.random.split(key, 8)

    def mat(k, shape, scale):
        return (scale * jax.random.normal(k, shape)).astype(jnp.float32)

    pad_n = OUT_PAD - OUTPUT_DIM

    def pad_cols(a):
        return jnp.pad(a, ((0, 0), (0, pad_n)))

    params = {
        "w1_mu": mat(ks[0], (INPUT_DIM, H1), 0.1),
        "w1_rho": jnp.full((INPUT_DIM, H1), -7.0, jnp.float32),
        "b1_mu": mat(ks[1], (1, H1), 0.1),
        "b1_rho": jnp.full((1, H1), -7.0, jnp.float32),
        "w2": mat(ks[2], (H1, H2), 1.0 / jnp.sqrt(H1)),
        "b2": mat(ks[3], (1, H2), 1.0 / jnp.sqrt(H1)),
        "w3_mu": pad_cols(mat(ks[4], (H2, OUTPUT_DIM), 0.1)),
        "w3_rho": pad_cols(jnp.full((H2, OUTPUT_DIM), -7.0, jnp.float32)),
        "b3_mu": pad_cols(mat(ks[5], (1, OUTPUT_DIM), 0.1)),
        "b3_rho": pad_cols(jnp.full((1, OUTPUT_DIM), -7.0, jnp.float32)),
    }
    eps = {
        "w1": jax.random.normal(ks[6], (INPUT_DIM, H1), jnp.float32),
        "b1": jax.random.normal(ks[7], (1, H1), jnp.float32),
        "w3": pad_cols(jax.random.normal(jax.random.fold_in(key, 100),
                                         (H2, OUTPUT_DIM), jnp.float32)),
        "b3": pad_cols(jax.random.normal(jax.random.fold_in(key, 101),
                                         (1, OUTPUT_DIM), jnp.float32)),
    }
    return params, eps


def reference_forward(x, params, eps):
    """Pure-JAX reference with the same bf16-matmul / f32-accumulate semantics."""
    B = x.shape[0]
    h = x.reshape(B, INPUT_DIM).astype(jnp.float32)
    w1 = params["w1_mu"] + _softplus(params["w1_rho"]) * eps["w1"]
    b1 = params["b1_mu"] + _softplus(params["b1_rho"]) * eps["b1"]
    w3 = params["w3_mu"] + _softplus(params["w3_rho"]) * eps["w3"]
    b3 = params["b3_mu"] + _softplus(params["b3_rho"]) * eps["b3"]

    h = jnp.dot(h.astype(jnp.bfloat16), w1.astype(jnp.bfloat16),
                preferred_element_type=jnp.float32) + b1
    h = jnp.maximum(h, 0.0)
    h = jnp.dot(h.astype(jnp.bfloat16), params["w2"].astype(jnp.bfloat16),
                preferred_element_type=jnp.float32) + params["b2"]
    h = jnp.maximum(h, 0.0)
    out = jnp.dot(h.astype(jnp.bfloat16), w3.astype(jnp.bfloat16),
                  preferred_element_type=jnp.float32) + b3
    return out[:, :OUTPUT_DIM]


if __name__ == "__main__":
    key = jax.random.PRNGKey(0)
    k_x, k_p = jax.random.split(key)

    # MNIST-like NCHW input; 28x28 is forced by x.view(-1, 28*28).
    x = jax.random.normal(k_x, (2, 1, 28, 28), jnp.float32)

    params, eps = init_params(k_p)

    out = bayesian_mlp_forward(x, params, eps)
    out = jax.block_until_ready(out)

    ref = reference_forward(x, params, eps)
    assert out.shape == (2, OUTPUT_DIM)
    assert jnp.allclose(out, ref, atol=2e-2, rtol=2e-2)

    print("KERNEL_OK")
</pallas_src>

<mosaic_0001>
module attributes {stable_mosaic.version = 11 : i64} {
  func.func @_sample_kernel(%arg0: i32, %arg1: memref<112x512xf32, #tpu.memory_space<vmem>>, %arg2: memref<112x512xf32, #tpu.memory_space<vmem>>, %arg3: memref<112x512xf32, #tpu.memory_space<vmem>>, %arg4: memref<1x512xf32, #tpu.memory_space<vmem>>, %arg5: memref<1x512xf32, #tpu.memory_space<vmem>>, %arg6: memref<1x512xf32, #tpu.memory_space<vmem>>, %arg7: memref<256x128xf32, #tpu.memory_space<vmem>>, %arg8: memref<256x128xf32, #tpu.memory_space<vmem>>, %arg9: memref<256x128xf32, #tpu.memory_space<vmem>>, %arg10: memref<1x128xf32, #tpu.memory_space<vmem>>, %arg11: memref<1x128xf32, #tpu.memory_space<vmem>>, %arg12: memref<1x128xf32, #tpu.memory_space<vmem>>, %arg13: memref<112x512xbf16, #tpu.memory_space<vmem>>, %arg14: memref<1x512xf32, #tpu.memory_space<vmem>>, %arg15: memref<256x128xbf16, #tpu.memory_space<vmem>>, %arg16: memref<1x128xf32, #tpu.memory_space<vmem>>) attributes {dimension_semantics = [#tpu.dimension_semantics<arbitrary>], iteration_bounds = array<i64: 7>, scalar_prefetch = 0 : i64, scratch_operands = 0 : i64, tpu.core_type = #tpu.core_type<tc>, window_params = [{transform_indices = @transform_0, window_bounds = array<i64: 112, 512>}, {transform_indices = @transform_1, window_bounds = array<i64: 112, 512>}, {transform_indices = @transform_2, window_bounds = array<i64: 112, 512>}, {pipeline_mode = #tpu.pipeline_mode<synchronous>, transform_indices = @transform_3, window_bounds = array<i64: 1, 512>}, {pipeline_mode = #tpu.pipeline_mode<synchronous>, transform_indices = @transform_4, window_bounds = array<i64: 1, 512>}, {pipeline_mode = #tpu.pipeline_mode<synchronous>, transform_indices = @transform_5, window_bounds = array<i64: 1, 512>}, {pipeline_mode = #tpu.pipeline_mode<synchronous>, transform_indices = @transform_6, window_bounds = array<i64: 256, 128>}, {pipeline_mode = #tpu.pipeline_mode<synchronous>, transform_indices = @transform_7, window_bounds = array<i64: 256, 128>}, {pipeline_mode = #tpu.pipeline_mode<synchronous>, transform_indices = @transform_8, window_bounds = array<i64: 256, 128>}, {pipeline_mode = #tpu.pipeline_mode<synchronous>, transform_indices = @transform_9, window_bounds = array<i64: 1, 128>}, {pipeline_mode = #tpu.pipeline_mode<synchronous>, transform_indices = @transform_10, window_bounds = array<i64: 1, 128>}, {pipeline_mode = #tpu.pipeline_mode<synchronous>, transform_indices = @transform_11, window_bounds = array<i64: 1, 128>}, {transform_indices = @transform_12, window_bounds = array<i64: 112, 512>}, {pipeline_mode = #tpu.pipeline_mode<synchronous>, transform_indices = @transform_13, window_bounds = array<i64: 1, 512>}, {pipeline_mode = #tpu.pipeline_mode<synchronous>, transform_indices = @transform_14, window_bounds = array<i64: 256, 128>}, {pipeline_mode = #tpu.pipeline_mode<synchronous>, transform_indices = @transform_15, window_bounds = array<i64: 1, 128>}]} {
    %c0 = arith.constant 0 : index
    %c0_0 = arith.constant 0 : index
    %0 = vector.load %arg1[%c0, %c0_0] : memref<112x512xf32, #tpu.memory_space<vmem>>, vector<112x512xf32>
    %c0_1 = arith.constant 0 : index
    %c0_2 = arith.constant 0 : index
    %1 = vector.load %arg2[%c0_1, %c0_2] : memref<112x512xf32, #tpu.memory_space<vmem>>, vector<112x512xf32>
    %2 = math.absf %1 : vector<112x512xf32>
    %cst = arith.constant 0.000000e+00 : f32
    %3 = vector.broadcast %cst : f32 to vector<112x512xf32>
    %4 = arith.subf %3, %2 : vector<112x512xf32>
    %5 = math.exp %4 : vector<112x512xf32>
    %6 = math.log1p %5 : vector<112x512xf32>
    %cst_3 = arith.constant 0.000000e+00 : f32
    %7 = vector.broadcast %cst_3 : f32 to vector<112x512xf32>
    %8 = arith.maximumf %1, %7 : vector<112x512xf32>
    %9 = arith.addf %6, %8 : vector<112x512xf32>
    %c0_4 = arith.constant 0 : index
    %c0_5 = arith.constant 0 : index
    %10 = vector.load %arg3[%c0_4, %c0_5] : memref<112x512xf32, #tpu.memory_space<vmem>>, vector<112x512xf32>
    %11 = arith.mulf %9, %10 : vector<112x512xf32>
    %12 = arith.addf %0, %11 : vector<112x512xf32>
    %13 = arith.truncf %12 : vector<112x512xf32> to vector<112x512xbf16>
    %c0_6 = arith.constant 0 : index
    %c0_7 = arith.constant 0 : index
    %14 = vector.load %arg13[%c0_6, %c0_7] : memref<112x512xbf16, #tpu.memory_space<vmem>>, vector<112x512xbf16>
    tpu.vector_store %arg13[%c0_6, %c0_7], %13 {strides = array<i32>} : memref<112x512xbf16, #tpu.memory_space<vmem>>, vector<112x512xbf16>,
    %c0_i32 = arith.constant 0 : i32
    %15 = arith.cmpi eq, %arg0, %c0_i32 : i32
    %16 = arith.extui %15 : i1 to i32
    %c0_i32_8 = arith.constant 0 : i32
    %17 = arith.cmpi ne, %16, %c0_i32_8 : i32
    scf.if %17 {
      %c0_9 = arith.constant 0 : index
      %c0_10 = arith.constant 0 : index
      %18 = vector.load %arg4[%c0_9, %c0_10] : memref<1x512xf32, #tpu.memory_space<vmem>>, vector<1x512xf32>
      %c0_11 = arith.constant 0 : index
      %c0_12 = arith.constant 0 : index
      %19 = vector.load %arg5[%c0_11, %c0_12] : memref<1x512xf32, #tpu.memory_space<vmem>>, vector<1x512xf32>
      %20 = math.absf %19 : vector<1x512xf32>
      %cst_13 = arith.constant 0.000000e+00 : f32
      %21 = vector.broadcast %cst_13 : f32 to vector<1x512xf32>
      %22 = arith.subf %21, %20 : vector<1x512xf32>
      %23 = math.exp %22 : vector<1x512xf32>
      %24 = math.log1p %23 : vector<1x512xf32>
      %cst_14 = arith.constant 0.000000e+00 : f32
      %25 = vector.broadcast %cst_14 : f32 to vector<1x512xf32>
      %26 = arith.maximumf %19, %25 : vector<1x512xf32>
      %27 = arith.addf %24, %26 : vector<1x512xf32>
      %c0_15 = arith.constant 0 : index
      %c0_16 = arith.constant 0 : index
      %28 = vector.load %arg6[%c0_15, %c0_16] : memref<1x512xf32, #tpu.memory_space<vmem>>, vector<1x512xf32>
      %29 = arith.mulf %27, %28 : vector<1x512xf32>
      %30 = arith.addf %18, %29 : vector<1x512xf32>
      %c0_17 = arith.constant 0 : index
      %c0_18 = arith.constant 0 : index
      %31 = vector.load %arg14[%c0_17, %c0_18] : memref<1x512xf32, #tpu.memory_space<vmem>>, vector<1x512xf32>
      tpu.vector_store %arg14[%c0_17, %c0_18], %30 {strides = array<i32>} : memref<1x512xf32, #tpu.memory_space<vmem>>, vector<1x512xf32>,
      %c0_19 = arith.constant 0 : index
      %c0_20 = arith.constant 0 : index
      %32 = vector.load %arg7[%c0_19, %c0_20] : memref<256x128xf32, #tpu.memory_space<vmem>>, vector<256x128xf32>
      %c0_21 = arith.constant 0 : index
      %c0_22 = arith.constant 0 : index
      %33 = vector.load %arg8[%c0_21, %c0_22] : memref<256x128xf32, #tpu.memory_space<vmem>>, vector<256x128xf32>
      %34 = math.absf %33 : vector<256x128xf32>
      %cst_23 = arith.constant 0.000000e+00 : f32
      %35 = vector.broadcast %cst_23 : f32 to vector<256x128xf32>
      %36 = arith.subf %35, %34 : vector<256x128xf32>
      %37 = math.exp %36 : vector<256x128xf32>
      %38 = math.log1p %37 : vector<256x128xf32>
      %cst_24 = arith.constant 0.000000e+00 : f32
      %39 = vector.broadcast %cst_24 : f32 to vector<256x128xf32>
      %40 = arith.maximumf %33, %39 : vector<256x128xf32>
      %41 = arith.addf %38, %40 : vector<256x128xf32>
      %c0_25 = arith.constant 0 : index
      %c0_26 = arith.constant 0 : index
      %42 = vector.load %arg9[%c0_25, %c0_26] : memref<256x128xf32, #tpu.memory_space<vmem>>, vector<256x128xf32>
      %43 = arith.mulf %41, %42 : vector<256x128xf32>
      %44 = arith.addf %32, %43 : vector<256x128xf32>
      %45 = arith.truncf %44 : vector<256x128xf32> to vector<256x128xbf16>
      %c0_27 = arith.constant 0 : index
      %c0_28 = arith.constant 0 : index
      %46 = vector.load %arg15[%c0_27, %c0_28] : memref<256x128xbf16, #tpu.memory_space<vmem>>, vector<256x128xbf16>
      tpu.vector_store %arg15[%c0_27, %c0_28], %45 {strides = array<i32>} : memref<256x128xbf16, #tpu.memory_space<vmem>>, vector<256x128xbf16>,
      %c0_29 = arith.constant 0 : index
      %c0_30 = arith.constant 0 : index
      %47 = vector.load %arg10[%c0_29, %c0_30] : memref<1x128xf32, #tpu.memory_space<vmem>>, vector<1x128xf32>
      %c0_31 = arith.constant 0 : index
      %c0_32 = arith.constant 0 : index
      %48 = vector.load %arg11[%c0_31, %c0_32] : memref<1x128xf32, #tpu.memory_space<vmem>>, vector<1x128xf32>
      %49 = math.absf %48 : vector<1x128xf32>
      %cst_33 = arith.constant 0.000000e+00 : f32
      %50 = vector.broadcast %cst_33 : f32 to vector<1x128xf32>
      %51 = arith.subf %50, %49 : vector<1x128xf32>
      %52 = math.exp %51 : vector<1x128xf32>
      %53 = math.log1p %52 : vector<1x128xf32>
      %cst_34 = arith.constant 0.000000e+00 : f32
      %54 = vector.broadcast %cst_34 : f32 to vector<1x128xf32>
      %55 = arith.maximumf %48, %54 : vector<1x128xf32>
      %56 = arith.addf %53, %55 : vector<1x128xf32>
      %c0_35 = arith.constant 0 : index
      %c0_36 = arith.constant 0 : index
      %57 = vector.load %arg12[%c0_35, %c0_36] : memref<1x128xf32, #tpu.memory_space<vmem>>, vector<1x128xf32>
      %58 = arith.mulf %56, %57 : vector<1x128xf32>
      %59 = arith.addf %47, %58 : vector<1x128xf32>
      %c0_37 = arith.constant 0 : index
      %c0_38 = arith.constant 0 : index
      %60 = vector.load %arg16[%c0_37, %c0_38] : memref<1x128xf32, #tpu.memory_space<vmem>>, vector<1x128xf32>
      tpu.vector_store %arg16[%c0_37, %c0_38], %59 {strides = array<i32>} : memref<1x128xf32, #tpu.memory_space<vmem>>, vector<1x128xf32>,
    } else {
    }
    return
  }
  func.func @transform_0(%arg0: i32) -> (i32, i32) {
    %c0_i32 = arith.constant 0 : i32
    %c0_i32_0 = arith.constant 0 : i32
    return %arg0, %c0_i32 : i32, i32
  }
  func.func @transform_1(%arg0: i32) -> (i32, i32) {
    %c0_i32 = arith.constant 0 : i32
    %c0_i32_0 = arith.constant 0 : i32
    return %arg0, %c0_i32 : i32, i32
  }
  func.func @transform_2(%arg0: i32) -> (i32, i32) {
    %c0_i32 = arith.constant 0 : i32
    %c0_i32_0 = arith.constant 0 : i32
    return %arg0, %c0_i32 : i32, i32
  }
  func.func @transform_3(%arg0: i32) -> (i32, i32) {
    %c0_i32 = arith.constant 0 : i32
    %c0_i32_0 = arith.constant 0 : i32
    %c0_i32_1 = arith.constant 0 : i32
    return %c0_i32, %c0_i32_0 : i32, i32
  }
  func.func @transform_4(%arg0: i32) -> (i32, i32) {
    %c0_i32 = arith.constant 0 : i32
    %c0_i32_0 = arith.constant 0 : i32
    %c0_i32_1 = arith.constant 0 : i32
    return %c0_i32, %c0_i32_0 : i32, i32
  }
  func.func @transform_5(%arg0: i32) -> (i32, i32) {
    %c0_i32 = arith.constant 0 : i32
    %c0_i32_0 = arith.constant 0 : i32
    %c0_i32_1 = arith.constant 0 : i32
    return %c0_i32, %c0_i32_0 : i32, i32
  }
  func.func @transform_6(%arg0: i32) -> (i32, i32) {
    %c0_i32 = arith.constant 0 : i32
    %c0_i32_0 = arith.constant 0 : i32
    %c0_i32_1 = arith.constant 0 : i32
    return %c0_i32, %c0_i32_0 : i32, i32
  }
  func.func @transform_7(%arg0: i32) -> (i32, i32) {
    %c0_i32 = arith.constant 0 : i32
    %c0_i32_0 = arith.constant 0 : i32
    %c0_i32_1 = arith.constant 0 : i32
    return %c0_i32, %c0_i32_0 : i32, i32
  }
  func.func @transform_8(%arg0: i32) -> (i32, i32) {
    %c0_i32 = arith.constant 0 : i32
    %c0_i32_0 = arith.constant 0 : i32
    %c0_i32_1 = arith.constant 0 : i32
    return %c0_i32, %c0_i32_0 : i32, i32
  }
  func.func @transform_9(%arg0: i32) -> (i32, i32) {
    %c0_i32 = arith.constant 0 : i32
    %c0_i32_0 = arith.constant 0 : i32
    %c0_i32_1 = arith.constant 0 : i32
    return %c0_i32, %c0_i32_0 : i32, i32
  }
  func.func @transform_10(%arg0: i32) -> (i32, i32) {
    %c0_i32 = arith.constant 0 : i32
    %c0_i32_0 = arith.constant 0 : i32
    %c0_i32_1 = arith.constant 0 : i32
    return %c0_i32, %c0_i32_0 : i32, i32
  }
  func.func @transform_11(%arg0: i32) -> (i32, i32) {
    %c0_i32 = arith.constant 0 : i32
    %c0_i32_0 = arith.constant 0 : i32
    %c0_i32_1 = arith.constant 0 : i32
    return %c0_i32, %c0_i32_0 : i32, i32
  }
  func.func @transform_12(%arg0: i32) -> (i32, i32) {
    %c0_i32 = arith.constant 0 : i32
    %c0_i32_0 = arith.constant 0 : i32
    return %arg0, %c0_i32 : i32, i32
  }
  func.func @transform_13(%arg0: i32) -> (i32, i32) {
    %c0_i32 = arith.constant 0 : i32
    %c0_i32_0 = arith.constant 0 : i32
    %c0_i32_1 = arith.constant 0 : i32
    return %c0_i32, %c0_i32_0 : i32, i32
  }
  func.func @transform_14(%arg0: i32) -> (i32, i32) {
    %c0_i32 = arith.constant 0 : i32
    %c0_i32_0 = arith.constant 0 : i32
    %c0_i32_1 = arith.constant 0 : i32
    return %c0_i32, %c0_i32_0 : i32, i32
  }
  func.func @transform_15(%arg0: i32) -> (i32, i32) {
    %c0_i32 = arith.constant 0 : i32
    %c0_i32_0 = arith.constant 0 : i32
    %c0_i32_1 = arith.constant 0 : i32
    return %c0_i32, %c0_i32_0 : i32, i32
  }
}

</mosaic_0001>

<bundles_post_ra>
// kernel: tpu_custom_call.1
= control target key start
LH: loop header
LB: loop body
LE: loop exit
PB: predicated region body
PF: predicated region fallthrough
CT: control target
= control target key end

     0   :  { %s6581_s0 = inlined_call_operand.hbm [shape: f32[784,512], index: 0, kind: input, shape index: {}]   ;;  %s6582_s1 = inlined_call_operand.hbm [shape: f32[784,512], index: 1, kind: input, shape index: {}]   ;;  %s6583_s2 = inlined_call_operand.hbm [shape: f32[784,512], index: 2, kind: input, shape index: {}]   ;;  %s6584_s3 = inlined_call_operand.hbm [shape: f32[1,512], index: 3, kind: input, shape index: {}]   ;;  %s6585_s4 = inlined_call_operand.hbm [shape: f32[1,512], index: 4, kind: input, shape index: {}]   ;;  %s6586_s5 = inlined_call_operand.hbm [shape: f32[1,512], index: 5, kind: input, shape index: {}]   ;;  %s6587_s6 = inlined_call_operand.hbm [shape: f32[256,128], index: 6, kind: input, shape index: {}]   ;;  %s6588_s7 = inlined_call_operand.hbm [shape: f32[256,128], index: 7, kind: input, shape index: {}]   ;;  %s6589_s8 = inlined_call_operand.hbm [shape: f32[256,128], index: 8, kind: input, shape index: {}]   ;;  %s6590_s9 = inlined_call_operand.hbm [shape: f32[1,128], index: 9, kind: input, shape index: {}]   ;;  %s6591_s10 = inlined_call_operand.hbm [shape: f32[1,128], index: 10, kind: input, shape index: {}]   ;;  %s6592_s11 = inlined_call_operand.hbm [shape: f32[1,128], index: 11, kind: input, shape index: {}]   ;;  %s6593_s12 = inlined_call_operand.hbm [shape: bf16[784,512], index: 12, kind: output, shape index: {0}]   ;;  %s6594_s13 = inlined_call_operand.hbm [shape: f32[1,512], index: 13, kind: output, shape index: {1}]   ;;  %s6595_s14 = inlined_call_operand.hbm [shape: bf16[256,128], index: 14, kind: output, shape index: {2}]   ;;  %s6596_s15 = inlined_call_operand.hbm [shape: f32[1,128], index: 15, kind: output, shape index: {3}]  }
   0x1   :  { %6631 = sst [smem:[#allocation45_spill]] %s6582_s1 }
   0x2   :  { %6632 = sst [smem:[#allocation46_spill]] %s6584_s3 }
   0x3   :  { %6633 = sst [smem:[#allocation47_spill]] %s6585_s4 }
   0x4   :  { %6634 = sst [smem:[#allocation48_spill]] %s6586_s5 }
   0x5   :  { %6635 = sst [smem:[#allocation49_spill]] %s6587_s6 }
   0x6   :  { %6636 = sst [smem:[#allocation50_spill]] %s6588_s7 }
   0x7   :  { %6637 = sst [smem:[#allocation51_spill]] %s6590_s9 }
   0x8   :  { %6638 = sst [smem:[#allocation52_spill]] %s6593_s12 }
   0x9   :  { %6639 = sst [smem:[#allocation53_spill]] %s6594_s13 }
   0xa   :  { %6640 = sst [smem:[#allocation54_spill]] %s6595_s14 }
   0xb   :  { %6641 = sst [smem:[#allocation55_spill]] %s6596_s15 }
   0xc   :  { %21 = vsyncpa [#allocation3], 0 }
   0xd   :  { %23 = vsyncpa [#allocation3 + $0x1], 0 }
   0xe   :  { %24 = vsyncpa [#allocation6], 0 }
   0xf   :  { %26 = vsyncpa [#allocation6 + $0x1], 0 }
  0x10   :  { %27 = vsyncpa [#allocation9], 0 }
  0x11   :  { %28 = vsyncpa [#allocation12], 0 }
  0x12   :  { %29 = vsyncpa [#allocation15], 0 }
  0x13   :  { %30 = vsyncpa [#allocation18], 0 }
  0x14   :  { %31 = vsyncpa [#allocation21], 0 }
  0x15   :  { %32 = vsyncpa [#allocation4], 0 }
  0x16   :  { %34 = vsyncpa [#allocation4 + $0x1], 0 }
  0x17   :  { %35 = vsyncpa [#allocation24], 0 }
  0x18   :  { %36 = vsyncpa [#allocation27], 0  ;;  %s4591_s18 = smov 0   ;;  %s4593_s19 = smov 0  }
  0x19   :  { %s4595_s20 = smov 0   ;;  %s4597_s21 = smov 0  }
  0x1a LB: > { %6642 = sst [smem:[#allocation38_spill]] %s4473_s18  ;;  %s4487_s22 = smov [#allocation8]   ;;  %s4485_s21 = sphi %s4597_s21, %s6881_s21   ;;  %s4481_s20 = sphi %s4595_s20, %s6885_s20   ;;  %s4477_s19 = sphi %s4593_s19, %s6884_s19   ;;  %s4473_s18 = sphi %s4591_s18, %s6883_s18  }
  0x1b   : > { %6643 = sst [smem:[#allocation39_spill]] %s4485_s21  ;;  %s416_s23 = sshll.u32 %s4487_s22, 4  ;;  %s417_s23 = int_to_ptr.vmem [resolvable:$true] %s416_s23 }
  0x1c   : > { %s4612_s24 = sadd.s32 4294967295, %s4485_s21   ;;  %p3161_p0 = scmp.ge.s32.totalorder %s4485_s21, 1 }
  0x1d   : > { %p6600_p1 = scmp.eq.s32.totalorder %s4612_s24, 0  ;;  %p403_p2 = scmp.lt.s32.totalorder %s4485_s21, 8 }
  0x1e   : > { %s4488_s26 = smov [#allocation11]   ;;  %s4489_s29 = smov [#allocation14]  }
  0x1f   : > { %p4618_p4 = pnand %p3161_p0, %p403_p2  ;;  %s438_s27 = sshll.u32 %s4488_s26, 4  ;;  %s4624_s27 = int_to_ptr.vmem [resolvable:$true] %s438_s27 }
  0x20   : > { %s461_s30 = sshll.u32 %s4489_s29, 4  ;;  %s6647_s3 = sld [smem:[#allocation46_spill]]  ;;  %s4632_s30 = int_to_ptr.vmem [resolvable:$true] %s461_s30 }
  0x21   : > { %s6644_s25 = scalar_select %p4618_p4, 1, 0 }
  0x22   : > { %p3487_p5 = pneg %p4618_p4 }
  0x23   : > { %6645 = sst [smem:[#allocation40_spill]] %s6644_s25 }
  0x24   : > { %p4628_p6 = pnand %p3487_p5, %p6600_p1 }
  0x26   : > { %s6646_s28 = scalar_select %p4628_p6, 1, 0 }
  0x27   : > { %s3967_s22 = scalar_lea.hbm %s6647_s3, 64  ;;  %p4642_p8 = pneg %p4628_p6 }
  0x28   : > { %p3968_p7 = scmp.ne.s32.totalorder %s6647_s3, %s3967_s22  ;;  %p3974_p11 = scmp.lt.u32.totalorder %s3967_s22, %s6647_s3 }
  0x29   : > { %s6648_s26 = scalar_select %p4642_p8, 1, 0 }
  0x2a   : > { %p3970_p9 = pnand %p4642_p8, %p3968_p7 }
  0x2c   : > { %p3971_p10 = pneg %p3970_p9 }
  0x2e   : > { %p3976_p12 = pnand %p3974_p11, %p3971_p10 }
  0x30   : > { %3979 = shalt.err (!%p3976_p12)
}
  0x31   : > { %s3980_s16 = scalar_lea.vmem %s417_s23, 64  ;;  %p3988_p5 = scmp.lt.s32.totalorder %s417_s23, %s417_s23 }
  0x32   : > { %p3981_p13 = scmp.ne.s32.totalorder %s417_s23, %s3980_s16  ;;  %p3989_p3 = scmp.lt.s32.totalorder %s3980_s16, %s3980_s16 }
  0x34   : > { %p3983_p0 = pnand %p3981_p13, %p4642_p8  ;;  %p3990_p1 = por %p3989_p3, %p3988_p5 }
  0x36   : > { %p3984_p2 = pneg %p3983_p0 }
  0x38   : > { %p3991_p4 = pnand %p3990_p1, %p3984_p2 }
  0x3a   : > { %3994 = shalt.err (!%p3991_p4)
}
  0x3b   : > { %3490 = dma.hbm_to_vmem [thread:$0]  (!%p4628_p6), %s6647_s3, 64, %s417_s23, [#allocation9]  }
  0x3c   : > { %s6649_s5 = sld [smem:[#allocation48_spill]] }
  0x42   : > { %s3995_s22 = scalar_lea.hbm %s6649_s5, 64 }
  0x43   : > { %p3996_p7 = scmp.ne.s32.totalorder %s6649_s5, %s3995_s22  ;;  %p4002_p1 = scmp.lt.u32.totalorder %s3995_s22, %s6649_s5 }
  0x45   : > { %p3998_p9 = pnand %p3996_p7, %p4642_p8 }
  0x47   : > { %p3999_p3 = pneg %p3998_p9 }
  0x49   : > { %p4004_p4 = pnand %p4002_p1, %p3999_p3 }
  0x4b   : > { %4007 = shalt.err (!%p4004_p4)
}
  0x4c   : > { %s4008_s23 = scalar_lea.vmem %s4624_s27, 64  ;;  %p4016_p13 = scmp.lt.s32.totalorder %s4624_s27, %s4624_s27 }
  0x4d   : > { %p4009_p10 = scmp.ne.s32.totalorder %s4624_s27, %s4008_s23  ;;  %p4017_p0 = scmp.lt.s32.totalorder %s4008_s23, %s4008_s23 }
  0x4f   : > { %p4011_p11 = pnand %p4009_p10, %p4642_p8  ;;  %p4018_p2 = por %p4017_p0, %p4016_p13 }
  0x51   : > { %p4012_p12 = pneg %p4011_p11 }
  0x53   : > { %p4019_p5 = pnand %p4018_p2, %p4012_p12 }
  0x55   : > { %4022 = shalt.err (!%p4019_p5)
}
  0x56   : > { %3496 = dma.hbm_to_vmem [thread:$0]  (!%p4628_p6), %s6649_s5, 64, %s4624_s27, [#allocation12]  }
  0x57   : > { %s6650_s7 = sld [smem:[#allocation50_spill]] }
  0x5d   : > { %s4023_s12 = scalar_lea.hbm %s6650_s7, 4096 }
  0x5e   : > { %p4024_p7 = scmp.ne.s32.totalorder %s6650_s7, %s4023_s12  ;;  %p4030_p1 = scmp.lt.u32.totalorder %s4023_s12, %s6650_s7 }
  0x60   : > { %p4026_p9 = pnand %p4024_p7, %p4642_p8 }
  0x62   : > { %p4027_p3 = pneg %p4026_p9 }
  0x64   : > { %p4032_p4 = pnand %p4030_p1, %p4027_p3 }
  0x66   : > { %4035 = shalt.err (!%p4032_p4)
}
  0x67   : > { %s4036_s27 = scalar_lea.vmem %s4632_s30, 4096  ;;  %p4044_p13 = scmp.lt.s32.totalorder %s4632_s30, %s4632_s30 }
  0x68   : > { %p4037_p10 = scmp.ne.s32.totalorder %s4632_s30, %s4036_s27  ;;  %p4045_p0 = scmp.lt.s32.totalorder %s4036_s27, %s4036_s27 }
  0x6a   : > { %p4039_p11 = pnand %p4037_p10, %p4642_p8  ;;  %p4046_p2 = por %p4045_p0, %p4044_p13 }
  0x6c   : > { %p4040_p12 = pneg %p4039_p11 }
  0x6e   : > { %p4047_p5 = pnand %p4046_p2, %p4040_p12 }
  0x70   : > { %4050 = shalt.err (!%p4047_p5)
}
  0x71   : > { %s6604_s23 = smov 128   ;;  %s6607_s13 = smov 8  }
  0x72   : > { %3502 = dma.hbm_to_vmem [thread:$0]  (!%p4628_p6), %s6650_s7, 4096, %s4632_s30, [#allocation15], %s6604_s23, %s6604_s23, %s6607_s13  }
  0x73   : > { %s4492_s15 = smov [#allocation17]   ;;  %s6651_s9 = sld [smem:[#allocation51_spill]] }
  0x74   : > { %s488_s12 = sshll.u32 %s4492_s15, 4  ;;  %s489_s12 = int_to_ptr.vmem [resolvable:$true] %s488_s12 }
  0x79   : > { %s4051_s29 = scalar_lea.hbm %s6651_s9, 16 }
  0x7a   : > { %p4052_p7 = scmp.ne.s32.totalorder %s6651_s9, %s4051_s29  ;;  %p4058_p1 = scmp.lt.u32.totalorder %s4051_s29, %s6651_s9 }
  0x7c   : > { %p4054_p9 = pnand %p4052_p7, %p4642_p8 }
  0x7e   : > { %p4055_p3 = pneg %p4054_p9 }
  0x80   : > { %p4060_p4 = pnand %p4058_p1, %p4055_p3 }
  0x82   : > { %4063 = shalt.err (!%p4060_p4)
}
  0x83   : > { %s4064_s30 = scalar_lea.vmem %s489_s12, 16  ;;  %s4071_s25 = scalar_lea.vmem %s489_s12, 32 }
  0x84   : > { %p4065_p10 = scmp.ne.s32.totalorder %s489_s12, %s4064_s30  ;;  %p4072_p13 = scmp.lt.s32.totalorder %s489_s12, %s489_s12 }
  0x85   : > { %p4073_p0 = scmp.lt.s32.totalorder %s4071_s25, %s4064_s30 }
  0x86   : > { %p4067_p11 = pnand %p4065_p10, %p4642_p8 }
  0x87   : > { %p4074_p2 = por %p4073_p0, %p4072_p13 }
  0x88   : > { %p4068_p12 = pneg %p4067_p11 }
  0x8a   : > { %p4075_p5 = pnand %p4074_p2, %p4068_p12 }
  0x8c   : > { %4078 = shalt.err (!%p4075_p5)
}
  0x8d   : > { %3508 = dma.hbm_to_vmem [thread:$0]  (!%p4628_p6), %s6651_s9, 16, %s489_s12, [#allocation18]  }
  0x8e   : > { %s3160_s3 = sadd.s32 4294967294, %s4485_s21   ;;  %s4727_s5 = sadd.s32 1, %s4485_s21  }
  0x8f   : > { %6652 = sst [smem:[#allocation41_spill]] %s4727_s5  ;;  %s46_s17 = ssub.s32 %s4485_s21, %s4727_s5 }
  0x90   : > { %s49_s22 = sadd.s32 1, %s4481_s20  ;;  %p47_p7 = scmp.eq.s32.totalorder %s46_s17, 0 }
  0x91   : > { %p56_p9 = scmp.ne.s32.totalorder %s4481_s20, %s4477_s19  ;;  %p57_p3 = scmp.eq.s32.totalorder %s4485_s21, 0 }
  0x92   : > { %p62_p1 = scmp.ne.s32.totalorder %s4477_s19, %s4473_s18  ;;  %p6654_p10 = scmp.eq.s32.totalorder %s4612_s24, 0 }
  0x93   : > { %s4738_s29 = scalar_select %p47_p7, %s4481_s20, %s49_s22  }
  0x94   : > { %p58_p4 = por %p57_p3, %p56_p9  ;;  %p4742_p11 = por %p6654_p10, %p62_p1 }
  0x95   : > { %6653 = sst [smem:[#allocation42_spill]] %s4738_s29  ;;  %p6613_p12 = scmp.eq.s32.totalorder %s4612_s24, 6 }
  0x96   : > { %s6655_s12 = scalar_select %p4742_p11, 1, 0 }
  0x97   : > { %p333_p13 = scmp.eq.s32.totalorder %s3160_s3, 6  ;;  %p3538_p0 = scmp.lt.s32.totalorder %s4485_s21, 7 }
  0x98   : > { %s6606_s16 = sand.u32 1, %s4481_s20   ;;  %p4751_p2 = por %p6613_p12, %p56_p9 }
  0x99   : > { %p4755_p5 = por %p333_p13, %p62_p1  ;;  %s4761_s25 = smul.u32 448, %s6606_s16 }
  0x9a   : > { %s6656_s27 = scalar_select %p4751_p2, 1, 0 }
  0x9b   : > { %s6658_s30 = scalar_select %p4755_p5, 1, 0 }
  0x9c   : > { %6657 = sst [smem:[#allocation43_spill]] %s6656_s27  ;;  %p4763_p7 = pnand %p3538_p0, %p58_p4 }
  0x9d   : > { %6659 = sst [smem:[#allocation44_spill]] %s6658_s30  ;;  %s4768_s15 = smul.u32 7168, %s4485_s21 }
  0x9e   : > { %s6660_s14 = scalar_select %p4763_p7, 1, 0 }
  0x9f   : > { %s543_s3 = sand.u32 1, %s4485_s21   ;;  %s6661_s1 = sld [smem:[#allocation45_spill]] }
  0xa0   : > { %s547_s16 = scalar_lea.vmem [#allocation5], %s4761_s25  ;;  %s4493_s7 = smov [#allocation10]  }
  0xa1   : > { %s555_s13 = sshll.u32 %s547_s16, 4  ;;  %s4780_s9 = sshll.u32 %s4493_s7, 4  ;;  %s4778_s13 = int_to_ptr.vmem [resolvable:$true] %s555_s13  ;;  %s428_s9 = int_to_ptr.vmem [resolvable:$true] %s4780_s9 }
  0xa2   : > { %s4782_s29 = scalar_lea.sflag [#allocation6], %s543_s3  ;;  %p4788_p3 = pneg %p4763_p7 }
  0xa4   : > { %s6662_s17 = scalar_select %p4788_p3, 1, 0 }
  0xa5   : > { %s4775_s23 = scalar_lea.hbm %s6661_s1, %s4768_s15  ;;  %s4084_s30 = scalar_lea.hbm %s6661_s1, 50176 }
  0xa6   : > { %s4079_s5 = scalar_lea.hbm %s4775_s23, 7168  ;;  %p4085_p10 = scmp.lt.u32.totalorder %s4775_s23, %s6661_s1 }
  0xa7   : > { %p4080_p9 = scmp.ne.s32.totalorder %s4775_s23, %s4079_s5  ;;  %p4086_p13 = scmp.lt.u32.totalorder %s4084_s30, %s4079_s5 }
  0xa8   : > { %p4088_p12 = scmp.lt.u32.totalorder %s4079_s5, %s4775_s23 }
  0xa9   : > { %p4082_p1 = pnand %p4788_p3, %p4080_p9  ;;  %p4087_p0 = por %p4086_p13, %p4085_p10 }
  0xab   : > { %p4083_p4 = pneg %p4082_p1  ;;  %p4089_p5 = por %p4088_p12, %p4087_p0 }
  0xad   : > { %p4090_p2 = pnand %p4089_p5, %p4083_p4 }
  0xaf   : > { %4093 = shalt.err (!%p4090_p2)
}
  0xb0   : > { %s4094_s3 = scalar_lea.vmem %s4778_s13, 7168  ;;  %s4494_s22 = smov [#allocation5]  }
  0xb1   : > { %p4095_p9 = scmp.ne.s32.totalorder %s4778_s13, %s4094_s3  ;;  %s4099_s16 = sshll.u32 %s4494_s22, 4  ;;  %s4100_s16 = int_to_ptr.vmem [resolvable:$false] %s4099_s16 }
  0xb2   : > { %s4101_s18 = scalar_lea.vmem %s4100_s16, 14336  ;;  %p4102_p6 = scmp.lt.s32.totalorder %s4778_s13, %s4100_s16 }
  0xb3   : > { %p4097_p1 = pnand %p4095_p9, %p4788_p3  ;;  %p4103_p8 = scmp.lt.s32.totalorder %s4101_s18, %s4094_s3 }
  0xb5   : > { %p4098_p11 = pneg %p4097_p1  ;;  %p4104_p10 = por %p4103_p8, %p4102_p6 }
  0xb7   : > { %p4105_p13 = pnand %p4104_p10, %p4098_p11 }
  0xb9   : > { %4108 = shalt.err (!%p4105_p13)
}
  0xba   : > { %s6625_s5 = smov 512   ;;  %s6627_s30 = smov 32  }
  0xbb   : > { %3521 = dma.hbm_to_vmem [thread:$0]  (!%p4763_p7), %s4775_s23, 7168, %s4778_s13, %s4782_s29, %s6625_s5, %s6625_s5, %s6627_s30  }
  0xbc   : > { %s6663_s4 = sld [smem:[#allocation47_spill]]  ;;  %p6664_p8 = scmp.ne.s32.totalorder %s6648_s26, 0 }
  0xc2   : > { %s4109_s3 = scalar_lea.hbm %s6663_s4, 64 }
  0xc3   : > { %p4110_p6 = scmp.ne.s32.totalorder %s6663_s4, %s4109_s3  ;;  %p4116_p2 = scmp.lt.u32.totalorder %s4109_s3, %s6663_s4 }
  0xc5   : > { %p4112_p11 = pnand %p4110_p6, %p6664_p8 }
  0xc7   : > { %p4113_p12 = pneg %p4112_p11 }
  0xc9   : > { %p4118_p5 = pnand %p4116_p2, %p4113_p12 }
  0xcb   : > { %4121 = shalt.err (!%p4118_p5)
}
  0xcc   : > { %s4122_s27 = scalar_lea.vmem %s428_s9, 64  ;;  %p4130_p1 = scmp.lt.s32.totalorder %s428_s9, %s428_s9 }
  0xcd   : > { %p4123_p4 = scmp.ne.s32.totalorder %s428_s9, %s4122_s27  ;;  %p4131_p10 = scmp.lt.s32.totalorder %s4122_s27, %s4122_s27 }
  0xcf   : > { %p4125_p0 = pnand %p4123_p4, %p6664_p8  ;;  %p4132_p13 = por %p4131_p10, %p4130_p1 }
  0xd1   : > { %p4126_p9 = pneg %p4125_p0 }
  0xd3   : > { %p4133_p7 = pnand %p4132_p13, %p4126_p9 }
  0xd5   : > { %4136 = shalt.err (!%p4133_p7)
}
  0xd6   : > { %p6665_p6 = scmp.ne.s32.totalorder %s6646_s28, 0  ;;  %s4497_s1 = smov [#allocation13]  }
  0xd7   : > { %s448_s21 = sshll.u32 %s4497_s1, 4  ;;  %s4498_s7 = smov [#allocation16]   ;;  %s449_s21 = int_to_ptr.vmem [resolvable:$true] %s448_s21 }
  0xd8   : > { %3493 = dma.hbm_to_vmem [thread:$0]  (!%p6665_p6), %s6663_s4, 64, %s428_s9, [#allocation9]  }
  0xd9   : > { %s474_s22 = sshll.u32 %s4498_s7, 4  ;;  %s6666_s6 = sld [smem:[#allocation49_spill]]  ;;  %s475_s22 = int_to_ptr.vmem [resolvable:$true] %s474_s22 }
  0xdf   : > { %s4137_s18 = scalar_lea.hbm %s6666_s6, 4096 }
  0xe0   : > { %p4138_p7 = scmp.ne.s32.totalorder %s6666_s6, %s4137_s18  ;;  %p4144_p2 = scmp.lt.u32.totalorder %s4137_s18, %s6666_s6 }
  0xe2   : > { %p4140_p11 = pnand %p4138_p7, %p6664_p8 }
  0xe4   : > { %p4141_p12 = pneg %p4140_p11 }
  0xe6   : > { %p4146_p5 = pnand %p4144_p2, %p4141_p12 }
  0xe8   : > { %4149 = shalt.err (!%p4146_p5)
}
  0xe9   : > { %s4150_s9 = scalar_lea.vmem %s449_s21, 4096  ;;  %p4158_p1 = scmp.lt.s32.totalorder %s449_s21, %s449_s21 }
  0xea   : > { %p4151_p4 = scmp.ne.s32.totalorder %s449_s21, %s4150_s9  ;;  %p4159_p10 = scmp.lt.s32.totalorder %s4150_s9, %s4150_s9 }
  0xec   : > { %p4153_p0 = pnand %p4151_p4, %p6664_p8  ;;  %p4160_p13 = por %p4159_p10, %p4158_p1 }
  0xee   : > { %p4154_p9 = pneg %p4153_p0 }
  0xf0   : > { %p4161_p3 = pnand %p4160_p13, %p4154_p9 }
  0xf2   : > { %4164 = shalt.err (!%p4161_p3)
}
  0xf3   : > { %s6667_s5 = smov 8   ;;  %s6668_s13 = smov 128  }
  0xf4   : > { %3499 = dma.hbm_to_vmem [thread:$0]  (!%p6665_p6), %s6666_s6, 4096, %s449_s21, [#allocation12], %s6668_s13, %s6668_s13, %s6667_s5  }
  0xf5   : > { %s4165_s16 = scalar_lea.hbm %s6589_s8, 4096 }
  0xf6   : > { %p4166_p7 = scmp.ne.s32.totalorder %s6589_s8, %s4165_s16  ;;  %p4172_p12 = scmp.lt.u32.totalorder %s4165_s16, %s6589_s8 }
  0xf8   : > { %p4168_p3 = pnand %p4166_p7, %p6664_p8 }
  0xfa   : > { %p4169_p11 = pneg %p4168_p3 }
  0xfc   : > { %p4174_p2 = pnand %p4172_p12, %p4169_p11 }
  0xfe   : > { %4177 = shalt.err (!%p4174_p2)
}
  0xff   : > { %s4178_s30 = scalar_lea.vmem %s475_s22, 4096  ;;  %p4186_p9 = scmp.lt.s32.totalorder %s475_s22, %s475_s22 }
 0x100   : > { %p4179_p5 = scmp.ne.s32.totalorder %s475_s22, %s4178_s30  ;;  %p4187_p1 = scmp.lt.s32.totalorder %s4178_s30, %s4178_s30 }
 0x102   : > { %p4181_p4 = pnand %p4179_p5, %p6664_p8  ;;  %p4188_p10 = por %p4187_p1, %p4186_p9 }
 0x104   : > { %p4182_p0 = pneg %p4181_p4 }
 0x106   : > { %p4189_p13 = pnand %p4188_p10, %p4182_p0 }
 0x108   : > { %4192 = shalt.err (!%p4189_p13)
}
 0x109   : > { %3505 = dma.hbm_to_vmem [thread:$0]  (!%p6665_p6), %s6589_s8, 4096, %s475_s22, [#allocation15], %s6668_s13, %s6668_s13, %s6667_s5  }
 0x10a   : > { %s4499_s7 = smov [#allocation19]   ;;  %s4500_s16 = smov [#allocation20]  }
 0x10b   : > { %s499_s3 = sshll.u32 %s4499_s7, 4  ;;  %s510_s18 = sshll.u32 %s4500_s16, 4  ;;  %s500_s3 = int_to_ptr.vmem [resolvable:$true] %s499_s3  ;;  %s511_s18 = int_to_ptr.vmem [resolvable:$true] %s510_s18 }
 0x10c   : > { %s4193_s9 = scalar_lea.hbm %s6591_s10, 16 }
 0x10d   : > { %p4194_p7 = scmp.ne.s32.totalorder %s6591_s10, %s4193_s9  ;;  %p4200_p12 = scmp.lt.u32.totalorder %s4193_s9, %s6591_s10 }
 0x10f   : > { %p4196_p3 = pnand %p4194_p7, %p6664_p8 }
 0x111   : > { %p4197_p11 = pneg %p4196_p3 }
 0x113   : > { %p4202_p2 = pnand %p4200_p12, %p4197_p11 }
 0x115   : > { %4205 = shalt.err (!%p4202_p2)
}
 0x116   : > { %s4206_s22 = scalar_lea.vmem %s500_s3, 16  ;;  %s4213_s5 = scalar_lea.vmem %s500_s3, 32 }
 0x117   : > { %p4207_p5 = scmp.ne.s32.totalorder %s500_s3, %s4206_s22  ;;  %p4214_p9 = scmp.lt.s32.totalorder %s500_s3, %s500_s3 }
 0x118   : > { %p4215_p1 = scmp.lt.s32.totalorder %s4213_s5, %s4206_s22 }
 0x119   : > { %p4209_p4 = pnand %p4207_p5, %p6664_p8 }
 0x11a   : > { %p4216_p10 = por %p4215_p1, %p4214_p9 }
 0x11b   : > { %p4210_p0 = pneg %p4209_p4 }
 0x11d   : > { %p4217_p13 = pnand %p4216_p10, %p4210_p0 }
 0x11f   : > { %4220 = shalt.err (!%p4217_p13)
}
 0x120   : > { %3511 = dma.hbm_to_vmem [thread:$0]  (!%p6665_p6), %s6591_s10, 16, %s500_s3, [#allocation18]  }
 0x121   : > { %s4221_s7 = scalar_lea.hbm %s6592_s11, 16 }
 0x122   : > { %p4222_p7 = scmp.ne.s32.totalorder %s6592_s11, %s4221_s7  ;;  %p4228_p12 = scmp.lt.u32.totalorder %s4221_s7, %s6592_s11 }
 0x124   : > { %p4224_p3 = pnand %p4222_p7, %p6664_p8 }
 0x126   : > { %p4225_p11 = pneg %p4224_p3 }
 0x128   : > { %p4230_p2 = pnand %p4228_p12, %p4225_p11 }
 0x12a   : > { %4233 = shalt.err (!%p4230_p2)
}
 0x12b   : > { %s4234_s30 = scalar_lea.vmem %s511_s18, 16  ;;  %s4241_s3 = scalar_lea.vmem %s511_s18, 32 }
 0x12c   : > { %p4235_p5 = scmp.ne.s32.totalorder %s511_s18, %s4234_s30  ;;  %p4242_p9 = scmp.lt.s32.totalorder %s511_s18, %s511_s18 }
 0x12d   : > { %p4243_p1 = scmp.lt.s32.totalorder %s4241_s3, %s4234_s30 }
 0x12e   : > { %p4237_p4 = pnand %p4235_p5, %p6664_p8 }
 0x12f   : > { %p4244_p10 = por %p4243_p1, %p4242_p9 }
 0x130   : > { %p4238_p0 = pneg %p4237_p4 }
 0x132   : > { %p4245_p13 = pnand %p4244_p10, %p4238_p0 }
 0x134   : > { %4248 = shalt.err (!%p4245_p13)
}
 0x135   : > { %3514 = dma.hbm_to_vmem [thread:$0]  (!%p6665_p6), %s6592_s11, 16, %s511_s18, [#allocation21]  }
 0x136   : > { %s4916_s4 = scalar_lea.hbm %s6581_s0, %s4768_s15  ;;  %s525_s13 = scalar_lea.vmem [#allocation2], %s4761_s25 }
 0x137   : > { %s533_s28 = sshll.u32 %s525_s13, 4  ;;  %s4925_s7 = scalar_lea.hbm %s6583_s2, %s4768_s15  ;;  %s4919_s28 = int_to_ptr.vmem [resolvable:$true] %s533_s28 }
 0x138   : > { %s6669_s16 = sand.u32 1, %s4481_s20   ;;  %s4249_s27 = scalar_lea.hbm %s4916_s4, 7168 }
 0x139   : > { %s4929_s18 = scalar_lea.sflag [#allocation3], %s6669_s16  ;;  %p4250_p8 = scmp.ne.s32.totalorder %s4916_s4, %s4249_s27 }
 0x13a   : > { %p6670_p6 = scmp.ne.s32.totalorder %s6662_s17, 0  ;;  %s4254_s30 = scalar_lea.hbm %s6581_s0, 50176 }
 0x13b   : > { %p4255_p11 = scmp.lt.u32.totalorder %s4916_s4, %s6581_s0  ;;  %p4256_p12 = scmp.lt.u32.totalorder %s4254_s30, %s4249_s27 }
 0x13c   : > { %p4252_p7 = pnand %p4250_p8, %p6670_p6  ;;  %p4258_p5 = scmp.lt.u32.totalorder %s4249_s27, %s4916_s4 }
 0x13d   : > { %p4257_p2 = por %p4256_p12, %p4255_p11 }
 0x13e   : > { %p4253_p3 = pneg %p4252_p7 }
 0x13f   : > { %p4259_p4 = por %p4258_p5, %p4257_p2 }
 0x141   : > { %p4260_p0 = pnand %p4259_p4, %p4253_p3 }
 0x143   : > { %4263 = shalt.err (!%p4260_p0)
}
 0x144   : > { %s4264_s15 = scalar_lea.vmem %s4919_s28, 7168  ;;  %s4501_s22 = smov [#allocation2]  }
 0x145   : > { %p4265_p9 = scmp.ne.s32.totalorder %s4919_s28, %s4264_s15  ;;  %s4269_s26 = sshll.u32 %s4501_s22, 4  ;;  %s4270_s26 = int_to_ptr.vmem [resolvable:$false] %s4269_s26 }
 0x146   : > { %s4271_s5 = scalar_lea.vmem %s4270_s26, 14336  ;;  %p4272_p13 = scmp.lt.s32.totalorder %s4919_s28, %s4270_s26 }
 0x147   : > { %p4267_p1 = pnand %p4265_p9, %p6670_p6  ;;  %p4273_p8 = scmp.lt.s32.totalorder %s4271_s5, %s4264_s15 }
 0x149   : > { %p4268_p10 = pneg %p4267_p1  ;;  %p4274_p7 = por %p4273_p8, %p4272_p13 }
 0x14b   : > { %p4275_p11 = pnand %p4274_p7, %p4268_p10 }
 0x14d   : > { %4278 = shalt.err (!%p4275_p11)
}
 0x14e   : > { %p6671_p3 = scmp.ne.s32.totalorder %s6660_s14, 0  ;;  %s6672_s13 = smov 32  }
 0x14f   : > { %s6673_s6 = smov 512   ;;  %s569_s1 = scalar_lea.vmem [#allocation7], %s4761_s25 }
 0x150   : > { %3518 = dma.hbm_to_vmem [thread:$0]  (!%p6671_p3), %s4916_s4, 7168, %s4919_s28, %s4929_s18, %s6673_s6, %s6673_s6, %s6672_s13  }
 0x151   : > { %s577_s16 = sshll.u32 %s569_s1, 4  ;;  %s4279_s27 = scalar_lea.hbm %s4925_s7, 7168  ;;  %s4957_s16 = int_to_ptr.vmem [resolvable:$true] %s577_s16 }
 0x152   : > { %p4280_p12 = scmp.ne.s32.totalorder %s4925_s7, %s4279_s27  ;;  %s4284_s30 = scalar_lea.hbm %s6583_s2, 50176 }
 0x153   : > { %p4285_p4 = scmp.lt.u32.totalorder %s4925_s7, %s6583_s2  ;;  %p4286_p0 = scmp.lt.u32.totalorder %s4284_s30, %s4279_s27 }
 0x154   : > { %p4282_p2 = pnand %p4280_p12, %p6670_p6  ;;  %p4288_p1 = scmp.lt.u32.totalorder %s4279_s27, %s4925_s7 }
 0x155   : > { %p4287_p9 = por %p4286_p0, %p4285_p4 }
 0x156   : > { %p4283_p5 = pneg %p4282_p2 }
 0x157   : > { %p4289_p10 = por %p4288_p1, %p4287_p9 }
 0x159   : > { %p4290_p13 = pnand %p4289_p10, %p4283_p5 }
 0x15b   : > { %4293 = shalt.err (!%p4290_p13)
}
 0x15c   : > { %s4294_s25 = scalar_lea.vmem %s4957_s16, 7168  ;;  %s4502_s4 = smov [#allocation7]  }
 0x15d   : > { %p4295_p8 = scmp.ne.s32.totalorder %s4957_s16, %s4294_s25  ;;  %s4299_s28 = sshll.u32 %s4502_s4, 4  ;;  %s4300_s28 = int_to_ptr.vmem [resolvable:$false] %s4299_s28 }
 0x15e   : > { %s4301_s18 = scalar_lea.vmem %s4300_s28, 14336  ;;  %p4302_p12 = scmp.lt.s32.totalorder %s4957_s16, %s4300_s28 }
 0x15f   : > { %p4297_p7 = pnand %p4295_p8, %p6670_p6  ;;  %p4303_p2 = scmp.lt.s32.totalorder %s4301_s18, %s4294_s25 }
 0x161   : > { %p4298_p11 = pneg %p4297_p7  ;;  %p4304_p4 = por %p4303_p2, %p4302_p12 }
 0x163   : > { %p4305_p0 = pnand %p4304_p4, %p4298_p11 }
 0x165   : > { %4308 = shalt.err (!%p4305_p0)
}
 0x166   : > { %3524 = dma.hbm_to_vmem [thread:$0]  (!%p6671_p3), %s4925_s7, 7168, %s4957_s16, %s4782_s29, %s6673_s6, %s6673_s6, %s6672_s13  }
 0x167   : > { %s6674_s17 = sld [smem:[#allocation40_spill]] }
 0x16d   : > { %p6675_p6 = scmp.ne.s32.totalorder %s6674_s17, 0 }
 0x16e   : > { %s4987_s15 = sand.u32 (!%p6675_p6), 1, %s4477_s19   ;;  %p6676_p5 = scmp.ne.s32.totalorder (!%p6675_p6), %s6655_s12, 0 }
 0x16f   : > { %589 = sbr.rel (%p6675_p6) target bundleno = 934 (0x3a6), region = 68  ;;  %s592_s26 = scalar_lea.sflag (!%p6675_p6), [#allocation3], %s4987_s15 }
 0x170   : > { %s3429_s22 = smul.u32 (!%p6675_p6), 448, %s4987_s15 }
 0x172   : > { %s4991_s5 = scalar_lea.vmem (!%p6675_p6), [#allocation2], %s3429_s22 }
 0x176   : > { %4432 = dma.done.wait (%p6676_p5), %s592_s26, 7168  }
 0x177   : > { %4434 = vsyncadd (%p6676_p5), %s592_s26, 4294960128  ;;  %s600_s29 = sand.u32 1, %s4612_s24   ;;  %s4998_s7 = scalar_lea.vmem [#allocation5], %s3429_s22 }
 0x178   : > { %s601_s14 = scalar_lea.sflag [#allocation6], %s600_s29 }
 0x179   : > { %4436 = dma.done.wait (%p6676_p5), %s601_s14, 14336  }
 0x17a   : > { %4438 = vsyncadd (%p6676_p5), %s601_s14, 4294952960  ;;  %s5004_s13 = scalar_lea.vmem [#allocation7], %s3429_s22  ;;  %p6677_p3 = scmp.eq.s32.totalorder %s4612_s24, 0 }
 0x17c   : > { %4440 = dma.done.wait (%p6677_p3), [#allocation9], 128   ;;  %p6678_p9 = pmov %p6677_p3 }
 0x17d   : > { %p6679_p1 = pmov %p6677_p3 }
 0x17e   : > { %4442 = vsyncadd (%p6678_p9), [#allocation9], 4294967168 }
 0x17f   : > { %4444 = dma.done.wait (%p6679_p1), [#allocation12], 4160   ;;  %p6680_p10 = pmov %p6679_p1 }
 0x180   : > { %p6681_p13 = pmov %p6679_p1 }
 0x181   : > { %4446 = vsyncadd (%p6680_p10), [#allocation12], 4294963136 }
 0x182   : > { %4448 = dma.done.wait (%p6681_p13), [#allocation15], 8192   ;;  %p6682_p8 = pmov %p6679_p1 }
 0x183   : > { %p6683_p7 = pmov %p6679_p1 }
 0x184   : > { %4450 = vsyncadd (%p6682_p8), [#allocation15], 4294959104 }
 0x185   : > { %4452 = dma.done.wait (%p6683_p7), [#allocation18], 32   ;;  %p6684_p11 = pmov %p6679_p1 }
 0x186   : > { %p6685_p12 = pmov %p6679_p1 }
 0x187   : > { %4454 = vsyncadd (%p6684_p11), [#allocation18], 4294967264 }
 0x188   : > { %4456 = dma.done.wait (%p6685_p12), [#allocation21], 16   ;;  %p6686_p2 = pmov %p6679_p1 }
 0x189   : > { %v5027_v0 = vld [vmem:[%s4998_s7] sm:$0xff]  ;;  %v5030_v1 = vld [vmem:[%s4998_s7 + $0x8] sm:$0xff]  ;;  %v5035_v4 = vld [vmem:[%s4998_s7 + $0x10] sm:$0xff]  ;;  %s3430_s12 = smul.u32 224, %s4987_s15  ;;  %p6793_p4 = scmp.ne.s32.totalorder %s4612_s24, 0 }
 0x18a   : > { %4458 = vsyncadd (%p6686_p2), [#allocation21], 4294967280  ;;  %v822_v2 = vand.u32 2147483647, %v5027_v0  ;;  %v823_v3 = vand.u32 2147483647, %v5030_v1 }
 0x18b   : > { %v5038_v6 = vld [vmem:[%s4998_s7 + $0x18] sm:$0xff]  ;;  %v824_v7 = vand.u32 2147483647, %v5035_v4  ;;  %v5043_v12 = vld [vmem:[%s4998_s7 + $0x20] sm:$0xff]  ;;  %v5046_v13 = vld [vmem:[%s4998_s7 + $0x28] sm:$0xff]  ;;  %v1550_v34 = vmax.f32 %v5027_v0, 0.0 }
 0x18c   : > { %v878_v5 = vsub.f32 0.0, %v822_v2  ;;  %v879_v8 = vsub.f32 0.0, %v823_v3  ;;  %v825_v9 = vand.u32 2147483647, %v5038_v6  ;;  %v826_v16 = vand.u32 2147483647, %v5043_v12 }
 0x18d   : > { %v880_v11 = vsub.f32 0.0, %v824_v7  ;;  %v827_v18 = vand.u32 2147483647, %v5046_v13  ;;  %v5051_v22 = vld [vmem:[%s4998_s7 + $0x30] sm:$0xff]  ;;  %v5054_v23 = vld [vmem:[%s4998_s7 + $0x38] sm:$0xff]  ;;  %v5059_v30 = vld [vmem:[%s4998_s7 + $0x40] sm:$0xff] }
 0x18e   : > { %v934_v10 = vmul.f32 1.442695, %v878_v5  ;;  %v936_v14 = vmul.f32 1.442695, %v879_v8  ;;  %v881_v15 = vsub.f32 0.0, %v825_v9  ;;  %v882_v20 = vsub.f32 0.0, %v826_v16 }
 0x18f   : > { %v938_v17 = vmul.f32 1.442695, %v880_v11  ;;  %v883_v21 = vsub.f32 0.0, %v827_v18  ;;  %v828_v25 = vand.u32 2147483647, %v5051_v22  ;;  %v5062_v31 = vld [vmem:[%s4998_s7 + $0x48] sm:$0xff] }
 0x190   : > { %3607 = vpow2.f32 %v934_v10  ;;  %v940_v19 = vmul.f32 1.442695, %v881_v15  ;;  %v942_v24 = vmul.f32 1.442695, %v882_v20  ;;  %v829_v26 = vand.u32 2147483647, %v5054_v23 }
 0x191   : > { %3609 = vpow2.f32 %v936_v14  ;;  %v944_v27 = vmul.f32 1.442695, %v883_v21  ;;  %v884_v28 = vsub.f32 0.0, %v828_v25  ;;  %v830_v32 = vand.u32 2147483647, %v5059_v30  ;;  %v5071_v42 = vld [vmem:[%s4998_s7 + $0x50] sm:$0xff] }
 0x192   : > { %3611 = vpow2.f32 %v938_v17  ;;  %v885_v29 = vsub.f32 0.0, %v829_v26  ;;  %v831_v33 = vand.u32 2147483647, %v5062_v31  ;;  %v1551_v35 = vmax.f32 %v5030_v1, 0.0  ;;  %v5078_v49 = vld [vmem:[%s4998_s7 + $0x58] sm:$0xff]  ;;  %v710_v8 = vld [vmem:[%s4991_s5] sm:$0xff] }
 0x193   : > { %3613 = vpow2.f32 %v940_v19  ;;  %v946_v36 = vmul.f32 1.442695, %v884_v28  ;;  %v1552_v38 = vmax.f32 %v5035_v4, 0.0  ;;  %v1553_v39 = vmax.f32 %v5038_v6, 0.0  ;;  %s5168_s6 = scalar_lea.vmem [#allocation22], %s3430_s12  ;;  %v717_v14 = vld [vmem:[%s4991_s5 + $0x38] sm:$0xff] }
 0x194   : > { %3615 = vpow2.f32 %v942_v24  ;;  %v948_v37 = vmul.f32 1.442695, %v885_v29  ;;  %v886_v40 = vsub.f32 0.0, %v830_v32  ;;  %v887_v41 = vsub.f32 0.0, %v831_v33  ;;  %v712_v24 = vld [vmem:[%s4991_s5 + $0x10] sm:$0xff] }
 0x195   : > { %3617 = vpow2.f32 %v944_v27  ;;  %v1554_v43 = vmax.f32 %v5043_v12, 0.0  ;;  %v1555_v44 = vmax.f32 %v5046_v13, 0.0  ;;  %v1556_v45 = vmax.f32 %v5051_v22, 0.0  ;;  %v1669_v22 = vld [vmem:[%s5004_s13 + $0x38] sm:$0xff] }
 0x196   : > { %3619 = vpow2.f32 %v946_v36  ;;  %v1557_v47 = vmax.f32 %v5054_v23, 0.0  ;;  %v950_v48 = vmul.f32 1.442695, %v886_v40  ;;  %v832_v50 = vand.u32 2147483647, %v5071_v42  ;;  %v5201_v23 = vld [vmem:[%s4998_s7 + $0x78] sm:$0xff] }
 0x197   : > { %3621 = vpow2.f32 %v948_v37  ;;  %v5081_v55 = vmul.f32 1.442695, %v887_v41  ;;  %v833_v63 = vand.u32 2147483647, %v5078_v49 }
 0x198   : > { %3623 = vpow2.f32 %v950_v48  ;;  %v5084_v5 = vsub.f32 0.0, %v832_v50 }
 0x19a   : > { %v3608_v46 = vpop.eup %3607 }
 0x19b   : > { %v3610_v51 = vpop.eup %3609  ;;  %v1046_v52 = vadd.f32 1.0, %v3608_v46  ;;  %v1049_v53 = vmul.f32 -0.5, %v3608_v46  ;;  %v1052_v54 = vand.u32 2147483647, %v3608_v46 }
 0x19c   : > { %v3612_v56 = vpop.eup %3611  ;;  %v1055_v57 = vadd.f32 1.0, %v3610_v51  ;;  %v1058_v58 = vmul.f32 -0.5, %v3610_v51  ;;  %v1061_v59 = vand.u32 2147483647, %v3610_v51 }
 0x19d   : > { %v3614_v60 = vpop.eup %3613  ;;  %3625 = vlog2.f32 %v1046_v52  ;;  %v1050_v61 = vadd.f32 1.0, %v1049_v53  ;;  %v1064_v62 = vadd.f32 1.0, %v3612_v56  ;;  %v1067_v3 = vmul.f32 -0.5, %v3612_v56 }
 0x19e   : > { %3627 = vlog2.f32 %v1055_v57  ;;  %v1059_v2 = vadd.f32 1.0, %v1058_v58  ;;  %v3616_v7 = vpop.eup %3615  ;;  %vm5086_vm0 = vcmp.lt.f32.partialorder %v1052_v54, 0.0004427343  ;;  %v1070_v9 = vand.u32 2147483647, %v3612_v56  ;;  %v715_v58 = vld [vmem:[%s4991_s5 + $0x28] sm:$0xff] }
 0x19f   : > { %3629 = vlog2.f32 %v1064_v62  ;;  %v1073_v10 = vadd.f32 1.0, %v3614_v60  ;;  %v3618_v11 = vpop.eup %3617  ;;  %vm5090_vm1 = vcmp.lt.f32.partialorder %v1061_v59, 0.0004427343  ;;  %v1068_v15 = vadd.f32 1.0, %v1067_v3 }
 0x1a0   : > { %v1076_v16 = vmul.f32 -0.5, %v3614_v60  ;;  %v1079_v17 = vand.u32 2147483647, %v3614_v60  ;;  %v1051_v18 = vmul.f32 %v3608_v46, %v1050_v61  ;;  %v1082_v19 = vadd.f32 1.0, %v3616_v7  ;;  %v3620_v27 = vpop.eup %3619 }
 0x1a1   : > { %3631 = vlog2.f32 %v1073_v10  ;;  %v1085_v20 = vmul.f32 -0.5, %v3616_v7  ;;  %v1060_v21 = vmul.f32 %v3610_v51, %v1059_v2  ;;  %vm5094_vm2 = vcmp.lt.f32.partialorder %v1070_v9, 0.0004427343  ;;  %v3622_v33 = vpop.eup %3621 }
 0x1a2   : > { %v1077_v25 = vadd.f32 1.0, %v1076_v16  ;;  %v1088_v26 = vand.u32 2147483647, %v3616_v7  ;;  %3633 = vlog2.f32 %v1082_v19  ;;  %v1091_v29 = vadd.f32 1.0, %v3618_v11  ;;  %v5102_v51 = vpop.eup %3623  ;;  %v1662_v19 = vld [vmem:[%s5004_s13] sm:$0xff] }
 0x1a3   : > { %v1086_v28 = vadd.f32 1.0, %v1085_v20  ;;  %v1094_v32 = vmul.f32 -0.5, %v3618_v11  ;;  %v1069_v36 = vmul.f32 %v3612_v56, %v1068_v15  ;;  %vm5098_vm3 = vcmp.lt.f32.partialorder %v1079_v17, 0.0004427343 }
 0x1a4   : > { %v1097_v40 = vand.u32 2147483647, %v3618_v11  ;;  %v1100_v41 = vadd.f32 1.0, %v3620_v27  ;;  %v1078_v46 = vmul.f32 %v3614_v60, %v1077_v25  ;;  %3635 = vlog2.f32 %v1091_v29  ;;  %v1663_v29 = vld [vmem:[%s5004_s13 + $0x8] sm:$0xff] }
 0x1a5   : > { %v1095_v48 = vadd.f32 1.0, %v1094_v32  ;;  %v1103_v50 = vmul.f32 -0.5, %v3620_v27  ;;  %vm5104_vm4 = vcmp.lt.f32.partialorder %v1088_v26, 0.0004427343  ;;  %v1106_v53 = vand.u32 2147483647, %v3620_v27 }
 0x1a6   : > { %3637 = vlog2.f32 %v1100_v41  ;;  %v1109_v54 = vadd.f32 1.0, %v3622_v33  ;;  %v1087_v57 = vmul.f32 %v3616_v7, %v1086_v28  ;;  %vm5108_vm5 = vcmp.lt.f32.partialorder %v1097_v40, 0.0004427343  ;;  %v1664_v41 = vld [vmem:[%s5004_s13 + $0x10] sm:$0xff] }
 0x1a7   : > { %v3626_v56 = vpop.eup %3625  ;;  %v1104_v59 = vadd.f32 1.0, %v1103_v50  ;;  %v1112_v60 = vmul.f32 -0.5, %v3622_v33  ;;  %v1115_v2 = vand.u32 2147483647, %v3622_v33  ;;  %v1118_v3 = vadd.f32 1.0, %v5102_v51  ;;  %v1665_v50 = vld [vmem:[%s5004_s13 + $0x18] sm:$0xff] }
 0x1a8   : > { %v3628_v61 = vpop.eup %3627  ;;  %v1048_v62 = vmul.f32 0.6931472, %v3626_v56  ;;  %3639 = vlog2.f32 %v1109_v54  ;;  %v1096_v15 = vmul.f32 %v3618_v11, %v1095_v48  ;;  %vm5113_vm6 = vcmp.lt.f32.partialorder %v1106_v53, 0.0004427343 }
 0x1a9   : > { %v3630_v9 = vpop.eup %3629  ;;  %v1057_v10 = vmul.f32 0.6931472, %v3628_v61  ;;  %v1113_v7 = vadd.f32 1.0, %v1112_v60  ;;  %3641 = vpow2.f32 %v5081_v55  ;;  %v1121_v25 = vmul.f32 -0.5, %v5102_v51 }
 0x1aa   : > { %v1054_v17 = vsel %vm5086_vm0, %v1051_v18, %v1048_v62  ;;  %v1066_v20 = vmul.f32 0.6931472, %v3630_v9  ;;  %v1105_v32 = vmul.f32 %v3620_v27, %v1104_v59  ;;  %3643 = vlog2.f32 %v1118_v3  ;;  %v713_v62 = vld [vmem:[%s4991_s5 + $0x18] sm:$0xff] }
 0x1ab   : > { %v3632_v26 = vpop.eup %3631  ;;  %v1063_v11 = vsel %vm5090_vm1, %v1060_v21, %v1057_v10  ;;  %v1606_v28 = vadd.f32 %v1550_v34, %v1054_v17  ;;  %vm5133_vm7 = vcmp.lt.f32.partialorder %v1115_v2, 0.0004427343  ;;  %v711_v34 = vld [vmem:[%s4991_s5 + $0x8] sm:$0xff]  ;;  %v1114_v1 = vmul.f32 %v3622_v33, %v1113_v7  ;;  %v1666_v2 = vld [vmem:[%s5004_s13 + $0x20] sm:$0xff] }
 0x1ac   : > { %v1607_v18 = vadd.f32 %v1551_v35, %v1063_v11  ;;  %v1072_v55 = vsel %vm5094_vm2, %v1069_v36, %v1066_v20  ;;  %v1075_v40 = vmul.f32 0.6931472, %v3632_v26  ;;  %v3634_v0 = vpop.eup %3633  ;;  %v1122_v48 = vadd.f32 1.0, %v1121_v25  ;;  %v714_v17 = vld [vmem:[%s4991_s5 + $0x20] sm:$0xff] }
 0x1ad   : > { %v1718_v21 = vmul.f32 %v1662_v19, %v1606_v28  ;;  %v1608_v27 = vadd.f32 %v1552_v38, %v1072_v55  ;;  %v1084_v53 = vmul.f32 0.6931472, %v3634_v0  ;;  %v889_v54 = vsub.f32 0.0, %v833_v63 }
 0x1ae   : > { %v1719_v35 = vmul.f32 %v1663_v29, %v1607_v18  ;;  %v1081_v36 = vsel %vm5098_vm3, %v1078_v46, %v1075_v40  ;;  %v3636_v56 = vpop.eup %3635  ;;  %v1124_v33 = vand.u32 2147483647, %v5102_v51  ;;  %v954_v63 = vmul.f32 1.442695, %v5084_v5  ;;  %v716_v18 = vld [vmem:[%s4991_s5 + $0x30] sm:$0xff] }
 0x1af   : > { %v1774_v59 = vadd.f32 %v1718_v21, %v710_v8  ;;  %v1609_v4 = vadd.f32 %v1553_v39, %v1081_v36  ;;  %v1720_v38 = vmul.f32 %v1664_v41, %v1608_v27  ;;  %v1090_v37 = vsel %vm5104_vm4, %v1087_v57, %v1084_v53  ;;  %v1667_v57 = vld [vmem:[%s5004_s13 + $0x28] sm:$0xff]  ;;  %v5176_v8 = vld [vmem:[%s4998_s7 + $0x60] sm:$0xff] }
 0x1b0   : > { %v3638_v60 = vpop.eup %3637  ;;  %v1775_v61 = vadd.f32 %v1719_v35, %v711_v34  ;;  %v1093_v46 = vmul.f32 0.6931472, %v3636_v56  ;;  %v1610_v6 = vadd.f32 %v1554_v43, %v1090_v37  ;;  %3645 = vpow2.f32 %v954_v63  ;;  %v1668_v43 = vld [vmem:[%s5004_s13 + $0x30] sm:$0xff]  ;;  %v5190_v21 = vld [vmem:[%s4998_s7 + $0x68] sm:$0xff] }
 0x1b1   : > { %v1721_v3 = vmul.f32 %v1665_v50, %v1609_v4  ;;  %v1776_v9 = vadd.f32 %v1720_v38, %v712_v24  ;;  %v1102_v39 = vmul.f32 0.6931472, %v3638_v60  ;;  %v956_v19 = vmul.f32 1.442695, %v889_v54 }
 0x1b2   : > { %v3640_v10 = vpop.eup %3639  ;;  %v3265_v7 = vpack.c.bf16 %v1775_v61, %v1774_v59  ;;  %v1099_v52 = vsel %vm5108_vm5, %v1096_v15, %v1093_v46  ;;  %v1722_v25 = vmul.f32 %v1666_v2, %v1610_v6  ;;  %vm5182_vm8 = vcmp.lt.f32.partialorder %v1124_v33, 0.0004427343 }
 0x1b3   : > { %v1777_v20 = vadd.f32 %v1721_v3, %v713_v62  ;;  %v1611_v5 = vadd.f32 %v1555_v44, %v1099_v52  ;;  %v1108_v12 = vsel %vm5113_vm6, %v1105_v32, %v1102_v39  ;;  %v3642_v26 = vpop.eup %3641  ;;  %v1111_v15 = vmul.f32 0.6931472, %v3640_v10 }
 0x1b4   : > { %1998 = vst [vmem:[%s5168_s6] sm:$0xff] %v3265_v7  ;;  %v1612_v13 = vadd.f32 %v1556_v45, %v1108_v12  ;;  %v1123_v44 = vmul.f32 %v5102_v51, %v1122_v48  ;;  %3647 = vpow2.f32 %v956_v19  ;;  %v3644_v16 = vpop.eup %3643  ;;  %v1778_v29 = vadd.f32 %v1722_v25, %v714_v17  ;;  %v5196_v48 = vld [vmem:[%s4998_s7 + $0x70] sm:$0xff]  ;;  %v5219_v25 = vld [vmem:[%s4998_s7 + $0x80] sm:$0xff] }
 0x1b5   : > { %v3266_v11 = vpack.c.bf16 %v1777_v20, %v1776_v9  ;;  %v1723_v28 = vmul.f32 %v1667_v57, %v1611_v5  ;;  %v1127_v32 = vadd.f32 1.0, %v3642_v26  ;;  %v1117_v55 = vsel %vm5133_vm7, %v1114_v1, %v1111_v15  ;;  %v718_v57 = vld [vmem:[%s4991_s5 + $0x40] sm:$0xff] }
 0x1b6   : > { %v1724_v40 = vmul.f32 %v1668_v43, %v1612_v13  ;;  %v1120_v45 = vmul.f32 0.6931472, %v3644_v16  ;;  %v1613_v0 = vadd.f32 %v1557_v47, %v1117_v55  ;;  %v1130_v34 = vmul.f32 -0.5, %v3642_v26  ;;  %v1671_v55 = vld [vmem:[%s5004_s13 + $0x48] sm:$0xff] }
 0x1b7   : > { %1999 = vst [vmem:[%s5168_s6 + $0x8] sm:$0xff] %v3266_v11  ;;  %v1779_v41 = vadd.f32 %v1723_v28, %v715_v58  ;;  %3649 = vlog2.f32 %v1127_v32  ;;  %v1558_v27 = vmax.f32 %v5059_v30, 0.0  ;;  %v834_v1 = vand.u32 2147483647, %v5176_v8  ;;  %v5227_v32 = vld [vmem:[%s4998_s7 + $0x90] sm:$0xff] }
 0x1b8   : > { %v1725_v24 = vmul.f32 %v1669_v22, %v1613_v0  ;;  %v1780_v36 = vadd.f32 %v1724_v40, %v716_v18  ;;  %v1126_v50 = vsel %vm5182_vm8, %v1123_v44, %v1120_v45  ;;  %v1133_v47 = vand.u32 2147483647, %v3642_v26  ;;  %v5235_v45 = vld [vmem:[%s4998_s7 + $0x98] sm:$0xff] }
 0x1b9   : > { %v3267_v35 = vpack.c.bf16 %v1779_v41, %v1778_v29  ;;  %v1559_v53 = vmax.f32 %v5062_v31, 0.0  ;;  %v835_v54 = vand.u32 2147483647, %v5190_v21  ;;  %v890_v56 = vsub.f32 0.0, %v834_v1  ;;  %v1670_v31 = vld [vmem:[%s5004_s13 + $0x40] sm:$0xff] }
 0x1ba   : > { %v1781_v30 = vadd.f32 %v1725_v24, %v717_v14  ;;  %v1131_v59 = vadd.f32 1.0, %v1130_v34  ;;  %v1560_v4 = vmax.f32 %v5071_v42, 0.0  ;;  %v836_v38 = vand.u32 2147483647, %v5196_v48  ;;  %v3646_v33 = vpop.eup %3645  ;;  %v719_v14 = vld [vmem:[%s4991_s5 + $0x48] sm:$0xff] }
 0x1bb   : > { %2000 = vst [vmem:[%s5168_s6 + $0x10] sm:$0xff] %v3267_v35  ;;  %v1614_v60 = vadd.f32 %v1558_v27, %v1126_v50  ;;  %v891_v61 = vsub.f32 0.0, %v835_v54  ;;  %v958_v62 = vmul.f32 1.442695, %v890_v56  ;;  %v837_v37 = vand.u32 2147483647, %v5201_v23 }
 0x1bc   : > { %v3268_v46 = vpack.c.bf16 %v1781_v30, %v1780_v36  ;;  %v1136_v2 = vadd.f32 1.0, %v3646_v33  ;;  %v1139_v63 = vmul.f32 -0.5, %v3646_v33  ;;  %v1561_v3 = vmax.f32 %v5078_v49, 0.0 }
 0x1bd   : > { %vm5211_vm9 = vcmp.lt.f32.partialorder %v1133_v47, 0.0004427343  ;;  %3651 = vpow2.f32 %v958_v62  ;;  %v960_v39 = vmul.f32 1.442695, %v891_v61  ;;  %v892_v10 = vsub.f32 0.0, %v836_v38 }
 0x1be   : > { %v3648_v9 = vpop.eup %3647  ;;  %2001 = vst [vmem:[%s5168_s6 + $0x18] sm:$0xff] %v3268_v46  ;;  %v1132_v7 = vmul.f32 %v3642_v26, %v1131_v59  ;;  %3653 = vlog2.f32 %v1136_v2  ;;  %v1726_v19 = vmul.f32 %v1670_v31, %v1614_v60  ;;  %v1562_v20 = vmax.f32 %v5176_v8, 0.0  ;;  %v5222_v26 = vld [vmem:[%s4998_s7 + $0x88] sm:$0xff]  ;;  %v722_v8 = vld [vmem:[%s4991_s5 + $0x60] sm:$0xff] }
 0x1bf   : > { %v1145_v17 = vadd.f32 1.0, %v3648_v9  ;;  %v1148_v52 = vmul.f32 -0.5, %v3648_v9  ;;  %3655 = vpow2.f32 %v960_v39  ;;  %v893_v5 = vsub.f32 0.0, %v837_v37  ;;  %v5256_v31 = vld [vmem:[%s4998_s7 + $0xa8] sm:$0xff] }
 0x1c0   : > { %v1140_v43 = vadd.f32 1.0, %v1139_v63  ;;  %v1142_v58 = vand.u32 2147483647, %v3646_v33  ;;  %v962_v15 = vmul.f32 1.442695, %v892_v10  ;;  %v1563_v28 = vmax.f32 %v5190_v21, 0.0 }
 0x1c1   : > { %v3650_v12 = vpop.eup %3649  ;;  %3657 = vlog2.f32 %v1145_v17  ;;  %v1151_v44 = vand.u32 2147483647, %v3648_v9  ;;  %v964_v16 = vmul.f32 1.442695, %v893_v5  ;;  %v1149_v11 = vadd.f32 1.0, %v1148_v52 }
 0x1c2   : > { %v1129_v13 = vmul.f32 0.6931472, %v3650_v12  ;;  %3659 = vpow2.f32 %v962_v15  ;;  %v838_v29 = vand.u32 2147483647, %v5219_v25  ;;  %v1564_v22 = vmax.f32 %v5196_v48, 0.0 }
 0x1c3   : > { %3661 = vpow2.f32 %v964_v16  ;;  %v839_v40 = vand.u32 2147483647, %v5222_v26  ;;  %v1782_v41 = vadd.f32 %v1726_v19, %v718_v57  ;;  %vm5237_vm10 = vcmp.lt.f32.partialorder %v1142_v58, 0.0004427343  ;;  %v1672_v19 = vld [vmem:[%s5004_s13 + $0x50] sm:$0xff] }
 0x1c4   : > { %v1135_v18 = vsel %vm5211_vm9, %v1132_v7, %v1129_v13  ;;  %v894_v34 = vsub.f32 0.0, %v838_v29  ;;  %v1141_v27 = vmul.f32 %v3646_v33, %v1140_v43  ;;  %vm5242_vm11 = vcmp.lt.f32.partialorder %v1151_v44, 0.0004427343  ;;  %v5253_v33 = vld [vmem:[%s4998_s7 + $0xa0] sm:$0xff]  ;;  %v720_v16 = vld [vmem:[%s4991_s5 + $0x50] sm:$0xff]  ;;  %v1673_v29 = vld [vmem:[%s5004_s13 + $0x58] sm:$0xff] }
 0x1c5   : > { %v1615_v51 = vadd.f32 %v1559_v53, %v1135_v18  ;;  %v895_v35 = vsub.f32 0.0, %v839_v40  ;;  %v840_v24 = vand.u32 2147483647, %v5227_v32  ;;  %v1150_v50 = vmul.f32 %v3648_v9, %v1149_v11 }
 0x1c6   : > { %v966_v47 = vmul.f32 1.442695, %v894_v34  ;;  %v841_v53 = vand.u32 2147483647, %v5235_v45  ;;  %v1565_v56 = vmax.f32 %v5201_v23, 0.0  ;;  %v1566_v30 = vmax.f32 %v5219_v25, 0.0 }
 0x1c7   : > { %v1727_v36 = vmul.f32 %v1671_v55, %v1615_v51  ;;  %v3652_v54 = vpop.eup %3651  ;;  %v1567_v59 = vmax.f32 %v5222_v26, 0.0  ;;  %v1568_v38 = vmax.f32 %v5227_v32, 0.0  ;;  %v968_v46 = vmul.f32 1.442695, %v895_v35 }
 0x1c8   : > { %v3654_v60 = vpop.eup %3653  ;;  %v1154_v62 = vadd.f32 1.0, %v3652_v54  ;;  %v1157_v37 = vmul.f32 -0.5, %v3652_v54  ;;  %3663 = vpow2.f32 %v966_v47  ;;  %v896_v9 = vsub.f32 0.0, %v840_v24  ;;  %v1676_v47 = vld [vmem:[%s5004_s13 + $0x70] sm:$0xff] }
 0x1c9   : > { %v1783_v61 = vadd.f32 %v1727_v36, %v719_v14  ;;  %v5258_v2 = vpop.eup %3655  ;;  %v1138_v63 = vmul.f32 0.6931472, %v3654_v60  ;;  %v1569_v6 = vmax.f32 %v5235_v45, 0.0  ;;  %v897_v7 = vsub.f32 0.0, %v841_v53 }
 0x1ca   : > { %3665 = vlog2.f32 %v1154_v62  ;;  %v842_v17 = vand.u32 2147483647, %v5253_v33  ;;  %v1163_v5 = vadd.f32 1.0, %v5258_v2  ;;  %v843_v12 = vand.u32 2147483647, %v5256_v31 }
 0x1cb   : > { %v3658_v39 = vpop.eup %3657  ;;  %v3269_v10 = vpack.c.bf16 %v1783_v61, %v1782_v41  ;;  %v1144_v52 = vsel %vm5237_vm10, %v1141_v27, %v1138_v63  ;;  %v1158_v15 = vadd.f32 1.0, %v1157_v37  ;;  %v1160_v13 = vand.u32 2147483647, %v3652_v54  ;;  %v721_v41 = vld [vmem:[%s4991_s5 + $0x58] sm:$0xff] }
 0x1cc   : > { %v1147_v57 = vmul.f32 0.6931472, %v3658_v39  ;;  %v5267_v43 = vpop.eup %3659  ;;  %v1616_v58 = vadd.f32 %v1560_v4, %v1144_v52  ;;  %3667 = vpow2.f32 %v968_v46  ;;  %v1166_v18 = vmul.f32 -0.5, %v5258_v2  ;;  %v5293_v52 = vld [vmem:[%s4998_s7 + $0xb0] sm:$0xff] }
 0x1cd   : > { %2002 = vst [vmem:[%s5168_s6 + $0x20] sm:$0xff] %v3269_v10  ;;  %v3662_v44 = vpop.eup %3661  ;;  %3669 = vlog2.f32 %v1163_v5  ;;  %v1172_v55 = vadd.f32 1.0, %v5267_v43  ;;  %v1169_v4 = vand.u32 2147483647, %v5258_v2  ;;  %v970_v51 = vmul.f32 1.442695, %v896_v9 }
 0x1ce   : > { %v1153_v11 = vsel %vm5242_vm11, %v1150_v50, %v1147_v57  ;;  %v1728_v42 = vmul.f32 %v1672_v19, %v1616_v58  ;;  %v1175_v0 = vmul.f32 -0.5, %v5267_v43  ;;  %v1181_v34 = vadd.f32 1.0, %v3662_v44 }
 0x1cf   : > { %v1617_v40 = vadd.f32 %v1561_v3, %v1153_v11  ;;  %3671 = vlog2.f32 %v1172_v55  ;;  %v972_v14 = vmul.f32 1.442695, %v897_v7  ;;  %v1159_v35 = vmul.f32 %v3652_v54, %v1158_v15 }
 0x1d0   : > { %v1784_v1 = vadd.f32 %v1728_v42, %v720_v16  ;;  %vm5283_vm12 = vcmp.lt.f32.partialorder %v1160_v13, 0.0004427343  ;;  %v1167_v36 = vadd.f32 1.0, %v1166_v18  ;;  %3673 = vlog2.f32 %v1181_v34  ;;  %v1674_v13 = vld [vmem:[%s5004_s13 + $0x60] sm:$0xff] }
 0x1d1   : > { %v1729_v27 = vmul.f32 %v1673_v29, %v1617_v40  ;;  %v1184_v49 = vmul.f32 -0.5, %v3662_v44  ;;  %v898_v3 = vsub.f32 0.0, %v842_v17  ;;  %vm5287_vm13 = vcmp.lt.f32.partialorder %v1169_v4, 0.0004427343 }
 0x1d2   : > { %v1178_v53 = vand.u32 2147483647, %v5267_v43  ;;  %3675 = vpow2.f32 %v970_v51  ;;  %v3664_v60 = vpop.eup %3663  ;;  %v1176_v54 = vadd.f32 1.0, %v1175_v0  ;;  %v899_v61 = vsub.f32 0.0, %v843_v12  ;;  %v5317_v0 = vld [vmem:[%s4998_s7 + $0xb8] sm:$0xff] }
 0x1d3   : > { %v1785_v50 = vadd.f32 %v1729_v27, %v721_v41  ;;  %3677 = vpow2.f32 %v972_v14  ;;  %v974_v62 = vmul.f32 1.442695, %v898_v3  ;;  %v1187_v63 = vand.u32 2147483647, %v3662_v44 }
 0x1d4   : > { %v3666_v37 = vpop.eup %3665  ;;  %v1190_v9 = vadd.f32 1.0, %v3664_v60  ;;  %v1193_v39 = vmul.f32 -0.5, %v3664_v60  ;;  %v1185_v7 = vadd.f32 1.0, %v1184_v49  ;;  %v1196_v17 = vand.u32 2147483647, %v3664_v60 }
 0x1d5   : > { %v3270_v46 = vpack.c.bf16 %v1785_v50, %v1784_v1  ;;  %v1156_v10 = vmul.f32 0.6931472, %v3666_v37  ;;  %3679 = vpow2.f32 %v974_v62  ;;  %v1168_v19 = vmul.f32 %v5258_v2, %v1167_v36  ;;  %v723_v1 = vld [vmem:[%s4991_s5 + $0x68] sm:$0xff]  ;;  %v724_v37 = vld [vmem:[%s4991_s5 + $0x70] sm:$0xff] }
 0x1d6   : > { %v3668_v57 = vpop.eup %3667  ;;  %vm5297_vm14 = vcmp.lt.f32.partialorder %v1178_v53, 0.0004427343  ;;  %3681 = vlog2.f32 %v1190_v9  ;;  %v1194_v12 = vadd.f32 1.0, %v1193_v39  ;;  %v976_v29 = vmul.f32 1.442695, %v899_v61 }
 0x1d7   : > { %2003 = vst [vmem:[%s5168_s6 + $0x28] sm:$0xff] %v3270_v46  ;;  %v3670_v58 = vpop.eup %3669  ;;  %v1162_v15 = vsel %vm5283_vm12, %v1159_v35, %v1156_v10  ;;  %v1199_v16 = vadd.f32 1.0, %v3668_v57  ;;  %v1202_v11 = vmul.f32 -0.5, %v3668_v57  ;;  %v1177_v55 = vmul.f32 %v5267_v43, %v1176_v54  ;;  %v1675_v43 = vld [vmem:[%s5004_s13 + $0x68] sm:$0xff] }
 0x1d8   : > { %v1165_v18 = vmul.f32 0.6931472, %v3670_v58  ;;  %v1618_v2 = vadd.f32 %v1562_v20, %v1162_v15  ;;  %v844_v40 = vand.u32 2147483647, %v5293_v52  ;;  %v1186_v4 = vmul.f32 %v3662_v44, %v1185_v7 }
 0x1d9   : > { %v3672_v42 = vpop.eup %3671  ;;  %vm5308_vm15 = vcmp.lt.f32.partialorder %v1187_v63, 0.0004427343  ;;  %vm5312_vm0 = vcmp.lt.f32.partialorder %v1196_v17, 0.0004427343  ;;  %3683 = vlog2.f32 %v1199_v16  ;;  %v1195_v44 = vmul.f32 %v3664_v60, %v1194_v12  ;;  %v1677_v63 = vld [vmem:[%s5004_s13 + $0x78] sm:$0xff] }
 0x1da   : > { %v1171_v20 = vsel %vm5287_vm13, %v1168_v19, %v1165_v18  ;;  %v1730_v34 = vmul.f32 %v1674_v13, %v1618_v2  ;;  %v1174_v14 = vmul.f32 0.6931472, %v3672_v42  ;;  %v3674_v27 = vpop.eup %3673  ;;  %v1203_v24 = vadd.f32 1.0, %v1202_v11  ;;  %v1678_v42 = vld [vmem:[%s5004_s13 + $0x80] sm:$0xff] }
 0x1db   : > { %v1619_v35 = vadd.f32 %v1563_v28, %v1171_v20  ;;  %v1205_v36 = vand.u32 2147483647, %v3668_v57  ;;  %3685 = vpow2.f32 %v976_v29  ;;  %v1183_v50 = vmul.f32 0.6931472, %v3674_v27  ;;  %v726_v27 = vld [vmem:[%s4991_s5 + $0x80] sm:$0xff] }
 0x1dc   : > { %v5326_v49 = vpop.eup %3675  ;;  %v1180_v3 = vsel %vm5297_vm14, %v1177_v55, %v1174_v14  ;;  %v845_v53 = vand.u32 2147483647, %v5317_v0  ;;  %v900_v60 = vsub.f32 0.0, %v844_v40  ;;  %v1786_v21 = vadd.f32 %v1730_v34, %v722_v8 }
 0x1dd   : > { %v3678_v54 = vpop.eup %3677  ;;  %v1731_v61 = vmul.f32 %v1675_v43, %v1619_v35  ;;  %v1620_v28 = vadd.f32 %v1564_v22, %v1180_v3  ;;  %v1208_v62 = vadd.f32 1.0, %v5326_v49  ;;  %v1189_v46 = vsel %vm5308_vm15, %v1186_v4, %v1183_v50  ;;  %v725_v22 = vld [vmem:[%s4991_s5 + $0x78] sm:$0xff]  ;;  %v1679_v35 = vld [vmem:[%s5004_s13 + $0x88] sm:$0xff] }
 0x1de   : > { %v1211_v9 = vmul.f32 -0.5, %v5326_v49  ;;  %v1217_v39 = vadd.f32 1.0, %v3678_v54  ;;  %v1220_v10 = vmul.f32 -0.5, %v3678_v54  ;;  %v1621_v19 = vadd.f32 %v1565_v56, %v1189_v46 }
 0x1df   : > { %v5340_v7 = vpop.eup %3679  ;;  %v1787_v17 = vadd.f32 %v1731_v61, %v723_v1  ;;  %v1732_v5 = vmul.f32 %v1676_v47, %v1620_v28  ;;  %3687 = vlog2.f32 %v1208_v62  ;;  %v1204_v12 = vmul.f32 %v3668_v57, %v1203_v24  ;;  %v727_v61 = vld [vmem:[%s4991_s5 + $0x88] sm:$0xff] }
 0x1e0   : > { %v3682_v48 = vpop.eup %3681  ;;  %vm5345_vm1 = vcmp.lt.f32.partialorder %v1205_v36, 0.0004427343  ;;  %3689 = vlog2.f32 %v1217_v39  ;;  %v978_v15 = vmul.f32 1.442695, %v900_v60  ;;  %v1733_v16 = vmul.f32 %v1677_v63, %v1621_v19  ;;  %v5379_v60 = vld [vmem:[%s4998_s7 + $0xc8] sm:$0xff]  ;;  %v5392_v63 = vld [vmem:[%s4998_s7 + $0xd0] sm:$0xff] }
 0x1e1   : > { %v3271_v13 = vpack.c.bf16 %v1787_v17, %v1786_v21  ;;  %v1788_v11 = vadd.f32 %v1732_v5, %v724_v37  ;;  %v1192_v29 = vmul.f32 0.6931472, %v3682_v48  ;;  %v1212_v18 = vadd.f32 1.0, %v1211_v9  ;;  %v5395_v9 = vld [vmem:[%s4998_s7 + $0xd8] sm:$0xff] }
 0x1e2   : > { %v1214_v23 = vand.u32 2147483647, %v5326_v49  ;;  %v1226_v56 = vadd.f32 1.0, %v5340_v7  ;;  %v901_v2 = vsub.f32 0.0, %v845_v53  ;;  %v1789_v57 = vadd.f32 %v1733_v16, %v725_v22  ;;  %v5376_v53 = vld [vmem:[%s4998_s7 + $0xc0] sm:$0xff] }
 0x1e3   : > { %v3684_v55 = vpop.eup %3683  ;;  %2004 = vst [vmem:[%s5168_s6 + $0x30] sm:$0xff] %v3271_v13  ;;  %v1198_v40 = vsel %vm5312_vm0, %v1195_v44, %v1192_v29  ;;  %v1221_v4 = vadd.f32 1.0, %v1220_v10  ;;  %v1229_v51 = vmul.f32 -0.5, %v5340_v7  ;;  %v1223_v43 = vand.u32 2147483647, %v3678_v54 }
 0x1e4   : > { %v1201_v8 = vmul.f32 0.6931472, %v3684_v55  ;;  %v1622_v20 = vadd.f32 %v1566_v30, %v1198_v40  ;;  %3691 = vlog2.f32 %v1226_v56  ;;  %v3272_v14 = vpack.c.bf16 %v1789_v57, %v1788_v11  ;;  %v728_v56 = vld [vmem:[%s4991_s5 + $0x90] sm:$0xff] }
 0x1e5   : > { %v5358_v34 = vpop.eup %3685  ;;  %v1232_v41 = vand.u32 2147483647, %v5340_v7  ;;  %v1570_v44 = vmax.f32 %v5253_v33, 0.0  ;;  %3693 = vpow2.f32 %v978_v15  ;;  %vm5366_vm2 = vcmp.lt.f32.partialorder %v1214_v23, 0.0004427343 }
 0x1e6   : > { %v1207_v1 = vsel %vm5345_vm1, %v1204_v12, %v1201_v8  ;;  %v1734_v25 = vmul.f32 %v1678_v42, %v1622_v20  ;;  %v1235_v24 = vadd.f32 1.0, %v5358_v34  ;;  %2005 = vst [vmem:[%s5168_s6 + $0x38] sm:$0xff] %v3272_v14  ;;  %v1230_v3 = vadd.f32 1.0, %v1229_v51  ;;  %v1680_v12 = vld [vmem:[%s5004_s13 + $0x90] sm:$0xff] }
 0x1e7   : > { %v1623_v36 = vadd.f32 %v1567_v59, %v1207_v1  ;;  %v1238_v50 = vmul.f32 -0.5, %v5358_v34  ;;  %v980_v47 = vmul.f32 1.442695, %v901_v2  ;;  %v1213_v21 = vmul.f32 %v5326_v49, %v1212_v18  ;;  %v1681_v18 = vld [vmem:[%s5004_s13 + $0x98] sm:$0xff] }
 0x1e8   : > { %v1222_v28 = vmul.f32 %v3678_v54, %v1221_v4  ;;  %vm5383_vm3 = vcmp.lt.f32.partialorder %v1223_v43, 0.0004427343  ;;  %3695 = vlog2.f32 %v1235_v24  ;;  %v1790_v37 = vadd.f32 %v1734_v25, %v726_v27  ;;  %v729_v4 = vld [vmem:[%s4991_s5 + $0x98] sm:$0xff]  ;;  %v1682_v27 = vld [vmem:[%s5004_s13 + $0xa0] sm:$0xff] }
 0x1e9   : > { %v3688_v26 = vpop.eup %3687  ;;  %v1735_v59 = vmul.f32 %v1679_v35, %v1623_v36  ;;  %vm5387_vm4 = vcmp.lt.f32.partialorder %v1232_v41, 0.0004427343  ;;  %3697 = vpow2.f32 %v980_v47  ;;  %v846_v39 = vand.u32 2147483647, %v5376_v53 }
 0x1ea   : > { %v3690_v49 = vpop.eup %3689  ;;  %v1210_v54 = vmul.f32 0.6931472, %v3688_v26  ;;  %v847_v10 = vand.u32 2147483647, %v5379_v60  ;;  %v1231_v5 = vmul.f32 %v5340_v7, %v1230_v3  ;;  %v1239_v48 = vadd.f32 1.0, %v1238_v50 }
 0x1eb   : > { %v1791_v17 = vadd.f32 %v1735_v59, %v727_v61  ;;  %v1219_v19 = vmul.f32 0.6931472, %v3690_v49  ;;  %v902_v58 = vsub.f32 0.0, %v846_v39  ;;  %v848_v13 = vand.u32 2147483647, %v5392_v63  ;;  %v5437_v59 = vld [vmem:[%s4998_s7 + $0xe8] sm:$0xff] }
 0x1ec   : > { %v1216_v22 = vsel %vm5366_vm2, %v1213_v21, %v1210_v54  ;;  %v903_v15 = vsub.f32 0.0, %v847_v10  ;;  %v849_v7 = vand.u32 2147483647, %v5395_v9  ;;  %v1241_v55 = vand.u32 2147483647, %v5358_v34  ;;  %v5428_v21 = vld [vmem:[%s4998_s7 + $0xe0] sm:$0xff] }
 0x1ed   : > { %v3273_v16 = vpack.c.bf16 %v1791_v17, %v1790_v37  ;;  %v1225_v11 = vsel %vm5383_vm3, %v1222_v28, %v1219_v19  ;;  %v1624_v29 = vadd.f32 %v1568_v38, %v1216_v22  ;;  %v982_v57 = vmul.f32 1.442695, %v902_v58  ;;  %v730_v28 = vld [vmem:[%s4991_s5 + $0xa0] sm:$0xff]  ;;  %v5441_v54 = vld [vmem:[%s4998_s7 + $0xf0] sm:$0xff]  ;;  %v731_v39 = vld [vmem:[%s4991_s5 + $0xa8] sm:$0xff] }
 0x1ee   : > { %v3692_v23 = vpop.eup %3691  ;;  %v1625_v2 = vadd.f32 %v1569_v6, %v1225_v11  ;;  %v904_v40 = vsub.f32 0.0, %v848_v13  ;;  %v984_v32 = vmul.f32 1.442695, %v903_v15  ;;  %v905_v38 = vsub.f32 0.0, %v849_v7  ;;  %v5450_v13 = vld [vmem:[%s4998_s7 + $0xf8] sm:$0xff] }
 0x1ef   : > { %v3694_v42 = vpop.eup %3693  ;;  %2006 = vst [vmem:[%s5168_s6 + $0x40] sm:$0xff] %v3273_v16  ;;  %v1736_v51 = vmul.f32 %v1680_v12, %v1624_v29  ;;  %v1228_v8 = vmul.f32 0.6931472, %v3692_v23  ;;  %v1240_v43 = vmul.f32 %v5358_v34, %v1239_v48  ;;  %v1571_v14 = vmax.f32 %v5256_v31, 0.0 }
 0x1f0   : > { %v1737_v20 = vmul.f32 %v1681_v18, %v1625_v2  ;;  %v1244_v41 = vadd.f32 1.0, %v3694_v42  ;;  %3699 = vpow2.f32 %v982_v57  ;;  %v986_v1 = vmul.f32 1.442695, %v904_v40 }
 0x1f1   : > { %v1792_v45 = vadd.f32 %v1736_v51, %v728_v56  ;;  %v1234_v6 = vsel %vm5387_vm4, %v1231_v5, %v1228_v8  ;;  %vm5421_vm5 = vcmp.lt.f32.partialorder %v1241_v55, 0.0004427343  ;;  %v1247_v36 = vmul.f32 -0.5, %v3694_v42 }
 0x1f2   : > { %v3696_v35 = vpop.eup %3695  ;;  %v1793_v25 = vadd.f32 %v1737_v20, %v729_v4  ;;  %v1626_v31 = vadd.f32 %v1570_v44, %v1234_v6  ;;  %3701 = vlog2.f32 %v1244_v41  ;;  %v988_v3 = vmul.f32 1.442695, %v905_v38  ;;  %v1683_v44 = vld [vmem:[%s5004_s13 + $0xa8] sm:$0xff]  ;;  %v5465_v38 = vld [vmem:[%s4998_s7 + $0x100] sm:$0xff] }
 0x1f3   : > { %v3698_v34 = vpop.eup %3697  ;;  %v1237_v24 = vmul.f32 0.6931472, %v3696_v35  ;;  %3703 = vpow2.f32 %v984_v32  ;;  %v1572_v62 = vmax.f32 %v5293_v52, 0.0  ;;  %v1573_v26 = vmax.f32 %v5317_v0, 0.0  ;;  %v1684_v35 = vld [vmem:[%s5004_s13 + $0xb0] sm:$0xff] }
 0x1f4   : > { %v3274_v50 = vpack.c.bf16 %v1793_v25, %v1792_v45  ;;  %v1738_v47 = vmul.f32 %v1682_v27, %v1626_v31  ;;  %v1253_v61 = vadd.f32 1.0, %v3698_v34  ;;  %3705 = vpow2.f32 %v986_v1 }
 0x1f5   : > { %v1243_v33 = vsel %vm5421_vm5, %v1240_v43, %v1237_v24  ;;  %v1250_v46 = vand.u32 2147483647, %v3694_v42  ;;  %v1256_v49 = vmul.f32 -0.5, %v3698_v34  ;;  %v1248_v10 = vadd.f32 1.0, %v1247_v36 }
 0x1f6   : > { %2007 = vst [vmem:[%s5168_s6 + $0x48] sm:$0xff] %v3274_v50  ;;  %v1627_v37 = vadd.f32 %v1571_v14, %v1243_v33  ;;  %3707 = vlog2.f32 %v1253_v61  ;;  %v1259_v17 = vand.u32 2147483647, %v3698_v34  ;;  %v850_v19 = vand.u32 2147483647, %v5428_v21  ;;  %v732_v33 = vld [vmem:[%s4991_s5 + $0xb0] sm:$0xff] }
 0x1f7   : > { %3709 = vpow2.f32 %v988_v3  ;;  %v1794_v5 = vadd.f32 %v1738_v47, %v730_v28  ;;  %v1574_v48 = vmax.f32 %v5376_v53, 0.0  ;;  %v851_v22 = vand.u32 2147483647, %v5437_v59 }
 0x1f8   : > { %v1739_v52 = vmul.f32 %v1683_v44, %v1627_v37  ;;  %v1575_v12 = vmax.f32 %v5379_v60, 0.0  ;;  %v1576_v58 = vmax.f32 %v5392_v63, 0.0  ;;  %v906_v15 = vsub.f32 0.0, %v850_v19  ;;  %v1685_v44 = vld [vmem:[%s5004_s13 + $0xb8] sm:$0xff]  ;;  %v5477_v19 = vld [vmem:[%s4998_s7 + $0x108] sm:$0xff] }
 0x1f9   : > { %v852_v16 = vand.u32 2147483647, %v5441_v54  ;;  %vm5453_vm6 = vcmp.lt.f32.partialorder %v1250_v46, 0.0004427343  ;;  %v1257_v18 = vadd.f32 1.0, %v1256_v49  ;;  %v907_v7 = vsub.f32 0.0, %v851_v22 }
 0x1fa   : > { %v1795_v11 = vadd.f32 %v1739_v52, %v731_v39  ;;  %v3700_v23 = vpop.eup %3699  ;;  %v1249_v56 = vmul.f32 %v3694_v42, %v1248_v10  ;;  %vm5457_vm7 = vcmp.lt.f32.partialorder %v1259_v17, 0.0004427343  ;;  %v1577_v55 = vmax.f32 %v5395_v9, 0.0 }
 0x1fb   : > { %v990_v57 = vmul.f32 1.442695, %v906_v15  ;;  %v1262_v51 = vadd.f32 1.0, %v3700_v23  ;;  %v1578_v8 = vmax.f32 %v5428_v21, 0.0  ;;  %v853_v32 = vand.u32 2147483647, %v5450_v13 }
 0x1fc   : > { %v3702_v40 = vpop.eup %3701  ;;  %v3275_v4 = vpack.c.bf16 %v1795_v11, %v1794_v5  ;;  %v992_v42 = vmul.f32 1.442695, %v907_v7  ;;  %v908_v14 = vsub.f32 0.0, %v852_v16  ;;  %v1258_v41 = vmul.f32 %v3698_v34, %v1257_v18  ;;  %v733_v15 = vld [vmem:[%s4991_s5 + $0xb8] sm:$0xff] }
 0x1fd   : > { %v3704_v20 = vpop.eup %3703  ;;  %v1246_v43 = vmul.f32 0.6931472, %v3702_v40  ;;  %3711 = vpow2.f32 %v990_v57  ;;  %v1265_v45 = vmul.f32 -0.5, %v3700_v23  ;;  %v854_v30 = vand.u32 2147483647, %v5465_v38 }
 0x1fe   : > { %2008 = vst [vmem:[%s5168_s6 + $0x50] sm:$0xff] %v3275_v4  ;;  %3713 = vlog2.f32 %v1262_v51  ;;  %v1271_v6 = vadd.f32 1.0, %v3704_v20  ;;  %v3706_v27 = vpop.eup %3705  ;;  %v1274_v25 = vmul.f32 -0.5, %v3704_v20  ;;  %v1268_v36 = vand.u32 2147483647, %v3700_v23 }
 0x1ff   : > { %v1252_v1 = vsel %vm5453_vm6, %v1249_v56, %v1246_v43  ;;  %3715 = vpow2.f32 %v992_v42  ;;  %v1280_v3 = vadd.f32 1.0, %v3706_v27  ;;  %v1283_v47 = vmul.f32 -0.5, %v3706_v27 }
 0x200   : > { %v3708_v31 = vpop.eup %3707  ;;  %v1628_v24 = vadd.f32 %v1572_v62, %v1252_v1  ;;  %3717 = vlog2.f32 %v1271_v6  ;;  %v909_v61 = vsub.f32 0.0, %v853_v32  ;;  %v994_v28 = vmul.f32 1.442695, %v908_v14 }
 0x201   : > { %v3710_v34 = vpop.eup %3709  ;;  %v1255_v50 = vmul.f32 0.6931472, %v3708_v31  ;;  %v1266_v46 = vadd.f32 1.0, %v1265_v45  ;;  %3719 = vlog2.f32 %v1280_v3  ;;  %v1275_v62 = vadd.f32 1.0, %v1274_v25 }
 0x202   : > { %v1740_v37 = vmul.f32 %v1684_v35, %v1628_v24  ;;  %v1289_v49 = vadd.f32 1.0, %v3710_v34  ;;  %v1277_v10 = vand.u32 2147483647, %v3704_v20  ;;  %v1286_v17 = vand.u32 2147483647, %v3706_v27  ;;  %v1686_v24 = vld [vmem:[%s5004_s13 + $0xc0] sm:$0xff] }
 0x203   : > { %v1261_v39 = vsel %vm5457_vm7, %v1258_v41, %v1255_v50  ;;  %v1292_v5 = vmul.f32 -0.5, %v3710_v34  ;;  %v1579_v22 = vmax.f32 %v5437_v59, 0.0  ;;  %vm5483_vm8 = vcmp.lt.f32.partialorder %v1268_v36, 0.0004427343 }
 0x204   : > { %v1629_v52 = vadd.f32 %v1573_v26, %v1261_v39  ;;  %3721 = vlog2.f32 %v1289_v49  ;;  %v1796_v16 = vadd.f32 %v1740_v37, %v732_v33  ;;  %v1284_v29 = vadd.f32 1.0, %v1283_v47  ;;  %v734_v33 = vld [vmem:[%s4991_s5 + $0xc0] sm:$0xff]  ;;  %v1687_v37 = vld [vmem:[%s5004_s13 + $0xc8] sm:$0xff] }
 0x205   : > { %3723 = vpow2.f32 %v994_v28  ;;  %v996_v7 = vmul.f32 1.442695, %v909_v61  ;;  %v855_v56 = vand.u32 2147483647, %v5477_v19  ;;  %v910_v2 = vsub.f32 0.0, %v854_v30  ;;  %v5515_v28 = vld [vmem:[%s4998_s7 + $0x110] sm:$0xff] }
 0x206   : > { %v1741_v18 = vmul.f32 %v1685_v44, %v1629_v52  ;;  %v1267_v0 = vmul.f32 %v3700_v23, %v1266_v46  ;;  %v1276_v26 = vmul.f32 %v3704_v20, %v1275_v62  ;;  %vm5490_vm9 = vcmp.lt.f32.partialorder %v1277_v10, 0.0004427343  ;;  %v1688_v62 = vld [vmem:[%s5004_s13 + $0xd0] sm:$0xff] }
 0x207   : > { %v5488_v57 = vpop.eup %3711  ;;  %vm5494_vm10 = vcmp.lt.f32.partialorder %v1286_v17, 0.0004427343  ;;  %v1293_v43 = vadd.f32 1.0, %v1292_v5  ;;  %v1295_v42 = vand.u32 2147483647, %v3710_v34  ;;  %v1285_v20 = vmul.f32 %v3706_v27, %v1284_v29 }
 0x208   : > { %v3714_v51 = vpop.eup %3713  ;;  %v1797_v32 = vadd.f32 %v1741_v18, %v733_v15  ;;  %v1298_v14 = vadd.f32 1.0, %v5488_v57  ;;  %3725 = vpow2.f32 %v996_v7  ;;  %v998_v45 = vmul.f32 1.442695, %v910_v2  ;;  %v5539_v7 = vld [vmem:[%s4998_s7 + $0x118] sm:$0xff] }
 0x209   : > { %v5499_v41 = vpop.eup %3715  ;;  %v1264_v23 = vmul.f32 0.6931472, %v3714_v51  ;;  %v1301_v35 = vmul.f32 -0.5, %v5488_v57  ;;  %v911_v25 = vsub.f32 0.0, %v855_v56  ;;  %v1304_v36 = vand.u32 2147483647, %v5488_v57 }
 0x20a   : > { %v3718_v6 = vpop.eup %3717  ;;  %v3276_v1 = vpack.c.bf16 %v1797_v32, %v1796_v16  ;;  %3727 = vlog2.f32 %v1298_v14  ;;  %v1307_v27 = vadd.f32 1.0, %v5499_v41  ;;  %v1294_v47 = vmul.f32 %v3710_v34, %v1293_v43  ;;  %v736_v56 = vld [vmem:[%s4991_s5 + $0xd0] sm:$0xff]  ;;  %v5590_v16 = vld [vmem:[%s4998_s7 + $0x128] sm:$0xff] }
 0x20b   : > { %v1270_v30 = vsel %vm5483_vm8, %v1267_v0, %v1264_v23  ;;  %v1273_v31 = vmul.f32 0.6931472, %v3718_v6  ;;  %v3720_v3 = vpop.eup %3719  ;;  %vm5510_vm11 = vcmp.lt.f32.partialorder %v1295_v42, 0.0004427343  ;;  %3729 = vpow2.f32 %v998_v45  ;;  %v1689_v0 = vld [vmem:[%s5004_s13 + $0xd8] sm:$0xff] }
 0x20c   : > { %2009 = vst [vmem:[%s5168_s6 + $0x58] sm:$0xff] %v3276_v1  ;;  %v1630_v50 = vadd.f32 %v1574_v48, %v1270_v30  ;;  %v1282_v46 = vmul.f32 0.6931472, %v3720_v3  ;;  %3731 = vlog2.f32 %v1307_v27  ;;  %v1310_v49 = vmul.f32 -0.5, %v5499_v41  ;;  %v735_v48 = vld [vmem:[%s4991_s5 + $0xc8] sm:$0xff] }
 0x20d   : > { %v1279_v44 = vsel %vm5490_vm9, %v1276_v26, %v1273_v31  ;;  %v1302_v10 = vadd.f32 1.0, %v1301_v35  ;;  %v1000_v17 = vmul.f32 1.442695, %v911_v25  ;;  %vm5530_vm12 = vcmp.lt.f32.partialorder %v1304_v36, 0.0004427343 }
 0x20e   : > { %v3722_v53 = vpop.eup %3721  ;;  %v1631_v34 = vadd.f32 %v1575_v12, %v1279_v44  ;;  %v1742_v39 = vmul.f32 %v1686_v24, %v1630_v50  ;;  %v1288_v5 = vsel %vm5494_vm10, %v1285_v20, %v1282_v46  ;;  %v856_v11 = vand.u32 2147483647, %v5515_v28 }
 0x20f   : > { %v5526_v52 = vpop.eup %3723  ;;  %v1291_v15 = vmul.f32 0.6931472, %v3722_v53  ;;  %v1632_v29 = vadd.f32 %v1576_v58, %v1288_v5  ;;  %v1311_v26 = vadd.f32 1.0, %v1310_v49  ;;  %v1313_v40 = vand.u32 2147483647, %v5499_v41  ;;  %v737_v58 = vld [vmem:[%s4991_s5 + $0xd8] sm:$0xff] }
 0x210   : > { %v1743_v60 = vmul.f32 %v1687_v37, %v1631_v34  ;;  %v1798_v12 = vadd.f32 %v1742_v39, %v734_v33  ;;  %v1316_v18 = vadd.f32 1.0, %v5526_v52  ;;  %3733 = vpow2.f32 %v1000_v17  ;;  %v1691_v39 = vld [vmem:[%s5004_s13 + $0xe8] sm:$0xff] }
 0x211   : > { %v1297_v2 = vsel %vm5510_vm11, %v1294_v47, %v1291_v15  ;;  %v1744_v32 = vmul.f32 %v1688_v62, %v1632_v29  ;;  %v1303_v43 = vmul.f32 %v5488_v57, %v1302_v10  ;;  %v1319_v42 = vmul.f32 -0.5, %v5526_v52  ;;  %v739_v10 = vld [vmem:[%s4991_s5 + $0xe8] sm:$0xff]  ;;  %v5587_v15 = vld [vmem:[%s4998_s7 + $0x120] sm:$0xff] }
 0x212   : > { %v1799_v4 = vadd.f32 %v1743_v60, %v735_v48  ;;  %v1633_v51 = vadd.f32 %v1577_v55, %v1297_v2  ;;  %3735 = vlog2.f32 %v1316_v18  ;;  %v5548_v63 = vpop.eup %3725  ;;  %v857_v14 = vand.u32 2147483647, %v5539_v7  ;;  %v738_v48 = vld [vmem:[%s4991_s5 + $0xe0] sm:$0xff] }
 0x213   : > { %v912_v23 = vsub.f32 0.0, %v856_v11  ;;  %v1800_v1 = vadd.f32 %v1744_v32, %v736_v56  ;;  %v1325_v9 = vadd.f32 1.0, %v5548_v63  ;;  %v1312_v35 = vmul.f32 %v5499_v41, %v1311_v26  ;;  %v1690_v41 = vld [vmem:[%s5004_s13 + $0xe0] sm:$0xff] }
 0x214   : > { %v3728_v20 = vpop.eup %3727  ;;  %v3277_v45 = vpack.c.bf16 %v1799_v4, %v1798_v12  ;;  %v1745_v6 = vmul.f32 %v1689_v0, %v1633_v51  ;;  %vm5556_vm13 = vcmp.lt.f32.partialorder %v1313_v40, 0.0004427343  ;;  %v1580_v57 = vmax.f32 %v5441_v54, 0.0  ;;  %v5603_v40 = vld [vmem:[%s4998_s7 + $0x130] sm:$0xff] }
 0x215   : > { %v1300_v55 = vmul.f32 0.6931472, %v3728_v20  ;;  %v5561_v30 = vpop.eup %3729  ;;  %3737 = vlog2.f32 %v1325_v9  ;;  %v913_v24 = vsub.f32 0.0, %v857_v14  ;;  %v1002_v36 = vmul.f32 1.442695, %v912_v23 }
 0x216   : > { %2010 = vst [vmem:[%s5168_s6 + $0x60] sm:$0xff] %v3277_v45  ;;  %v1801_v31 = vadd.f32 %v1745_v6, %v737_v58  ;;  %v3732_v27 = vpop.eup %3731  ;;  %v1320_v50 = vadd.f32 1.0, %v1319_v42  ;;  %v1328_v47 = vmul.f32 -0.5, %v5548_v63  ;;  %v1334_v54 = vadd.f32 1.0, %v5561_v30  ;;  %v1692_v58 = vld [vmem:[%s5004_s13 + $0xf0] sm:$0xff]  ;;  %v5615_v6 = vld [vmem:[%s4998_s7 + $0x138] sm:$0xff] }
 0x217   : > { %v1306_v3 = vsel %vm5530_vm12, %v1303_v43, %v1300_v55  ;;  %v1309_v33 = vmul.f32 0.6931472, %v3732_v27  ;;  %v1322_v37 = vand.u32 2147483647, %v5526_v52  ;;  %v1581_v46 = vmax.f32 %v5450_v13, 0.0 }
 0x218   : > { %v3278_v61 = vpack.c.bf16 %v1801_v31, %v1800_v1  ;;  %v1634_v44 = vadd.f32 %v1578_v8, %v1306_v3  ;;  %3739 = vlog2.f32 %v1334_v54  ;;  %v1582_v49 = vmax.f32 %v5465_v38, 0.0  ;;  %v1693_v3 = vld [vmem:[%s5004_s13 + $0xf8] sm:$0xff] }
 0x219   : > { %v1004_v53 = vmul.f32 1.442695, %v913_v24  ;;  %v1315_v34 = vsel %vm5556_vm13, %v1312_v35, %v1309_v33  ;;  %v1337_v21 = vmul.f32 -0.5, %v5561_v30  ;;  %3741 = vpow2.f32 %v1002_v36  ;;  %v740_v35 = vld [vmem:[%s4991_s5 + $0xf0] sm:$0xff] }
 0x21a   : > { %2011 = vst [vmem:[%s5168_s6 + $0x68] sm:$0xff] %v3278_v61  ;;  %v1746_v62 = vmul.f32 %v1690_v41, %v1634_v44  ;;  %v5580_v8 = vpop.eup %3733  ;;  %v1635_v13 = vadd.f32 %v1579_v22, %v1315_v34  ;;  %v1321_v17 = vmul.f32 %v5526_v52, %v1320_v50  ;;  %v1329_v5 = vadd.f32 1.0, %v1328_v47 }
 0x21b   : > { %3743 = vpow2.f32 %v1004_v53  ;;  %vm5592_vm14 = vcmp.lt.f32.partialorder %v1322_v37, 0.0004427343  ;;  %v1331_v12 = vand.u32 2147483647, %v5548_v63  ;;  %v1343_v59 = vadd.f32 1.0, %v5580_v8  ;;  %v741_v37 = vld [vmem:[%s4991_s5 + $0xf8] sm:$0xff] }
 0x21c   : > { %v3736_v11 = vpop.eup %3735  ;;  %v1583_v22 = vmax.f32 %v5477_v19, 0.0  ;;  %v1747_v52 = vmul.f32 %v1691_v39, %v1635_v13  ;;  %v1802_v29 = vadd.f32 %v1746_v62, %v738_v48  ;;  %v1340_v56 = vand.u32 2147483647, %v5561_v30 }
 0x21d   : > { %v1318_v18 = vmul.f32 0.6931472, %v3736_v11  ;;  %v1338_v2 = vadd.f32 1.0, %v1337_v21  ;;  %3745 = vlog2.f32 %v1343_v59  ;;  %v858_v0 = vand.u32 2147483647, %v5587_v15 }
 0x21e   : > { %v859_v26 = vand.u32 2147483647, %v5590_v16  ;;  %v1803_v4 = vadd.f32 %v1747_v52, %v739_v10  ;;  %v1330_v32 = vmul.f32 %v5548_v63, %v1329_v5  ;;  %v1346_v43 = vmul.f32 -0.5, %v5580_v8  ;;  %v5644_v52 = vld [vmem:[%s4998_s7 + $0x140] sm:$0xff] }
 0x21f   : > { %v1324_v51 = vsel %vm5592_vm14, %v1321_v17, %v1318_v18  ;;  %v3738_v42 = vpop.eup %3737  ;;  %vm5610_vm15 = vcmp.lt.f32.partialorder %v1331_v12, 0.0004427343  ;;  %v914_v20 = vsub.f32 0.0, %v858_v0  ;;  %vm5617_vm0 = vcmp.lt.f32.partialorder %v1340_v56, 0.0004427343  ;;  %v1694_v17 = vld [vmem:[%s5004_s13 + $0x100] sm:$0xff] }
 0x220   : > { %v1636_v23 = vadd.f32 %v1580_v57, %v1324_v51  ;;  %v915_v45 = vsub.f32 0.0, %v859_v26  ;;  %v3279_v1 = vpack.c.bf16 %v1803_v4, %v1802_v29  ;;  %v1327_v9 = vmul.f32 0.6931472, %v3738_v42 }
 0x221   : > { %v860_v63 = vand.u32 2147483647, %v5603_v40  ;;  %v1339_v31 = vmul.f32 %v5561_v30, %v1338_v2  ;;  %v1006_v24 = vmul.f32 1.442695, %v914_v20  ;;  %v1347_v41 = vadd.f32 1.0, %v1346_v43  ;;  %v742_v2 = vld [vmem:[%s4991_s5 + $0x100] sm:$0xff] }
 0x222   : > { %v1748_v25 = vmul.f32 %v1692_v58, %v1636_v23  ;;  %v1008_v57 = vmul.f32 1.442695, %v915_v45  ;;  %v3740_v36 = vpop.eup %3739  ;;  %2012 = vst [vmem:[%s5168_s6 + $0x70] sm:$0xff] %v3279_v1  ;;  %v1333_v27 = vsel %vm5610_vm15, %v1330_v32, %v1327_v9  ;;  %v1349_v50 = vand.u32 2147483647, %v5580_v8  ;;  %v1695_v32 = vld [vmem:[%s5004_s13 + $0x108] sm:$0xff] }
 0x223   : > { %v1584_v47 = vmax.f32 %v5515_v28, 0.0  ;;  %v3742_v54 = vpop.eup %3741  ;;  %v1637_v61 = vadd.f32 %v1581_v46, %v1333_v27  ;;  %v1336_v33 = vmul.f32 0.6931472, %v3740_v36  ;;  %3747 = vpow2.f32 %v1006_v24  ;;  %v743_v45 = vld [vmem:[%s4991_s5 + $0x108] sm:$0xff]  ;;  %v5670_v24 = vld [vmem:[%s4998_s7 + $0x158] sm:$0xff] }
 0x224   : > { %v861_v30 = vand.u32 2147483647, %v5615_v6  ;;  %v1804_v53 = vadd.f32 %v1748_v25, %v740_v35  ;;  %v1352_v48 = vadd.f32 1.0, %v3742_v54  ;;  %3749 = vpow2.f32 %v1008_v57 }
 0x225   : > { %v3744_v44 = vpop.eup %3743  ;;  %v916_v34 = vsub.f32 0.0, %v860_v63  ;;  %v1749_v39 = vmul.f32 %v1693_v3, %v1637_v61  ;;  %v1342_v62 = vsel %vm5617_vm0, %v1339_v31, %v1336_v33  ;;  %v1355_v21 = vmul.f32 -0.5, %v3742_v54  ;;  %v5663_v63 = vld [vmem:[%s4998_s7 + $0x150] sm:$0xff] }
 0x226   : > { %v1361_v10 = vadd.f32 1.0, %v3744_v44  ;;  %v1348_v46 = vmul.f32 %v5580_v8, %v1347_v41  ;;  %v1638_v13 = vadd.f32 %v1582_v49, %v1342_v62  ;;  %3751 = vlog2.f32 %v1352_v48  ;;  %v5647_v8 = vld [vmem:[%s4998_s7 + $0x148] sm:$0xff] }
 0x227   : > { %v1364_v5 = vmul.f32 -0.5, %v3744_v44  ;;  %v3746_v11 = vpop.eup %3745  ;;  %v1805_v60 = vadd.f32 %v1749_v39, %v741_v37  ;;  %vm5638_vm1 = vcmp.lt.f32.partialorder %v1349_v50, 0.0004427343  ;;  %v1585_v59 = vmax.f32 %v5539_v7, 0.0 }
 0x228   : > { %3753 = vlog2.f32 %v1361_v10  ;;  %v1345_v38 = vmul.f32 0.6931472, %v3746_v11  ;;  %v1358_v49 = vand.u32 2147483647, %v3742_v54  ;;  %v1586_v29 = vmax.f32 %v5587_v15, 0.0 }
 0x229   : > { %v917_v18 = vsub.f32 0.0, %v861_v30  ;;  %v3280_v56 = vpack.c.bf16 %v1805_v60, %v1804_v53  ;;  %v1750_v0 = vmul.f32 %v1694_v17, %v1638_v13  ;;  %v1356_v26 = vadd.f32 1.0, %v1355_v21  ;;  %v1696_v17 = vld [vmem:[%s5004_s13 + $0x110] sm:$0xff]  ;;  %v5689_v60 = vld [vmem:[%s4998_s7 + $0x160] sm:$0xff] }
 0x22a   : > { %v1010_v4 = vmul.f32 1.442695, %v916_v34  ;;  %v1351_v51 = vsel %vm5638_vm1, %v1348_v46, %v1345_v38  ;;  %v1365_v58 = vadd.f32 1.0, %v1364_v5  ;;  %v862_v42 = vand.u32 2147483647, %v5644_v52 }
 0x22b   : > { %v1012_v43 = vmul.f32 1.442695, %v917_v18  ;;  %2013 = vst [vmem:[%s5168_s6 + $0x78] sm:$0xff] %v3280_v56  ;;  %v1639_v14 = vadd.f32 %v1583_v22, %v1351_v51  ;;  %v1367_v23 = vand.u32 2147483647, %v3744_v44  ;;  %v1587_v1 = vmax.f32 %v5590_v16, 0.0 }
 0x22c   : > { %3755 = vpow2.f32 %v1010_v4  ;;  %v863_v20 = vand.u32 2147483647, %v5647_v8  ;;  %v1588_v9 = vmax.f32 %v5603_v40, 0.0  ;;  %v918_v55 = vsub.f32 0.0, %v862_v42 }
 0x22d   : > { %3757 = vpow2.f32 %v1012_v43  ;;  %v3748_v35 = vpop.eup %3747  ;;  %v1751_v25 = vmul.f32 %v1695_v32, %v1639_v14  ;;  %v1806_v31 = vadd.f32 %v1750_v0, %v742_v2  ;;  %vm5665_vm2 = vcmp.lt.f32.partialorder %v1358_v49, 0.0004427343  ;;  %v1697_v49 = vld [vmem:[%s5004_s13 + $0x118] sm:$0xff]  ;;  %v744_v0 = vld [vmem:[%s4991_s5 + $0x110] sm:$0xff]  ;;  %v5708_v14 = vld [vmem:[%s4998_s7 + $0x168] sm:$0xff] }
 0x22e   : > { %v919_v22 = vsub.f32 0.0, %v863_v20  ;;  %v5672_v57 = vpop.eup %3749  ;;  %v1357_v36 = vmul.f32 %v3742_v54, %v1356_v26  ;;  %v1366_v27 = vmul.f32 %v3744_v44, %v1365_v58  ;;  %v1370_v3 = vadd.f32 1.0, %v3748_v35  ;;  %v745_v26 = vld [vmem:[%s4991_s5 + $0x118] sm:$0xff] }
 0x22f   : > { %v1014_v41 = vmul.f32 1.442695, %v918_v55  ;;  %v1807_v50 = vadd.f32 %v1751_v25, %v743_v45  ;;  %vm5674_vm3 = vcmp.lt.f32.partialorder %v1367_v23, 0.0004427343  ;;  %v1379_v33 = vadd.f32 1.0, %v5672_v57 }
 0x230   : > { %v864_v30 = vand.u32 2147483647, %v5663_v63  ;;  %v3752_v37 = vpop.eup %3751  ;;  %3759 = vlog2.f32 %v1370_v3  ;;  %v1373_v53 = vmul.f32 -0.5, %v3748_v35  ;;  %v1016_v48 = vmul.f32 1.442695, %v919_v22 }
 0x231   : > { %v865_v54 = vand.u32 2147483647, %v5670_v24  ;;  %v3281_v34 = vpack.c.bf16 %v1807_v50, %v1806_v31  ;;  %v1354_v39 = vmul.f32 0.6931472, %v3752_v37  ;;  %3761 = vlog2.f32 %v1379_v33 }
 0x232   : > { %v3754_v44 = vpop.eup %3753  ;;  %v1382_v62 = vmul.f32 -0.5, %v5672_v57  ;;  %v1589_v10 = vmax.f32 %v5615_v6, 0.0  ;;  %3763 = vpow2.f32 %v1014_v41  ;;  %v1590_v46 = vmax.f32 %v5644_v52, 0.0 }
 0x233   : > { %v1363_v21 = vmul.f32 0.6931472, %v3754_v44  ;;  %2014 = vst [vmem:[%s5168_s6 + $0x80] sm:$0xff] %v3281_v34  ;;  %v1360_v13 = vsel %vm5665_vm2, %v1357_v36, %v1354_v39  ;;  %v1376_v5 = vand.u32 2147483647, %v3748_v35  ;;  %3765 = vpow2.f32 %v1016_v48  ;;  %v1698_v39 = vld [vmem:[%s5004_s13 + $0x120] sm:$0xff] }
 0x234   : > { %v920_v11 = vsub.f32 0.0, %v864_v30  ;;  %v1640_v38 = vadd.f32 %v1584_v47, %v1360_v13  ;;  %v1374_v18 = vadd.f32 1.0, %v1373_v53  ;;  %v1591_v56 = vmax.f32 %v5647_v8, 0.0 }
 0x235   : > { %v1369_v12 = vsel %vm5674_vm3, %v1366_v27, %v1363_v21  ;;  %v1383_v51 = vadd.f32 1.0, %v1382_v62  ;;  %v921_v32 = vsub.f32 0.0, %v865_v54  ;;  %v1592_v58 = vmax.f32 %v5663_v63, 0.0 }
 0x236   : > { %v5697_v2 = vpop.eup %3755  ;;  %v1641_v4 = vadd.f32 %v1585_v59, %v1369_v12  ;;  %v1752_v28 = vmul.f32 %v1696_v17, %v1640_v38  ;;  %v1018_v42 = vmul.f32 1.442695, %v920_v11  ;;  %v866_v23 = vand.u32 2147483647, %v5689_v60  ;;  %v1699_v11 = vld [vmem:[%s5004_s13 + $0x128] sm:$0xff] }
 0x237   : > { %v5704_v43 = vpop.eup %3757  ;;  %v1388_v47 = vadd.f32 1.0, %v5697_v2  ;;  %vm5711_vm4 = vcmp.lt.f32.partialorder %v1376_v5, 0.0004427343  ;;  %v1385_v7 = vand.u32 2147483647, %v5672_v57  ;;  %v1375_v25 = vmul.f32 %v3748_v35, %v1374_v18 }
 0x238   : > { %v1753_v20 = vmul.f32 %v1697_v49, %v1641_v4  ;;  %v1397_v59 = vadd.f32 1.0, %v5704_v43  ;;  %v1808_v55 = vadd.f32 %v1752_v28, %v744_v0  ;;  %v1391_v31 = vmul.f32 -0.5, %v5697_v2  ;;  %v746_v49 = vld [vmem:[%s4991_s5 + $0x120] sm:$0xff]  ;;  %v747_v4 = vld [vmem:[%s4991_s5 + $0x128] sm:$0xff] }
 0x239   : > { %3767 = vlog2.f32 %v1388_v47  ;;  %v1384_v22 = vmul.f32 %v5672_v57, %v1383_v51  ;;  %v867_v36 = vand.u32 2147483647, %v5708_v14  ;;  %v1400_v3 = vmul.f32 -0.5, %v5704_v43 }
 0x23a   : > { %v1809_v19 = vadd.f32 %v1753_v20, %v745_v26  ;;  %3769 = vlog2.f32 %v1397_v59  ;;  %v3760_v27 = vpop.eup %3759  ;;  %v1020_v41 = vmul.f32 1.442695, %v921_v32  ;;  %v922_v50 = vsub.f32 0.0, %v866_v23 }
 0x23b   : > { %3771 = vpow2.f32 %v1018_v42  ;;  %v3762_v61 = vpop.eup %3761  ;;  %v1372_v35 = vmul.f32 0.6931472, %v3760_v27  ;;  %vm5721_vm5 = vcmp.lt.f32.partialorder %v1385_v7, 0.0004427343  ;;  %v1394_v57 = vand.u32 2147483647, %v5697_v2 }
 0x23c   : > { %v3282_v33 = vpack.c.bf16 %v1809_v19, %v1808_v55  ;;  %v5726_v37 = vpop.eup %3763  ;;  %v1381_v53 = vmul.f32 0.6931472, %v3762_v61  ;;  %v1392_v48 = vadd.f32 1.0, %v1391_v31  ;;  %v1403_v54 = vand.u32 2147483647, %v5704_v43 }
 0x23d   : > { %3773 = vpow2.f32 %v1020_v41  ;;  %v5729_v44 = vpop.eup %3765  ;;  %v1378_v34 = vsel %vm5711_vm4, %v1375_v25, %v1372_v35  ;;  %v1406_v62 = vadd.f32 1.0, %v5726_v37  ;;  %v923_v21 = vsub.f32 0.0, %v867_v36  ;;  %v5765_v25 = vld [vmem:[%s4998_s7 + $0x178] sm:$0xff]  ;;  %v1700_v41 = vld [vmem:[%s5004_s13 + $0x130] sm:$0xff] }
 0x23e   : > { %2015 = vst [vmem:[%s5168_s6 + $0x88] sm:$0xff] %v3282_v33  ;;  %v1022_v13 = vmul.f32 1.442695, %v922_v50  ;;  %v1387_v17 = vsel %vm5721_vm5, %v1384_v22, %v1381_v53  ;;  %v1642_v5 = vadd.f32 %v1586_v29, %v1378_v34  ;;  %v1401_v12 = vadd.f32 1.0, %v1400_v3 }
 0x23f   : > { %v1415_v38 = vadd.f32 1.0, %v5729_v44  ;;  %v1643_v18 = vadd.f32 %v1587_v1, %v1387_v17  ;;  %vm5745_vm6 = vcmp.lt.f32.partialorder %v1394_v57, 0.0004427343  ;;  %3775 = vlog2.f32 %v1406_v62  ;;  %v5755_v1 = vld [vmem:[%s4998_s7 + $0x170] sm:$0xff]  ;;  %v1701_v57 = vld [vmem:[%s5004_s13 + $0x138] sm:$0xff] }
 0x240   : > { %v1593_v26 = vmax.f32 %v5670_v24, 0.0  ;;  %v1754_v51 = vmul.f32 %v1698_v39, %v1642_v5  ;;  %v1409_v15 = vmul.f32 -0.5, %v5726_v37  ;;  %v1418_v29 = vmul.f32 -0.5, %v5729_v44 }
 0x241   : > { %3777 = vlog2.f32 %v1415_v38  ;;  %v1755_v32 = vmul.f32 %v1699_v11, %v1643_v18  ;;  %v1393_v28 = vmul.f32 %v5697_v2, %v1392_v48  ;;  %v1024_v16 = vmul.f32 1.442695, %v923_v21  ;;  %v749_v21 = vld [vmem:[%s4991_s5 + $0x138] sm:$0xff] }
 0x242   : > { %3779 = vpow2.f32 %v1022_v13  ;;  %v1810_v42 = vadd.f32 %v1754_v51, %v746_v49  ;;  %v1402_v23 = vmul.f32 %v5704_v43, %v1401_v12  ;;  %vm5758_vm7 = vcmp.lt.f32.partialorder %v1403_v54, 0.0004427343  ;;  %v748_v54 = vld [vmem:[%s4991_s5 + $0x130] sm:$0xff] }
 0x243   : > { %v3768_v47 = vpop.eup %3767  ;;  %v1594_v45 = vmax.f32 %v5689_v60, 0.0  ;;  %v1811_v59 = vadd.f32 %v1755_v32, %v747_v4  ;;  %v1412_v2 = vand.u32 2147483647, %v5726_v37  ;;  %3781 = vpow2.f32 %v1024_v16  ;;  %v1702_v32 = vld [vmem:[%s5004_s13 + $0x140] sm:$0xff] }
 0x244   : > { %v3770_v7 = vpop.eup %3769  ;;  %v1390_v55 = vmul.f32 0.6931472, %v3768_v47  ;;  %v1410_v19 = vadd.f32 1.0, %v1409_v15  ;;  %v1419_v22 = vadd.f32 1.0, %v1418_v29  ;;  %v868_v36 = vand.u32 2147483647, %v5755_v1 }
 0x245   : > { %v5767_v31 = vpop.eup %3771  ;;  %v1399_v43 = vmul.f32 0.6931472, %v3770_v7  ;;  %v3283_v27 = vpack.c.bf16 %v1811_v59, %v1810_v42  ;;  %v1421_v50 = vand.u32 2147483647, %v5729_v44  ;;  %v869_v48 = vand.u32 2147483647, %v5765_v25 }
 0x246   : > { %v1396_v3 = vsel %vm5745_vm6, %v1393_v28, %v1390_v55  ;;  %v1424_v61 = vadd.f32 1.0, %v5767_v31  ;;  %v1427_v53 = vmul.f32 -0.5, %v5767_v31  ;;  %v1430_v39 = vand.u32 2147483647, %v5767_v31  ;;  %v1703_v59 = vld [vmem:[%s5004_s13 + $0x148] sm:$0xff] }
 0x247   : > { %v5775_v33 = vpop.eup %3773  ;;  %v1405_v35 = vsel %vm5758_vm7, %v1402_v23, %v1399_v43  ;;  %v1644_v30 = vadd.f32 %v1588_v9, %v1396_v3  ;;  %2016 = vst [vmem:[%s5168_s6 + $0x90] sm:$0xff] %v3283_v27  ;;  %v1411_v40 = vmul.f32 %v5726_v37, %v1410_v19  ;;  %v924_v17 = vsub.f32 0.0, %v868_v36  ;;  %v750_v43 = vld [vmem:[%s4991_s5 + $0x140] sm:$0xff]  ;;  %v751_v19 = vld [vmem:[%s4991_s5 + $0x148] sm:$0xff] }
 0x248   : > { %v1645_v34 = vadd.f32 %v1589_v10, %v1405_v35  ;;  %3783 = vlog2.f32 %v1424_v61  ;;  %v1433_v62 = vadd.f32 1.0, %v5775_v33  ;;  %v1436_v9 = vmul.f32 -0.5, %v5775_v33 }
 0x249   : > { %v1756_v13 = vmul.f32 %v1700_v41, %v1644_v30  ;;  %v3776_v5 = vpop.eup %3775  ;;  %vm5793_vm8 = vcmp.lt.f32.partialorder %v1412_v2, 0.0004427343  ;;  %v1420_v6 = vmul.f32 %v5729_v44, %v1419_v22  ;;  %vm5798_vm9 = vcmp.lt.f32.partialorder %v1421_v50, 0.0004427343  ;;  %v5821_v2 = vld [vmem:[%s4998_s7 + $0x180] sm:$0xff]  ;;  %v5833_v50 = vld [vmem:[%s4998_s7 + $0x188] sm:$0xff] }
 0x24a   : > { %v1757_v11 = vmul.f32 %v1701_v57, %v1645_v34  ;;  %3785 = vlog2.f32 %v1433_v62  ;;  %v1408_v49 = vmul.f32 0.6931472, %v3776_v5  ;;  %v925_v37 = vsub.f32 0.0, %v869_v48  ;;  %v5843_v62 = vld [vmem:[%s4998_s7 + $0x198] sm:$0xff] }
 0x24b   : > { %v3778_v10 = vpop.eup %3777  ;;  %v1812_v38 = vadd.f32 %v1756_v13, %v748_v54  ;;  %v1428_v15 = vadd.f32 1.0, %v1427_v53  ;;  %vm5804_vm10 = vcmp.lt.f32.partialorder %v1430_v39, 0.0004427343  ;;  %v1437_v28 = vadd.f32 1.0, %v1436_v9  ;;  %v5840_v39 = vld [vmem:[%s4998_s7 + $0x190] sm:$0xff] }
 0x24c   : > { %v5802_v0 = vpop.eup %3779  ;;  %v1813_v4 = vadd.f32 %v1757_v11, %v749_v21  ;;  %v1417_v51 = vmul.f32 0.6931472, %v3778_v10  ;;  %v1414_v29 = vsel %vm5793_vm8, %v1411_v40, %v1408_v49  ;;  %v1026_v47 = vmul.f32 1.442695, %v924_v17  ;;  %v1704_v11 = vld [vmem:[%s5004_s13 + $0x150] sm:$0xff] }
 0x24d   : > { %v1442_v16 = vadd.f32 1.0, %v5802_v0  ;;  %v5812_v42 = vpop.eup %3781  ;;  %v1646_v7 = vadd.f32 %v1590_v46, %v1414_v29  ;;  %v1445_v55 = vmul.f32 -0.5, %v5802_v0  ;;  %v1028_v27 = vmul.f32 1.442695, %v925_v37  ;;  %v752_v37 = vld [vmem:[%s4991_s5 + $0x150] sm:$0xff] }
 0x24e   : > { %v3284_v23 = vpack.c.bf16 %v1813_v4, %v1812_v38  ;;  %v1423_v20 = vsel %vm5798_vm9, %v1420_v6, %v1417_v51  ;;  %v1451_v36 = vadd.f32 1.0, %v5812_v42  ;;  %v1439_v52 = vand.u32 2147483647, %v5775_v33  ;;  %v5857_v6 = vld [vmem:[%s4998_s7 + $0x1a0] sm:$0xff]  ;;  %v1705_v51 = vld [vmem:[%s5004_s13 + $0x158] sm:$0xff] }
 0x24f   : > { %v1647_v22 = vadd.f32 %v1591_v56, %v1423_v20  ;;  %3787 = vlog2.f32 %v1442_v16  ;;  %v1758_v3 = vmul.f32 %v1702_v32, %v1646_v7  ;;  %v1448_v46 = vand.u32 2147483647, %v5802_v0 }
 0x250   : > { %2017 = vst [vmem:[%s5168_s6 + $0x98] sm:$0xff] %v3284_v23  ;;  %v1454_v41 = vmul.f32 -0.5, %v5812_v42  ;;  %v1429_v8 = vmul.f32 %v5767_v31, %v1428_v15  ;;  %3789 = vlog2.f32 %v1451_v36  ;;  %v870_v56 = vand.u32 2147483647, %v5821_v2 }
 0x251   : > { %v1759_v61 = vmul.f32 %v1703_v59, %v1647_v22  ;;  %v1814_v30 = vadd.f32 %v1758_v3, %v750_v43  ;;  %v1438_v57 = vmul.f32 %v5775_v33, %v1437_v28  ;;  %v1446_v53 = vadd.f32 1.0, %v1445_v55  ;;  %v5873_v28 = vld [vmem:[%s4998_s7 + $0x1a8] sm:$0xff] }
 0x252   : > { %v3784_v35 = vpop.eup %3783  ;;  %3791 = vpow2.f32 %v1026_v47  ;;  %v871_v34 = vand.u32 2147483647, %v5833_v50  ;;  %vm5845_vm11 = vcmp.lt.f32.partialorder %v1439_v52, 0.0004427343  ;;  %vm5849_vm12 = vcmp.lt.f32.partialorder %v1448_v46, 0.0004427343 }
 0x253   : > { %v1815_v48 = vadd.f32 %v1759_v61, %v751_v19  ;;  %v1426_v54 = vmul.f32 0.6931472, %v3784_v35  ;;  %3793 = vpow2.f32 %v1028_v27  ;;  %v1455_v13 = vadd.f32 1.0, %v1454_v41  ;;  %v753_v47 = vld [vmem:[%s4991_s5 + $0x158] sm:$0xff]  ;;  %v1706_v52 = vld [vmem:[%s5004_s13 + $0x160] sm:$0xff] }
 0x254   : > { %v3786_v31 = vpop.eup %3785  ;;  %v926_v40 = vsub.f32 0.0, %v870_v56  ;;  %v927_v12 = vsub.f32 0.0, %v871_v34  ;;  %v872_v49 = vand.u32 2147483647, %v5840_v39  ;;  %v873_v18 = vand.u32 2147483647, %v5843_v62 }
 0x255   : > { %v3285_v9 = vpack.c.bf16 %v1815_v48, %v1814_v30  ;;  %v1432_v17 = vsel %vm5804_vm10, %v1429_v8, %v1426_v54  ;;  %v1435_v5 = vmul.f32 0.6931472, %v3786_v31  ;;  %v1447_v15 = vmul.f32 %v5802_v0, %v1446_v53  ;;  %v1707_v30 = vld [vmem:[%s5004_s13 + $0x168] sm:$0xff] }
 0x256   : > { %v1648_v10 = vadd.f32 %v1592_v58, %v1432_v17  ;;  %v1030_v38 = vmul.f32 1.442695, %v926_v40  ;;  %v1457_v44 = vand.u32 2147483647, %v5812_v42  ;;  %v1032_v29 = vmul.f32 1.442695, %v927_v12 }
 0x257   : > { %2018 = vst [vmem:[%s5168_s6 + $0xa0] sm:$0xff] %v3285_v9  ;;  %v1441_v4 = vsel %vm5845_vm11, %v1438_v57, %v1435_v5  ;;  %v928_v32 = vsub.f32 0.0, %v872_v49  ;;  %v1456_v23 = vmul.f32 %v5812_v42, %v1455_v13  ;;  %v929_v20 = vsub.f32 0.0, %v873_v18  ;;  %v755_v31 = vld [vmem:[%s4991_s5 + $0x168] sm:$0xff] }
 0x258   : > { %v1649_v63 = vadd.f32 %v1593_v26, %v1441_v4  ;;  %v1760_v58 = vmul.f32 %v1704_v11, %v1648_v10  ;;  %3795 = vpow2.f32 %v1030_v38  ;;  %v874_v0 = vand.u32 2147483647, %v5857_v6 }
 0x259   : > { %v3788_v16 = vpop.eup %3787  ;;  %3797 = vpow2.f32 %v1032_v29  ;;  %v1034_v43 = vmul.f32 1.442695, %v928_v32  ;;  %vm5878_vm13 = vcmp.lt.f32.partialorder %v1457_v44, 0.0004427343  ;;  %v1595_v19 = vmax.f32 %v5708_v14, 0.0  ;;  %v754_v14 = vld [vmem:[%s4991_s5 + $0x160] sm:$0xff] }
 0x25a   : > { %v1761_v7 = vmul.f32 %v1705_v51, %v1649_v63  ;;  %v1816_v59 = vadd.f32 %v1760_v58, %v752_v37  ;;  %v1444_v55 = vmul.f32 0.6931472, %v3788_v16  ;;  %v3790_v24 = vpop.eup %3789  ;;  %v875_v42 = vand.u32 2147483647, %v5873_v28  ;;  %v5905_v44 = vld [vmem:[%s4998_s7 + $0x1b8] sm:$0xff]  ;;  %v1710_v63 = vld [vmem:[%s5004_s13 + $0x180] sm:$0xff] }
 0x25b   : > { %v1453_v3 = vmul.f32 0.6931472, %v3790_v24  ;;  %3799 = vpow2.f32 %v1034_v43  ;;  %v1036_v8 = vmul.f32 1.442695, %v929_v20  ;;  %v930_v53 = vsub.f32 0.0, %v874_v0 }
 0x25c   : > { %v3792_v22 = vpop.eup %3791  ;;  %v1817_v36 = vadd.f32 %v1761_v7, %v753_v47  ;;  %v1450_v27 = vsel %vm5849_vm12, %v1447_v15, %v1444_v55  ;;  %v931_v21 = vsub.f32 0.0, %v875_v42  ;;  %v1596_v9 = vmax.f32 %v5755_v1, 0.0  ;;  %v5902_v1 = vld [vmem:[%s4998_s7 + $0x1b0] sm:$0xff] }
 0x25d   : > { %v3794_v46 = vpop.eup %3793  ;;  %v1650_v41 = vadd.f32 %v1594_v45, %v1450_v27  ;;  %v1460_v61 = vadd.f32 1.0, %v3792_v22  ;;  %v1459_v35 = vsel %vm5878_vm13, %v1456_v23, %v1453_v3  ;;  %v1463_v34 = vmul.f32 -0.5, %v3792_v22 }
 0x25e   : > { %v3286_v56 = vpack.c.bf16 %v1817_v36, %v1816_v59  ;;  %v1469_v57 = vadd.f32 1.0, %v3794_v46  ;;  %v1651_v48 = vadd.f32 %v1595_v19, %v1459_v35  ;;  %v1472_v33 = vmul.f32 -0.5, %v3794_v46 }
 0x25f   : > { %v1762_v54 = vmul.f32 %v1706_v52, %v1650_v41  ;;  %3801 = vlog2.f32 %v1460_v61  ;;  %v1466_v40 = vand.u32 2147483647, %v3792_v22  ;;  %v1038_v17 = vmul.f32 1.442695, %v930_v53  ;;  %v1709_v53 = vld [vmem:[%s5004_s13 + $0x178] sm:$0xff] }
 0x260   : > { %2019 = vst [vmem:[%s5168_s6 + $0xa8] sm:$0xff] %v3286_v56  ;;  %3803 = vlog2.f32 %v1469_v57  ;;  %v1763_v60 = vmul.f32 %v1707_v30, %v1651_v48  ;;  %v1464_v12 = vadd.f32 1.0, %v1463_v34  ;;  %v1597_v10 = vmax.f32 %v5765_v25, 0.0  ;;  %v756_v34 = vld [vmem:[%s4991_s5 + $0x170] sm:$0xff] }
 0x261   : > { %v1818_v45 = vadd.f32 %v1762_v54, %v754_v14  ;;  %3805 = vpow2.f32 %v1036_v8  ;;  %v1598_v18 = vmax.f32 %v5821_v2, 0.0  ;;  %v1040_v37 = vmul.f32 1.442695, %v931_v21  ;;  %v1708_v8 = vld [vmem:[%s5004_s13 + $0x170] sm:$0xff] }
 0x262   : > { %v3796_v13 = vpop.eup %3795  ;;  %v1819_v11 = vadd.f32 %v1763_v60, %v755_v31  ;;  %3807 = vpow2.f32 %v1038_v17  ;;  %v1473_v51 = vadd.f32 1.0, %v1472_v33  ;;  %v1475_v15 = vand.u32 2147483647, %v3794_v46  ;;  %v757_v33 = vld [vmem:[%s4991_s5 + $0x178] sm:$0xff] }
 0x263   : > { %v5896_v5 = vpop.eup %3797  ;;  %v1478_v38 = vadd.f32 1.0, %v3796_v13  ;;  %vm5907_vm14 = vcmp.lt.f32.partialorder %v1466_v40, 0.0004427343  ;;  %v1481_v25 = vmul.f32 -0.5, %v3796_v13  ;;  %v1599_v58 = vmax.f32 %v5833_v50, 0.0  ;;  %v1712_v50 = vld [vmem:[%s5004_s13 + $0x190] sm:$0xff] }
 0x264   : > { %v1487_v49 = vadd.f32 1.0, %v5896_v5  ;;  %v3287_v4 = vpack.c.bf16 %v1819_v11, %v1818_v45  ;;  %v1465_v32 = vmul.f32 %v3792_v22, %v1464_v12  ;;  %v1484_v16 = vand.u32 2147483647, %v3796_v13 }
 0x265   : > { %3809 = vlog2.f32 %v1478_v38  ;;  %v3800_v29 = vpop.eup %3799  ;;  %v1490_v47 = vmul.f32 -0.5, %v5896_v5  ;;  %v1493_v20 = vand.u32 2147483647, %v5896_v5  ;;  %v876_v0 = vand.u32 2147483647, %v5902_v1 }
 0x266   : > { %3811 = vlog2.f32 %v1487_v49  ;;  %2020 = vst [vmem:[%s5168_s6 + $0xb0] sm:$0xff] %v3287_v4  ;;  %v1496_v23 = vadd.f32 1.0, %v3800_v29  ;;  %v877_v7 = vand.u32 2147483647, %v5905_v44  ;;  %v1474_v55 = vmul.f32 %v3794_v46, %v1473_v51 }
 0x267   : > { %3813 = vpow2.f32 %v1040_v37  ;;  %vm5917_vm15 = vcmp.lt.f32.partialorder %v1475_v15, 0.0004427343  ;;  %v1499_v24 = vmul.f32 -0.5, %v3800_v29  ;;  %v1482_v42 = vadd.f32 1.0, %v1481_v25 }
 0x268   : > { %3815 = vlog2.f32 %v1496_v23  ;;  %v932_v22 = vsub.f32 0.0, %v876_v0  ;;  %v933_v36 = vsub.f32 0.0, %v877_v7  ;;  %vm5923_vm0 = vcmp.lt.f32.partialorder %v1484_v16, 0.0004427343  ;;  %v758_v7 = vld [vmem:[%s4991_s5 + $0x180] sm:$0xff] }
 0x269   : > { %v3802_v59 = vpop.eup %3801  ;;  %v1491_v46 = vadd.f32 1.0, %v1490_v47  ;;  %v1600_v41 = vmax.f32 %v5840_v39, 0.0  ;;  %vm5931_vm1 = vcmp.lt.f32.partialorder %v1493_v20, 0.0004427343  ;;  %v1502_v14 = vand.u32 2147483647, %v3800_v29 }
 0x26a   : > { %v3804_v26 = vpop.eup %3803  ;;  %v1462_v19 = vmul.f32 0.6931472, %v3802_v59  ;;  %v1500_v48 = vadd.f32 1.0, %v1499_v24  ;;  %v1042_v54 = vmul.f32 1.442695, %v932_v22  ;;  %v1483_v21 = vmul.f32 %v3796_v13, %v1482_v42  ;;  %v759_v24 = vld [vmem:[%s4991_s5 + $0x188] sm:$0xff] }
 0x26b   : > { %v5921_v27 = vpop.eup %3805  ;;  %v1471_v3 = vmul.f32 0.6931472, %v3804_v26  ;;  %v1044_v60 = vmul.f32 1.442695, %v933_v36  ;;  %v1492_v17 = vmul.f32 %v5896_v5, %v1491_v46  ;;  %vm5946_vm2 = vcmp.lt.f32.partialorder %v1502_v14, 0.0004427343 }
 0x26c   : > { %v1468_v61 = vsel %vm5907_vm14, %v1465_v32, %v1462_v19  ;;  %v1505_v35 = vadd.f32 1.0, %v5921_v27  ;;  %v5939_v39 = vpop.eup %3807  ;;  %v1508_v11 = vmul.f32 -0.5, %v5921_v27  ;;  %v1501_v4 = vmul.f32 %v3800_v29, %v1500_v48  ;;  %v1711_v29 = vld [vmem:[%s5004_s13 + $0x188] sm:$0xff] }
 0x26d   : > { %v1477_v30 = vsel %vm5917_vm15, %v1474_v55, %v1471_v3  ;;  %v1652_v57 = vadd.f32 %v1596_v9, %v1468_v61  ;;  %v1514_v9 = vadd.f32 1.0, %v5939_v39  ;;  %v1517_v25 = vmul.f32 -0.5, %v5939_v39 }
 0x26e   : > { %v1653_v31 = vadd.f32 %v1597_v10, %v1477_v30  ;;  %3817 = vlog2.f32 %v1505_v35  ;;  %v1509_v23 = vadd.f32 1.0, %v1508_v11  ;;  %v1511_v43 = vand.u32 2147483647, %v5921_v27 }
 0x26f   : > { %v3810_v45 = vpop.eup %3809  ;;  %v1764_v40 = vmul.f32 %v1708_v8, %v1652_v57  ;;  %3819 = vpow2.f32 %v1042_v54  ;;  %v1601_v8 = vmax.f32 %v5843_v62, 0.0  ;;  %v1603_v37 = vmax.f32 %v5873_v28, 0.0  ;;  %v6014_v62 = vld [vmem:[#allocation14 + $0x10] sm:$0xff] (!%p6793_p4) }
 0x270   : > { %v3812_v12 = vpop.eup %3811  ;;  %v1765_v38 = vmul.f32 %v1709_v53, %v1653_v31  ;;  %v1480_v49 = vmul.f32 0.6931472, %v3810_v45  ;;  %3821 = vlog2.f32 %v1514_v9  ;;  %v1510_v36 = vmul.f32 %v5921_v27, %v1509_v23  ;;  %v760_v27 = vld [vmem:[%s4991_s5 + $0x190] sm:$0xff]  ;;  %v763_v23 = vld [vmem:[%s4991_s5 + $0x1a8] sm:$0xff] }
 0x271   : > { %v1820_v13 = vadd.f32 %v1764_v40, %v756_v34  ;;  %v1489_v10 = vmul.f32 0.6931472, %v3812_v12  ;;  %v3814_v51 = vpop.eup %3813  ;;  %3823 = vpow2.f32 %v1044_v60  ;;  %vm5970_vm3 = vcmp.lt.f32.partialorder %v1511_v43, 0.0004427343  ;;  %v1713_v34 = vld [vmem:[%s5004_s13 + $0x198] sm:$0xff]  ;;  %v1714_v12 = vld [vmem:[%s5004_s13 + $0x1a0] sm:$0xff] }
 0x272   : > { %v1821_v5 = vadd.f32 %v1765_v38, %v757_v33  ;;  %v1486_v15 = vsel %vm5923_vm0, %v1483_v21, %v1480_v49  ;;  %v3816_v32 = vpop.eup %3815  ;;  %v1523_v20 = vadd.f32 1.0, %v3814_v51  ;;  %v1526_v19 = vmul.f32 -0.5, %v3814_v51  ;;  %v761_v40 = vld [vmem:[%s4991_s5 + $0x198] sm:$0xff] }
 0x273   : > { %v1495_v16 = vsel %vm5931_vm1, %v1492_v17, %v1489_v10  ;;  %v1654_v47 = vadd.f32 %v1598_v18, %v1486_v15  ;;  %v1498_v55 = vmul.f32 0.6931472, %v3816_v32  ;;  %v1518_v18 = vadd.f32 1.0, %v1517_v25  ;;  %v1715_v32 = vld [vmem:[%s5004_s13 + $0x1a8] sm:$0xff] }
 0x274   : > { %v3288_v0 = vpack.c.bf16 %v1821_v5, %v1820_v13  ;;  %v1655_v59 = vadd.f32 %v1599_v58, %v1495_v16  ;;  %3825 = vlog2.f32 %v1523_v20  ;;  %v1520_v58 = vand.u32 2147483647, %v5939_v39 }
 0x275   : > { %v1766_v26 = vmul.f32 %v1710_v63, %v1654_v47  ;;  %v1504_v2 = vsel %vm5946_vm2, %v1501_v4, %v1498_v55  ;;  %v1527_v14 = vadd.f32 1.0, %v1526_v19  ;;  %v1519_v57 = vmul.f32 %v5939_v39, %v1518_v18  ;;  %v762_v63 = vld [vmem:[%s4991_s5 + $0x1a0] sm:$0xff] }
 0x276   : > { %2021 = vst [vmem:[%s5168_s6 + $0xb8] sm:$0xff] %v3288_v0  ;;  %v1767_v42 = vmul.f32 %v1711_v29, %v1655_v59  ;;  %v1656_v3 = vadd.f32 %v1600_v41, %v1504_v2  ;;  %v1602_v53 = vmax.f32 %v5857_v6, 0.0  ;;  %vm5981_vm4 = vcmp.lt.f32.partialorder %v1520_v58, 0.0004427343  ;;  %v764_v58 = vld [vmem:[%s4991_s5 + $0x1b0] sm:$0xff] }
 0x277   : > { %v1822_v22 = vadd.f32 %v1766_v26, %v758_v7  ;;  %v1529_v31 = vand.u32 2147483647, %v3814_v51  ;;  %v1528_v39 = vmul.f32 %v3814_v51, %v1527_v14  ;;  %v1605_v18 = vmax.f32 %v5905_v44, 0.0  ;;  %v6005_v44 = vld [vmem:[#allocation10] sm:$0xf] (!%p6793_p4) }
 0x278   : > { %v3818_v52 = vpop.eup %3817  ;;  %v1823_v46 = vadd.f32 %v1767_v42, %v759_v24  ;;  %v1768_v41 = vmul.f32 %v1712_v50, %v1656_v3  ;;  %v1604_v24 = vmax.f32 %v5902_v1, 0.0  ;;  %v1716_v3 = vld [vmem:[%s5004_s13 + $0x1b0] sm:$0xff]  ;;  %v765_v1 = vld [vmem:[%s4991_s5 + $0x1b8] sm:$0xff] }
 0x279   : > { %v1507_v56 = vmul.f32 0.6931472, %v3818_v52  ;;  %v3820_v35 = vpop.eup %3819  ;;  %vm1530_vm5 = vcmp.lt.f32.partialorder %v1529_v31, 0.0004427343  ;;  %v6016_v31 = vld [vmem:[#allocation14 + $0x18] sm:$0xff] (!%p6793_p4) }
 0x27a   : > { %v3289_v30 = vpack.c.bf16 %v1823_v46, %v1822_v22  ;;  %v3822_v48 = vpop.eup %3821  ;;  %v1532_v21 = vadd.f32 1.0, %v3820_v35  ;;  %v1824_v11 = vadd.f32 %v1768_v41, %v760_v27  ;;  %v1535_v38 = vmul.f32 -0.5, %v3820_v35  ;;  %v1717_v46 = vld [vmem:[%s5004_s13 + $0x1b8] sm:$0xff]  ;;  %v6008_v41 = vld [vmem:[#allocation14] sm:$0xff] (!%p6793_p4) }
 0x27b   : > { %v1513_v54 = vsel %vm5970_vm3, %v1510_v36, %v1507_v56  ;;  %v3824_v60 = vpop.eup %3823  ;;  %v1516_v33 = vmul.f32 0.6931472, %v3822_v48  ;;  %v1538_v29 = vand.u32 2147483647, %v3820_v35  ;;  %v2032_v27 = vand.u32 (!%p6793_p4), 2147483647, %v6005_v44 }
 0x27c   : > { %2022 = vst [vmem:[%s5168_s6 + $0xc0] sm:$0xff] %v3289_v30  ;;  %v1657_v45 = vadd.f32 %v1601_v8, %v1513_v54  ;;  %3827 = vlog2.f32 %v1532_v21  ;;  %v1541_v6 = vadd.f32 1.0, %v3824_v60  ;;  %v1544_v51 = vmul.f32 -0.5, %v3824_v60 }
 0x27d   : > { %v1522_v9 = vsel %vm5981_vm4, %v1519_v57, %v1516_v33  ;;  %v1536_v16 = vadd.f32 1.0, %v1535_v38  ;;  %v1547_v28 = vand.u32 2147483647, %v3824_v60  ;;  %vm1539_vm6 = vcmp.lt.f32.partialorder %v1538_v29, 0.0004427343  ;;  %v6010_v57 = vld [vmem:[#allocation14 + $0x8] sm:$0xff] (!%p6793_p4) }
 0x27e   : > { %v1769_v17 = vmul.f32 %v1713_v34, %v1657_v45  ;;  %v3826_v49 = vpop.eup %3825  ;;  %v1658_v13 = vadd.f32 %v1602_v53, %v1522_v9  ;;  %3829 = vlog2.f32 %v1541_v6  ;;  %v1545_v20 = vadd.f32 1.0, %v1544_v51  ;;  %v6022_v9 = vld [vmem:[#allocation14 + $0x28] sm:$0xff] (!%p6793_p4)  ;;  %v6028_v51 = vld [vmem:[#allocation14 + $0x38] sm:$0xff] (!%p6793_p4) }
 0x27f   : > { %v1525_v4 = vmul.f32 0.6931472, %v3826_v49  ;;  %v1537_v59 = vmul.f32 %v3820_v35, %v1536_v16  ;;  %vm1548_vm7 = vcmp.lt.f32.partialorder %v1547_v28, 0.0004427343  ;;  %v2119_v53 = vand.u32 (!%p6793_p4), 2147483647, %v6008_v41 }
 0x280   : > { %v1825_v10 = vadd.f32 %v1769_v17, %v761_v40  ;;  %v1770_v5 = vmul.f32 %v1714_v12, %v1658_v13  ;;  %v1546_v19 = vmul.f32 %v3824_v60, %v1545_v20  ;;  %v2033_v48 = vsub.f32 (!%p6793_p4), 0.0, %v2032_v27  ;;  %v6034_v20 = vld [vmem:[#allocation14 + $0x40] sm:$0xff] (!%p6793_p4) }
 0x281   : > { %v1531_v25 = vsel %vm1530_vm5, %v1528_v39, %v1525_v4  ;;  %v2120_v54 = vand.u32 (!%p6793_p4), 2147483647, %v6010_v57  ;;  %v2151_v34 = vsub.f32 (!%p6793_p4), 0.0, %v2119_v53  ;;  %v2121_v45 = vand.u32 (!%p6793_p4), 2147483647, %v6014_v62  ;;  %v6026_v4 = vld [vmem:[#allocation14 + $0x30] sm:$0xff] (!%p6793_p4) }
 0x282   : > { %v3290_v15 = vpack.c.bf16 %v1825_v10, %v1824_v11  ;;  %v1659_v47 = vadd.f32 %v1603_v37, %v1531_v25  ;;  %v1826_v7 = vadd.f32 %v1770_v5, %v762_v63  ;;  %v2034_v21 = vmul.f32 (!%p6793_p4), 1.442695, %v2033_v48  ;;  %v6020_v11 = vld [vmem:[#allocation14 + $0x20] sm:$0xff] (!%p6793_p4) }
 0x283   : > { %v2152_v60 = vsub.f32 (!%p6793_p4), 0.0, %v2120_v54  ;;  %v2183_v33 = vmul.f32 (!%p6793_p4), 1.442695, %v2151_v34  ;;  %v2122_v40 = vand.u32 (!%p6793_p4), 2147483647, %v6016_v31  ;;  %v2153_v6 = vsub.f32 (!%p6793_p4), 0.0, %v2121_v45 }
 0x284   : > { %2023 = vst [vmem:[%s5168_s6 + $0xc8] sm:$0xff] %v3290_v15  ;;  %v1771_v0 = vmul.f32 %v1715_v32, %v1659_v47  ;;  %3831 = vpow2.f32 (!%p6793_p4), %v2034_v21  ;;  %v2123_v38 = vand.u32 (!%p6793_p4), 2147483647, %v6020_v11  ;;  %v2124_v49 = vand.u32 (!%p6793_p4), 2147483647, %v6022_v9 }
 0x285   : > { %v2185_v39 = vmul.f32 (!%p6793_p4), 1.442695, %v2152_v60  ;;  %3833 = vpow2.f32 (!%p6793_p4), %v2183_v33  ;;  %v2154_v17 = vsub.f32 (!%p6793_p4), 0.0, %v2122_v40  ;;  %v2187_v12 = vmul.f32 (!%p6793_p4), 1.442695, %v2153_v6 }
 0x286   : > { %v3828_v55 = vpop.eup %3827  ;;  %v1827_v43 = vadd.f32 %v1771_v0, %v763_v23  ;;  %v2155_v13 = vsub.f32 (!%p6793_p4), 0.0, %v2123_v38  ;;  %v2156_v10 = vsub.f32 (!%p6793_p4), 0.0, %v2124_v49  ;;  %v2125_v5 = vand.u32 (!%p6793_p4), 2147483647, %v6026_v4 }
 0x287   : > { %v1534_v26 = vmul.f32 0.6931472, %v3828_v55  ;;  %3835 = vpow2.f32 (!%p6793_p4), %v2185_v39  ;;  %v2189_v37 = vmul.f32 (!%p6793_p4), 1.442695, %v2154_v17  ;;  %v2126_v15 = vand.u32 (!%p6793_p4), 2147483647, %v6028_v51 }
 0x288   : > { %v3830_v42 = vpop.eup %3829  ;;  %v3291_v2 = vpack.c.bf16 %v1827_v43, %v1826_v7  ;;  %3837 = vpow2.f32 (!%p6793_p4), %v2187_v12  ;;  %v2050_v63 = vlaneseq (!%p6793_p4)  ;;  %v2191_v25 = vmul.f32 (!%p6793_p4), 1.442695, %v2155_v13 }
 0x289   : > { %v1540_v22 = vsel %vm1539_vm6, %v1537_v59, %v1534_v26  ;;  %v1543_v36 = vmul.f32 0.6931472, %v3830_v42  ;;  %3839 = vpow2.f32 (!%p6793_p4), %v2189_v37  ;;  %v2193_v32 = vmul.f32 (!%p6793_p4), 1.442695, %v2156_v10 }
 0x28a   : > { %2024 = vst [vmem:[%s5168_s6 + $0xd0] sm:$0xff] %v3291_v2  ;;  %v1660_v50 = vadd.f32 %v1604_v24, %v1540_v22  ;;  %v2045_v16 = vmax.f32 (!%p6793_p4), %v6005_v44, 0.0  ;;  %v2535_v47 = vmax.f32 (!%p6793_p4), %v6008_v41, 0.0  ;;  %v2157_v29 = vsub.f32 (!%p6793_p4), 0.0, %v2125_v5  ;;  %v6043_v2 = vld [vmem:[#allocation14 + $0x48] sm:$0xff] (!%p6793_p4) }
 0x28b   : > { %v1549_v52 = vsel %vm1548_vm7, %v1546_v19, %v1543_v36  ;;  %v2158_v23 = vsub.f32 (!%p6793_p4), 0.0, %v2126_v15  ;;  %v2536_v0 = vmax.f32 (!%p6793_p4), %v6010_v57, 0.0  ;;  %v2537_v7 = vmax.f32 (!%p6793_p4), %v6014_v62, 0.0  ;;  %v2600_v44 = vld [vmem:[#allocation16 + $0x8] sm:$0xff] (!%p6793_p4) }
 0x28c   : > { %v1661_v61 = vadd.f32 %v1605_v18, %v1549_v52  ;;  %v1772_v8 = vmul.f32 %v1716_v3, %v1660_v50  ;;  %v2538_v28 = vmax.f32 (!%p6793_p4), %v6016_v31, 0.0  ;;  %3841 = vpow2.f32 (!%p6793_p4), %v2191_v25 }
 0x28d   : > { %3843 = vpow2.f32 (!%p6793_p4), %v2193_v32  ;;  %v2539_v59 = vmax.f32 (!%p6793_p4), %v6020_v11, 0.0  ;;  %v2195_v55 = vmul.f32 (!%p6793_p4), 1.442695, %v2157_v29  ;;  %v2197_v43 = vmul.f32 (!%p6793_p4), 1.442695, %v2158_v23  ;;  %v2602_v29 = vld [vmem:[#allocation16 + $0x18] sm:$0xff] (!%p6793_p4) }
 0x28e   : > { %v1773_v56 = vmul.f32 %v1717_v46, %v1661_v61  ;;  %v1828_v14 = vadd.f32 %v1772_v8, %v764_v58  ;;  %2029 = sbr.rel (%p6793_p4) target bundleno = 811 (0x32b), region = 120  ;;  %v3832_v24 = vpop.eup (!%p6793_p4), %3831  ;;  %v2540_v26 = vmax.f32 (!%p6793_p4), %v6022_v9, 0.0  ;;  %v2541_v19 = vmax.f32 (!%p6793_p4), %v6026_v4, 0.0  ;;  %v2605_v11 = vld [vmem:[#allocation16 + $0x30] sm:$0xff] (!%p6793_p4)  ;;  %v6159_v4 = vld [vmem:[#allocation14 + $0x78] sm:$0xff] (!%p6793_p4) }
 0x28f   : > { %v2542_v42 = vmax.f32 (!%p6793_p4), %v6028_v51, 0.0  ;;  %v2127_v18 = vand.u32 (!%p6793_p4), 2147483647, %v6034_v20  ;;  %v3834_v22 = vpop.eup (!%p6793_p4), %3833  ;;  %v2036_v36 = vadd.f32 (!%p6793_p4), 1.0, %v3832_v24  ;;  %v2039_v3 = vmul.f32 (!%p6793_p4), -0.5, %v3832_v24 }
 0x290   : > { %v1829_v35 = vadd.f32 %v1773_v56, %v765_v1  ;;  %v2042_v50 = vand.u32 (!%p6793_p4), 2147483647, %v3832_v24  ;;  %3845 = vpow2.f32 (!%p6793_p4), %v2195_v55  ;;  %v2247_v52 = vadd.f32 (!%p6793_p4), 1.0, %v3834_v22 }
 0x291   : > { %v3836_v58 = vpop.eup (!%p6793_p4), %3835  ;;  %v2250_v46 = vmul.f32 (!%p6793_p4), -0.5, %v3834_v22  ;;  %v2253_v61 = vand.u32 (!%p6793_p4), 2147483647, %v3834_v22  ;;  %3847 = vpow2.f32 (!%p6793_p4), %v2197_v43  ;;  %v2040_v8 = vadd.f32 (!%p6793_p4), 1.0, %v2039_v3 }
 0x292   : > { %v3292_v30 = vpack.c.bf16 %v1829_v35, %v1828_v14  ;;  %3849 = vlog2.f32 (!%p6793_p4), %v2036_v36  ;;  %v2256_v1 = vadd.f32 (!%p6793_p4), 1.0, %v3836_v58  ;;  %v2128_v56 = vand.u32 (!%p6793_p4), 2147483647, %v6043_v2  ;;  %v3838_v14 = vpop.eup (!%p6793_p4), %3837 }
 0x293   : > { %3851 = vlog2.f32 (!%p6793_p4), %v2247_v52  ;;  %v2251_v35 = vadd.f32 (!%p6793_p4), 1.0, %v2250_v46  ;;  %v6047_v27 = vsub.f32 (!%p6793_p4), 0.0, %v2127_v18  ;;  %v3840_v53 = vpop.eup (!%p6793_p4), %3839  ;;  %vm6049_vm8 = vcmp.lt.f32.partialorder (!%p6793_p4), %v2042_v50, 0.0004427343 }
 0x294   : > { %2025 = vst [vmem:[%s5168_s6 + $0xd8] sm:$0xff] %v3292_v30  ;;  %v2259_v30 = vmul.f32 (!%p6793_p4), -0.5, %v3836_v58  ;;  %3853 = vlog2.f32 (!%p6793_p4), %v2256_v1  ;;  %v2262_v54 = vand.u32 (!%p6793_p4), 2147483647, %v3836_v58  ;;  %v2265_v34 = vadd.f32 (!%p6793_p4), 1.0, %v3838_v14 }
 0x295   : > { %v2041_v21 = vmul.f32 %v3832_v24, %v2040_v8  ;;  %vm6053_vm9 = vcmp.lt.f32.partialorder %v2253_v61, 0.0004427343  ;;  %v2268_v33 = vmul.f32 -0.5, %v3838_v14  ;;  %v2271_v40 = vand.u32 2147483647, %v3838_v14 }
 0x296   : > { %v2260_v45 = vadd.f32 1.0, %v2259_v30  ;;  %v2252_v39 = vmul.f32 %v3834_v22, %v2251_v35  ;;  %3855 = vlog2.f32 %v2265_v34  ;;  %v2274_v6 = vadd.f32 1.0, %v3840_v53  ;;  %v3842_v12 = vpop.eup %3841 }
 0x297   : > { %v2277_v17 = vmul.f32 -0.5, %v3840_v53  ;;  %vm6057_vm10 = vcmp.lt.f32.partialorder %v2262_v54, 0.0004427343  ;;  %v2269_v37 = vadd.f32 1.0, %v2268_v33  ;;  %v2280_v13 = vand.u32 2147483647, %v3840_v53  ;;  %v3844_v10 = vpop.eup %3843 }
 0x298   : > { %v2261_v38 = vmul.f32 %v3836_v58, %v2260_v45  ;;  %3857 = vlog2.f32 %v2274_v6  ;;  %v2283_v15 = vadd.f32 1.0, %v3842_v12  ;;  %v2286_v25 = vmul.f32 -0.5, %v3842_v12 }
 0x299   : > { %v2278_v5 = vadd.f32 1.0, %v2277_v17  ;;  %v6061_v32 = vmul.f32 %v3838_v14, %v2269_v37  ;;  %vm6063_vm11 = vcmp.lt.f32.partialorder %v2271_v40, 0.0004427343  ;;  %v2289_v23 = vand.u32 2147483647, %v3842_v12 }
 0x29a   : > { %v2292_v55 = vadd.f32 1.0, %v3844_v10  ;;  %v3846_v43 = vpop.eup %3845  ;;  %vm6067_vm12 = vcmp.lt.f32.partialorder %v2280_v13, 0.0004427343  ;;  %3859 = vlog2.f32 %v2283_v15  ;;  %v2287_v18 = vadd.f32 1.0, %v2286_v25  ;;  %v2047_v17 = vld [vmem:[#allocation11] sm:$0xf] }
 0x29b   : > { %v2295_v22 = vmul.f32 -0.5, %v3844_v10  ;;  %v3848_v36 = vpop.eup %3847  ;;  %vm6072_vm13 = vcmp.lt.s32.totalorder %v2050_v63, 512  ;;  %v6076_v50 = vmul.f32 %v3840_v53, %v2278_v5  ;;  %v2298_v58 = vand.u32 2147483647, %v3844_v10  ;;  %v2599_v15 = vld [vmem:[#allocation16] sm:$0xff] }
 0x29c   : > { %3861 = vlog2.f32 %v2292_v55  ;;  %v2301_v52 = vadd.f32 1.0, %v3846_v43  ;;  %v3850_v46 = vpop.eup %3849  ;;  %vm6078_vm14 = vcmp.lt.f32.partialorder %v2289_v23, 0.0004427343  ;;  %v2304_v1 = vmul.f32 -0.5, %v3846_v43 }
 0x29d   : > { %v2296_v8 = vadd.f32 1.0, %v2295_v22  ;;  %v2307_v14 = vand.u32 2147483647, %v3846_v43  ;;  %v3852_v35 = vpop.eup %3851  ;;  %v2038_v30 = vmul.f32 0.6931472, %v3850_v46  ;;  %v6082_v54 = vmul.f32 %v3842_v12, %v2287_v18 }
 0x29e   : > { %3863 = vlog2.f32 %v2301_v52  ;;  %v2310_v63 = vadd.f32 1.0, %v3848_v36  ;;  %v3854_v34 = vpop.eup %3853  ;;  %v2249_v53 = vmul.f32 0.6931472, %v3852_v35  ;;  %vm6086_vm15 = vcmp.lt.f32.partialorder %v2298_v58, 0.0004427343  ;;  %v2055_v58 = vld [vmem:[#allocation13] sm:$0xff] }
 0x29f   : > { %v6084_v45 = vmul.f32 %v3844_v10, %v2296_v8  ;;  %v2305_v40 = vadd.f32 1.0, %v2304_v1  ;;  %v2044_v6 = vsel %vm6049_vm8, %v2041_v21, %v2038_v30  ;;  %v2258_v37 = vmul.f32 0.6931472, %v3854_v34  ;;  %v2030_v21 = vld [vmem:[#allocation8] sm:$0xf] }
 0x2a0   : > { %3865 = vlog2.f32 %v2310_v63  ;;  %v2313_v13 = vmul.f32 -0.5, %v3848_v36  ;;  %v3856_v12 = vpop.eup %3855  ;;  %v2046_v5 = vadd.f32 %v2045_v16, %v2044_v6  ;;  %v2255_v10 = vsel %vm6053_vm9, %v2252_v39, %v2249_v53  ;;  %v2601_v8 = vld [vmem:[#allocation16 + $0x10] sm:$0xff] }
 0x2a1   : > { %v6096_v25 = vmul.f32 %v3846_v43, %v2305_v40  ;;  %vm6098_vm0 = vcmp.lt.f32.partialorder %v2307_v14, 0.0004427343  ;;  %v2316_v48 = vand.u32 2147483647, %v3848_v36  ;;  %v2264_v55 = vsel %vm6057_vm10, %v2261_v38, %v2258_v37  ;;  %v2056_v38 = vld [vmem:[#allocation13 + $0x8] sm:$0xff]  ;;  %v6120_v63 = vld [vmem:[#allocation14 + $0x50] sm:$0xff] }
 0x2a2   : > { %v2567_v18 = vadd.f32 %v2535_v47, %v2255_v10  ;;  %v2267_v16 = vmul.f32 0.6931472, %v3856_v12  ;;  %v2314_v22 = vadd.f32 1.0, %v2313_v13  ;;  %v3858_v60 = vpop.eup %3857  ;;  %v2048_v39 = vmul.f32 %v2047_v17, %v2046_v5  ;;  %v2057_v40 = vld [vmem:[#allocation13 + $0x10] sm:$0xff]  ;;  %v2058_v13 = vld [vmem:[#allocation13 + $0x18] sm:$0xff] }
 0x2a3   : > { %v2568_v43 = vadd.f32 %v2536_v0, %v2264_v55  ;;  %vm6108_vm1 = vcmp.lt.f32.partialorder %v2316_v48, 0.0004427343  ;;  %v2160_v49 = vsub.f32 0.0, %v2128_v56  ;;  %v2276_v47 = vmul.f32 0.6931472, %v3858_v60  ;;  %v6122_v56 = vld [vmem:[#allocation14 + $0x58] sm:$0xff] }
 0x2a4   : > { %v2631_v46 = vmul.f32 %v2599_v15, %v2567_v18  ;;  %v2273_v41 = vsel %vm6063_vm11, %v6061_v32, %v2267_v16  ;;  %v2315_v1 = vmul.f32 %v3848_v36, %v2314_v22  ;;  %v3860_v14 = vpop.eup %3859  ;;  %v2049_v35 = vadd.f32 %v2048_v39, %v2030_v21  ;;  %v2604_v15 = vld [vmem:[#allocation16 + $0x28] sm:$0xff]  ;;  %v2059_v18 = vld [vmem:[#allocation13 + $0x20] sm:$0xff] }
 0x2a5   : > { %v2632_v57 = vmul.f32 %v2600_v44, %v2568_v43  ;;  %v2569_v0 = vadd.f32 %v2537_v7, %v2273_v41  ;;  %v2199_v30 = vmul.f32 1.442695, %v6047_v27  ;;  %v2282_v32 = vsel %vm6067_vm12, %v6076_v50, %v2276_v47  ;;  %v2060_v44 = vld [vmem:[#allocation13 + $0x28] sm:$0xff]  ;;  %v2606_v43 = vld [vmem:[#allocation16 + $0x38] sm:$0xff]  ;;  %v2061_v47 = vld [vmem:[#allocation13 + $0x30] sm:$0xff] }
 0x2a6   : > { %v3862_v34 = vpop.eup %3861  ;;  %v2663_v53 = vadd.f32 %v2631_v46, %v2055_v58  ;;  %v2285_v36 = vmul.f32 0.6931472, %v3860_v14  ;;  %v2201_v6 = vmul.f32 1.442695, %v2160_v49  ;;  %2054 = vst.msk [vmem:[#allocation23] sm:$0xf] %vm6072_vm13, %v2049_v35  ;;  %v2570_v7 = vadd.f32 %v2538_v28, %v2282_v32 }
 0x2a7   : > { %v2664_v62 = vadd.f32 %v2632_v57, %v2056_v38  ;;  %v2633_v27 = vmul.f32 %v2601_v8, %v2569_v0  ;;  %v2294_v17 = vmul.f32 0.6931472, %v3862_v34  ;;  %3867 = vpow2.f32 %v2199_v30  ;;  %v2603_v28 = vld [vmem:[#allocation16 + $0x20] sm:$0xff]  ;;  %v6152_v38 = vld [vmem:[#allocation14 + $0x68] sm:$0xff]  ;;  %v2062_v8 = vld [vmem:[#allocation13 + $0x38] sm:$0xff] }
 0x2a8   : > { %v3864_v37 = vpop.eup %3863  ;;  %v2291_v12 = vsel %vm6078_vm14, %v6082_v54, %v2285_v36  ;;  %v2129_v24 = vand.u32 2147483647, %v6120_v63  ;;  %v2130_v50 = vand.u32 2147483647, %v6122_v56  ;;  %v2634_v3 = vmul.f32 %v2602_v29, %v2570_v7 }
 0x2a9   : > { %v3330_v5 = vpack.c.bf16 %v2664_v62, %v2663_v53  ;;  %v2665_v10 = vadd.f32 %v2633_v27, %v2057_v40  ;;  %v2300_v31 = vsel %vm6086_vm15, %v6084_v45, %v2294_v17  ;;  %v2571_v21 = vadd.f32 %v2539_v59, %v2291_v12  ;;  %v6146_v59 = vld [vmem:[#allocation14 + $0x60] sm:$0xff] }
 0x2aa   : > { %v3866_v48 = vpop.eup %3865  ;;  %v2572_v61 = vadd.f32 %v2540_v26, %v2300_v31  ;;  %v2303_v54 = vmul.f32 0.6931472, %v3864_v37  ;;  %3869 = vpow2.f32 %v2201_v6  ;;  %v2666_v55 = vadd.f32 %v2634_v3, %v2058_v13  ;;  %v6168_v31 = vld [vmem:[#allocation14 + $0x88] sm:$0xff] }
 0x2ab   : > { %3331 = vst [vmem:[#allocation25] sm:$0xff] %v3330_v5   ;;  %v2312_v16 = vmul.f32 0.6931472, %v3866_v48  ;;  %v2161_v22 = vsub.f32 0.0, %v2129_v24  ;;  %v2162_v60 = vsub.f32 0.0, %v2130_v50  ;;  %v2635_v33 = vmul.f32 %v2603_v28, %v2571_v21 }
 0x2ac   : > { %v2636_v45 = vmul.f32 %v2604_v15, %v2572_v61  ;;  %v2309_v39 = vsel %vm6098_vm0, %v6096_v25, %v2303_v54  ;;  %v3335_v9 = vpack.c.bf16 %v2666_v55, %v2665_v10  ;;  %v2131_v52 = vand.u32 2147483647, %v6146_v59  ;;  %v6166_v10 = vld [vmem:[#allocation14 + $0x80] sm:$0xff] }
 0x2ad   : > { %v2318_v26 = vsel %vm6108_vm1, %v2315_v1, %v2312_v16  ;;  %v2573_v58 = vadd.f32 %v2541_v19, %v2309_v39  ;;  %v2203_v49 = vmul.f32 1.442695, %v2161_v22  ;;  %v2667_v46 = vadd.f32 %v2635_v33, %v2059_v18  ;;  %v6157_v1 = vld [vmem:[#allocation14 + $0x70] sm:$0xff] }
 0x2ae   : > { %v2668_v41 = vadd.f32 %v2636_v45, %v2060_v44  ;;  %v2574_v25 = vadd.f32 %v2542_v42, %v2318_v26  ;;  %v2205_v23 = vmul.f32 1.442695, %v2162_v60  ;;  %3410 = vst [vmem:[#allocation25 + $0x8] sm:$0xff] %v3335_v9   ;;  %v2132_v57 = vand.u32 2147483647, %v6152_v38 }
 0x2af   : > { %v2637_v14 = vmul.f32 %v2605_v11, %v2573_v58  ;;  %3871 = vpow2.f32 %v2203_v49  ;;  %v2163_v30 = vsub.f32 0.0, %v2131_v52  ;;  %v2133_v53 = vand.u32 2147483647, %v6157_v1  ;;  %v6180_v58 = vld [vmem:[#allocation14 + $0x90] sm:$0xff] }
 0x2b0   : > { %v3340_v19 = vpack.c.bf16 %v2668_v41, %v2667_v46  ;;  %v2638_v35 = vmul.f32 %v2606_v43, %v2574_v25  ;;  %3873 = vpow2.f32 %v2205_v23  ;;  %v2164_v34 = vsub.f32 0.0, %v2132_v57  ;;  %v6187_v23 = vld [vmem:[#allocation14 + $0x98] sm:$0xff] }
 0x2b1   : > { %v2669_v0 = vadd.f32 %v2637_v14, %v2061_v47  ;;  %v3868_v51 = vpop.eup %3867  ;;  %v2134_v40 = vand.u32 2147483647, %v6159_v4  ;;  %v2207_v6 = vmul.f32 1.442695, %v2163_v30  ;;  %v2165_v17 = vsub.f32 0.0, %v2133_v53 }
 0x2b2   : > { %3411 = vst [vmem:[#allocation25 + $0x10] sm:$0xff] %v3340_v19   ;;  %v2670_v42 = vadd.f32 %v2638_v35, %v2062_v8  ;;  %v2319_v32 = vadd.f32 1.0, %v3868_v51  ;;  %v2322_v29 = vmul.f32 -0.5, %v3868_v51  ;;  %v2325_v36 = vand.u32 2147483647, %v3868_v51 }
 0x2b3   : > { %v2209_v27 = vmul.f32 1.442695, %v2164_v34  ;;  %v2166_v37 = vsub.f32 0.0, %v2134_v40  ;;  %v2543_v12 = vmax.f32 %v6034_v20, 0.0  ;;  %v2544_v24 = vmax.f32 %v6043_v2, 0.0  ;;  %v2066_v40 = vld [vmem:[#allocation13 + $0x58] sm:$0xff] }
 0x2b4   : > { %v3870_v62 = vpop.eup %3869  ;;  %v3345_v7 = vpack.c.bf16 %v2670_v42, %v2669_v0  ;;  %3875 = vlog2.f32 %v2319_v32  ;;  %v2323_v50 = vadd.f32 1.0, %v2322_v29  ;;  %v2211_v3 = vmul.f32 1.442695, %v2165_v17  ;;  %v2607_v17 = vld [vmem:[#allocation16 + $0x40] sm:$0xff] }
 0x2b5   : > { %v2328_v13 = vadd.f32 1.0, %v3870_v62  ;;  %v2331_v5 = vmul.f32 -0.5, %v3870_v62  ;;  %3877 = vpow2.f32 %v2207_v6  ;;  %v2545_v28 = vmax.f32 %v6120_v63, 0.0 }
 0x2b6   : > { %3412 = vst [vmem:[#allocation25 + $0x18] sm:$0xff] %v3345_v7   ;;  %v2546_v15 = vmax.f32 %v6122_v56, 0.0  ;;  %v2213_v48 = vmul.f32 1.442695, %v2166_v37  ;;  %vm6172_vm2 = vcmp.lt.f32.partialorder %v2325_v36, 0.0004427343  ;;  %v2324_v60 = vmul.f32 %v3868_v51, %v2323_v50 }
 0x2b7   : > { %3879 = vlog2.f32 %v2328_v13  ;;  %v2547_v61 = vmax.f32 %v6146_v59, 0.0  ;;  %v2548_v54 = vmax.f32 %v6152_v38, 0.0  ;;  %v2334_v18 = vand.u32 2147483647, %v3870_v62 }
 0x2b8   : > { %3881 = vpow2.f32 %v2209_v27  ;;  %v2135_v44 = vand.u32 2147483647, %v6166_v10  ;;  %v2136_v16 = vand.u32 2147483647, %v6168_v31  ;;  %v2332_v33 = vadd.f32 1.0, %v2331_v5 }
 0x2b9   : > { %v3872_v55 = vpop.eup %3871  ;;  %3883 = vpow2.f32 %v2211_v3  ;;  %vm6182_vm3 = vcmp.lt.f32.partialorder %v2334_v18, 0.0004427343  ;;  %v2549_v47 = vmax.f32 %v6157_v1, 0.0  ;;  %v2550_v8 = vmax.f32 %v6159_v4, 0.0  ;;  %v2069_v1 = vld [vmem:[#allocation13 + $0x70] sm:$0xff] }
 0x2ba   : > { %v3874_v22 = vpop.eup %3873  ;;  %v2337_v45 = vadd.f32 1.0, %v3872_v55  ;;  %v2340_v39 = vmul.f32 -0.5, %v3872_v55  ;;  %v2343_v11 = vand.u32 2147483647, %v3872_v55  ;;  %3885 = vpow2.f32 %v2213_v48 }
 0x2bb   : > { %v2346_v9 = vadd.f32 1.0, %v3874_v22  ;;  %v2349_v26 = vmul.f32 -0.5, %v3874_v22  ;;  %v2352_v49 = vand.u32 2147483647, %v3874_v22  ;;  %v2167_v46 = vsub.f32 0.0, %v2135_v44  ;;  %v2608_v44 = vld [vmem:[#allocation16 + $0x48] sm:$0xff] }
 0x2bc   : > { %3887 = vlog2.f32 %v2337_v45  ;;  %v2341_v43 = vadd.f32 1.0, %v2340_v39  ;;  %v2168_v25 = vsub.f32 0.0, %v2136_v16  ;;  %v2551_v52 = vmax.f32 %v6166_v10, 0.0 }
 0x2bd   : > { %3889 = vlog2.f32 %v2346_v9  ;;  %v2215_v14 = vmul.f32 1.442695, %v2167_v46  ;;  %v2137_v19 = vand.u32 2147483647, %v6180_v58  ;;  %v2333_v57 = vmul.f32 %v3870_v62, %v2332_v33 }
 0x2be   : > { %v3876_v35 = vpop.eup %3875  ;;  %vm6192_vm4 = vcmp.lt.f32.partialorder %v2343_v11, 0.0004427343  ;;  %v2350_v30 = vadd.f32 1.0, %v2349_v26  ;;  %v2217_v51 = vmul.f32 1.442695, %v2168_v25  ;;  %v2342_v53 = vmul.f32 %v3872_v55, %v2341_v43  ;;  %v2063_v55 = vld [vmem:[#allocation13 + $0x40] sm:$0xff] }
 0x2bf   : > { %v3878_v42 = vpop.eup %3877  ;;  %v2321_v34 = vmul.f32 0.6931472, %v3876_v35  ;;  %vm6196_vm5 = vcmp.lt.f32.partialorder %v2352_v49, 0.0004427343  ;;  %3891 = vpow2.f32 %v2215_v14  ;;  %v2138_v6 = vand.u32 2147483647, %v6187_v23 }
 0x2c0   : > { %v2355_v29 = vadd.f32 1.0, %v3878_v42  ;;  %v2358_v36 = vmul.f32 -0.5, %v3878_v42  ;;  %3893 = vpow2.f32 %v2217_v51  ;;  %v2552_v37 = vmax.f32 %v6168_v31, 0.0  ;;  %v2064_v11 = vld [vmem:[#allocation13 + $0x48] sm:$0xff] }
 0x2c1   : > { %v3880_v32 = vpop.eup %3879  ;;  %v2327_v7 = vsel %vm6172_vm2, %v2324_v60, %v2321_v34  ;;  %v2169_v13 = vsub.f32 0.0, %v2137_v19  ;;  %v2351_v3 = vmul.f32 %v3874_v22, %v2350_v30  ;;  %v2361_v48 = vand.u32 2147483647, %v3878_v42  ;;  %v2609_v30 = vld [vmem:[#allocation16 + $0x50] sm:$0xff] }
 0x2c2   : > { %v3882_v62 = vpop.eup %3881  ;;  %v2330_v27 = vmul.f32 0.6931472, %v3880_v32  ;;  %v2575_v5 = vadd.f32 %v2543_v12, %v2327_v7  ;;  %3895 = vlog2.f32 %v2355_v29  ;;  %v2359_v21 = vadd.f32 1.0, %v2358_v36  ;;  %v2610_v36 = vld [vmem:[#allocation16 + $0x58] sm:$0xff] }
 0x2c3   : > { %v6204_v50 = vpop.eup %3883  ;;  %v2364_v16 = vadd.f32 1.0, %v3882_v62  ;;  %v2367_v60 = vmul.f32 -0.5, %v3882_v62  ;;  %v6215_v12 = vsub.f32 0.0, %v2138_v6  ;;  %v2370_v9 = vand.u32 2147483647, %v3882_v62 }
 0x2c4   : > { %v2336_v18 = vsel %vm6182_vm3, %v2333_v57, %v2330_v27  ;;  %v6210_v33 = vpop.eup %3885  ;;  %v2639_v39 = vmul.f32 %v2607_v17, %v2575_v5  ;;  %v2373_v20 = vadd.f32 1.0, %v6204_v50  ;;  %v2376_v26 = vmul.f32 -0.5, %v6204_v50  ;;  %v2065_v27 = vld [vmem:[#allocation13 + $0x50] sm:$0xff] }
 0x2c5   : > { %v2576_v45 = vadd.f32 %v2544_v24, %v2336_v18  ;;  %3897 = vlog2.f32 %v2364_v16  ;;  %v2219_v43 = vmul.f32 1.442695, %v2169_v13  ;;  %v2360_v2 = vmul.f32 %v3878_v42, %v2359_v21 }
 0x2c6   : > { %v3888_v22 = vpop.eup %3887  ;;  %v2671_v41 = vadd.f32 %v2639_v39, %v2063_v55  ;;  %3899 = vlog2.f32 %v2373_v20  ;;  %vm6218_vm6 = vcmp.lt.f32.partialorder %v2361_v48, 0.0004427343  ;;  %v2368_v19 = vadd.f32 1.0, %v2367_v60 }
 0x2c7   : > { %v3890_v49 = vpop.eup %3889  ;;  %v2640_v46 = vmul.f32 %v2608_v44, %v2576_v45  ;;  %v2339_v25 = vmul.f32 0.6931472, %v3888_v22  ;;  %v2382_v51 = vadd.f32 1.0, %v6210_v33  ;;  %v2385_v34 = vmul.f32 -0.5, %v6210_v33  ;;  %v2611_v22 = vld [vmem:[#allocation16 + $0x60] sm:$0xff]  ;;  %v2070_v45 = vld [vmem:[#allocation13 + $0x78] sm:$0xff] }
 0x2c8   : > { %v2348_v14 = vmul.f32 0.6931472, %v3890_v49  ;;  %vm6232_vm7 = vcmp.lt.f32.partialorder %v2370_v9, 0.0004427343  ;;  %v2377_v0 = vadd.f32 1.0, %v2376_v26  ;;  %v2369_v63 = vmul.f32 %v3882_v62, %v2368_v19  ;;  %v6258_v26 = vld [vmem:[#allocation14 + $0xa0] sm:$0xff] }
 0x2c9   : > { %v2672_v35 = vadd.f32 %v2640_v46, %v2064_v11  ;;  %v2345_v57 = vsel %vm6192_vm4, %v2342_v53, %v2339_v25  ;;  %v6226_v32 = vpop.eup %3891  ;;  %v2379_v13 = vand.u32 2147483647, %v6204_v50  ;;  %3901 = vlog2.f32 %v2382_v51 }
 0x2ca   : > { %v2354_v29 = vsel %vm6196_vm5, %v2351_v3, %v2348_v14  ;;  %v2577_v42 = vadd.f32 %v2545_v28, %v2345_v57  ;;  %v6236_v53 = vpop.eup %3893  ;;  %v2388_v28 = vand.u32 2147483647, %v6210_v33  ;;  %v2391_v3 = vadd.f32 1.0, %v6226_v32  ;;  %v6262_v14 = vld [vmem:[#allocation14 + $0xa8] sm:$0xff] }
 0x2cb   : > { %v3350_v7 = vpack.c.bf16 %v2672_v35, %v2671_v41  ;;  %v2578_v17 = vadd.f32 %v2546_v15, %v2354_v29  ;;  %v2386_v18 = vadd.f32 1.0, %v2385_v34  ;;  %v2394_v44 = vmul.f32 -0.5, %v6226_v32  ;;  %v2613_v29 = vld [vmem:[#allocation16 + $0x70] sm:$0xff] }
 0x2cc   : > { %v2641_v5 = vmul.f32 %v2609_v30, %v2577_v42  ;;  %v3896_v48 = vpop.eup %3895  ;;  %v2400_v21 = vadd.f32 1.0, %v6236_v53  ;;  %3903 = vlog2.f32 %v2391_v3  ;;  %v2397_v16 = vand.u32 2147483647, %v6226_v32  ;;  %v2612_v30 = vld [vmem:[#allocation16 + $0x68] sm:$0xff] }
 0x2cd   : > { %3413 = vst [vmem:[#allocation25 + $0x20] sm:$0xff] %v3350_v7   ;;  %v2642_v55 = vmul.f32 %v2610_v36, %v2578_v17  ;;  %v2357_v15 = vmul.f32 0.6931472, %v3896_v48  ;;  %v2378_v62 = vmul.f32 %v6204_v50, %v2377_v0  ;;  %vm6247_vm8 = vcmp.lt.f32.partialorder %v2379_v13, 0.0004427343  ;;  %v6279_v0 = vld [vmem:[#allocation14 + $0xb0] sm:$0xff] }
 0x2ce   : > { %v2673_v56 = vadd.f32 %v2641_v5, %v2065_v27  ;;  %3905 = vlog2.f32 %v2400_v21  ;;  %vm6253_vm9 = vcmp.lt.f32.partialorder %v2388_v28, 0.0004427343  ;;  %v2403_v9 = vmul.f32 -0.5, %v6236_v53  ;;  %v2068_v7 = vld [vmem:[#allocation13 + $0x68] sm:$0xff] }
 0x2cf   : > { %v2674_v60 = vadd.f32 %v2642_v55, %v2066_v40  ;;  %v3898_v39 = vpop.eup %3897  ;;  %v2363_v20 = vsel %vm6218_vm6, %v2360_v2, %v2357_v15  ;;  %3907 = vpow2.f32 %v2219_v43  ;;  %v2395_v25 = vadd.f32 1.0, %v2394_v44  ;;  %v2067_v43 = vld [vmem:[#allocation13 + $0x60] sm:$0xff] }
 0x2d0   : > { %v3900_v50 = vpop.eup %3899  ;;  %v2366_v46 = vmul.f32 0.6931472, %v3898_v39  ;;  %v2579_v41 = vadd.f32 %v2547_v61, %v2363_v20  ;;  %v2387_v24 = vmul.f32 %v6210_v33, %v2386_v18  ;;  %vm6265_vm10 = vcmp.lt.f32.partialorder %v2397_v16, 0.0004427343 }
 0x2d1   : > { %v3355_v49 = vpack.c.bf16 %v2674_v60, %v2673_v56  ;;  %v2375_v2 = vmul.f32 0.6931472, %v3900_v50  ;;  %v2404_v35 = vadd.f32 1.0, %v2403_v9  ;;  %v2221_v59 = vmul.f32 1.442695, %v6215_v12  ;;  %v2615_v50 = vld [vmem:[#allocation16 + $0x80] sm:$0xff] }
 0x2d2   : > { %v2372_v57 = vsel %vm6232_vm7, %v2369_v63, %v2366_v46  ;;  %v2643_v51 = vmul.f32 %v2611_v22, %v2579_v41  ;;  %v2139_v61 = vand.u32 2147483647, %v6258_v26  ;;  %v2406_v42 = vand.u32 2147483647, %v6236_v53  ;;  %v2616_v46 = vld [vmem:[#allocation16 + $0x88] sm:$0xff] }
 0x2d3   : > { %3414 = vst [vmem:[#allocation25 + $0x28] sm:$0xff] %v3355_v49   ;;  %v2580_v34 = vadd.f32 %v2548_v54, %v2372_v57  ;;  %v2381_v33 = vsel %vm6247_vm8, %v2378_v62, %v2375_v2  ;;  %v2140_v36 = vand.u32 2147483647, %v6262_v14  ;;  %v3902_v6 = vpop.eup %3901  ;;  %v2396_v27 = vmul.f32 %v6226_v32, %v2395_v25  ;;  %v6284_v54 = vld [vmem:[#allocation14 + $0xb8] sm:$0xff]  ;;  %v2071_v2 = vld [vmem:[#allocation13 + $0x80] sm:$0xff] }
 0x2d4   : > { %v2581_v12 = vadd.f32 %v2549_v47, %v2381_v33  ;;  %3909 = vpow2.f32 %v2221_v59  ;;  %v2171_v38 = vsub.f32 0.0, %v2139_v61  ;;  %v2675_v13 = vadd.f32 %v2643_v51, %v2067_v43  ;;  %v2614_v32 = vld [vmem:[#allocation16 + $0x78] sm:$0xff]  ;;  %v6307_v51 = vld [vmem:[#allocation14 + $0xc8] sm:$0xff] }
 0x2d5   : > { %v2644_v17 = vmul.f32 %v2612_v30, %v2580_v34  ;;  %v2384_v40 = vmul.f32 0.6931472, %v3902_v6  ;;  %v2172_v5 = vsub.f32 0.0, %v2140_v36  ;;  %v2405_v28 = vmul.f32 %v6236_v53, %v2404_v35  ;;  %v2072_v35 = vld [vmem:[#allocation13 + $0x88] sm:$0xff]  ;;  %v6305_v30 = vld [vmem:[#allocation14 + $0xc0] sm:$0xff] }
 0x2d6   : > { %v2645_v63 = vmul.f32 %v2613_v29, %v2581_v12  ;;  %v2223_v3 = vmul.f32 1.442695, %v2171_v38  ;;  %v2141_v48 = vand.u32 2147483647, %v6279_v0  ;;  %v3904_v55 = vpop.eup %3903  ;;  %v2142_v21 = vand.u32 2147483647, %v6284_v54 }
 0x2d7   : > { %v2676_v18 = vadd.f32 %v2644_v17, %v2068_v7  ;;  %v2390_v47 = vsel %vm6253_vm9, %v2387_v24, %v2384_v40  ;;  %v2225_v44 = vmul.f32 1.442695, %v2172_v5  ;;  %v2393_v16 = vmul.f32 0.6931472, %v3904_v55 }
 0x2d8   : > { %v3906_v56 = vpop.eup %3905  ;;  %v2582_v15 = vadd.f32 %v2550_v8, %v2390_v47  ;;  %vm6293_vm11 = vcmp.lt.f32.partialorder %v2406_v42, 0.0004427343  ;;  %3911 = vpow2.f32 %v2223_v3  ;;  %v2173_v20 = vsub.f32 0.0, %v2141_v48  ;;  %v6315_v3 = vld [vmem:[#allocation14 + $0xd0] sm:$0xff] }
 0x2d9   : > { %v3908_v60 = vpop.eup %3907  ;;  %v3360_v62 = vpack.c.bf16 %v2676_v18, %v2675_v13  ;;  %v2402_v39 = vmul.f32 0.6931472, %v3906_v56  ;;  %3913 = vpow2.f32 %v2225_v44  ;;  %v2677_v11 = vadd.f32 %v2645_v63, %v2069_v1 }
 0x2da   : > { %v2646_v22 = vmul.f32 %v2614_v32, %v2582_v15  ;;  %v2399_v9 = vsel %vm6265_vm10, %v2396_v27, %v2393_v16  ;;  %v2409_v4 = vadd.f32 1.0, %v3908_v60  ;;  %v2174_v41 = vsub.f32 0.0, %v2142_v21  ;;  %v6322_v32 = vld [vmem:[#allocation14 + $0xd8] sm:$0xff] }
 0x2db   : > { %3415 = vst [vmem:[#allocation25 + $0x30] sm:$0xff] %v3360_v62   ;;  %v2408_v8 = vsel %vm6293_vm11, %v2405_v28, %v2402_v39  ;;  %v2583_v49 = vadd.f32 %v2551_v52, %v2399_v9  ;;  %v2412_v43 = vmul.f32 -0.5, %v3908_v60  ;;  %v2227_v57 = vmul.f32 1.442695, %v2173_v20  ;;  %v6327_v20 = vld [vmem:[#allocation14 + $0xe0] sm:$0xff] }
 0x2dc   : > { %v2678_v25 = vadd.f32 %v2646_v22, %v2070_v45  ;;  %v2584_v24 = vadd.f32 %v2552_v37, %v2408_v8  ;;  %3915 = vlog2.f32 %v2409_v4  ;;  %v2229_v52 = vmul.f32 1.442695, %v2174_v41 }
 0x2dd   : > { %v2647_v19 = vmul.f32 %v2615_v50, %v2583_v49  ;;  %v2415_v33 = vand.u32 2147483647, %v3908_v60  ;;  %3917 = vpow2.f32 %v2227_v57  ;;  %v2143_v31 = vand.u32 2147483647, %v6305_v30 }
 0x2de   : > { %v3910_v59 = vpop.eup %3909  ;;  %v3365_v61 = vpack.c.bf16 %v2678_v25, %v2677_v11  ;;  %v2648_v10 = vmul.f32 %v2616_v46, %v2584_v24  ;;  %v2144_v37 = vand.u32 2147483647, %v6307_v51  ;;  %v2413_v36 = vadd.f32 1.0, %v2412_v43  ;;  %v2617_v46 = vld [vmem:[#allocation16 + $0x90] sm:$0xff] }
 0x2df   : > { %v2679_v34 = vadd.f32 %v2647_v19, %v2071_v2  ;;  %v2418_v29 = vadd.f32 1.0, %v3910_v59  ;;  %v2421_v6 = vmul.f32 -0.5, %v3910_v59  ;;  %v2553_v7 = vmax.f32 %v6180_v58, 0.0  ;;  %v6338_v2 = vld [vmem:[#allocation14 + $0xe8] sm:$0xff] }
 0x2e0   : > { %3416 = vst [vmem:[#allocation25 + $0x38] sm:$0xff] %v3365_v61   ;;  %v2680_v42 = vadd.f32 %v2648_v10, %v2072_v35  ;;  %v2175_v38 = vsub.f32 0.0, %v2143_v31  ;;  %v2176_v17 = vsub.f32 0.0, %v2144_v37  ;;  %v2554_v40 = vmax.f32 %v6187_v23, 0.0  ;;  %v2618_v37 = vld [vmem:[#allocation16 + $0x98] sm:$0xff] }
 0x2e1   : > { %3919 = vlog2.f32 %v2418_v29  ;;  %v2555_v63 = vmax.f32 %v6258_v26, 0.0  ;;  %v2556_v28 = vmax.f32 %v6262_v14, 0.0  ;;  %vm6317_vm12 = vcmp.lt.f32.partialorder %v2415_v33, 0.0004427343 }
 0x2e2   : > { %v3912_v12 = vpop.eup %3911  ;;  %v3370_v27 = vpack.c.bf16 %v2680_v42, %v2679_v34  ;;  %3921 = vpow2.f32 %v2229_v52  ;;  %v2557_v55 = vmax.f32 %v6279_v0, 0.0  ;;  %v2231_v18 = vmul.f32 1.442695, %v2175_v38  ;;  %v2073_v42 = vld [vmem:[#allocation13 + $0x90] sm:$0xff] }
 0x2e3   : > { %v3914_v13 = vpop.eup %3913  ;;  %v2427_v5 = vadd.f32 1.0, %v3912_v12  ;;  %v2414_v1 = vmul.f32 %v3908_v60, %v2413_v36  ;;  %v2424_v47 = vand.u32 2147483647, %v3910_v59  ;;  %v2233_v23 = vmul.f32 1.442695, %v2176_v17 }
 0x2e4   : > { %3417 = vst [vmem:[#allocation25 + $0x40] sm:$0xff] %v3370_v27   ;;  %v2436_v58 = vadd.f32 1.0, %v3914_v13  ;;  %v2422_v21 = vadd.f32 1.0, %v2421_v6  ;;  %v2430_v56 = vmul.f32 -0.5, %v3912_v12  ;;  %v2433_v15 = vand.u32 2147483647, %v3912_v12 }
 0x2e5   : > { %3923 = vlog2.f32 %v2427_v5  ;;  %v2439_v53 = vmul.f32 -0.5, %v3914_v13  ;;  %v2145_v62 = vand.u32 2147483647, %v6315_v3  ;;  %v2442_v45 = vand.u32 2147483647, %v3914_v13 }
 0x2e6   : > { %v3916_v44 = vpop.eup %3915  ;;  %3925 = vlog2.f32 %v2436_v58  ;;  %v2558_v39 = vmax.f32 %v6284_v54, 0.0  ;;  %v2146_v60 = vand.u32 2147483647, %v6322_v32  ;;  %vm6331_vm13 = vcmp.lt.f32.partialorder %v2424_v47, 0.0004427343  ;;  %v2074_v58 = vld [vmem:[#allocation13 + $0x98] sm:$0xff] }
 0x2e7   : > { %v2411_v16 = vmul.f32 0.6931472, %v3916_v44  ;;  %3927 = vpow2.f32 %v2231_v18  ;;  %v2559_v9 = vmax.f32 %v6305_v30, 0.0  ;;  %v2177_v50 = vsub.f32 0.0, %v2145_v62  ;;  %v6336_v4 = vpop.eup %3917 }
 0x2e8   : > { %3929 = vpow2.f32 %v2233_v23  ;;  %v2423_v8 = vmul.f32 %v3910_v59, %v2422_v21  ;;  %v2431_v41 = vadd.f32 1.0, %v2430_v56  ;;  %v2178_v25 = vsub.f32 0.0, %v2146_v60 }
 0x2e9   : > { %v2417_v22 = vsel %vm6317_vm12, %v2414_v1, %v2411_v16  ;;  %vm6340_vm14 = vcmp.lt.f32.partialorder %v2433_v15, 0.0004427343  ;;  %v2440_v19 = vadd.f32 1.0, %v2439_v53  ;;  %v2445_v43 = vadd.f32 1.0, %v6336_v4 }
 0x2ea   : > { %v2585_v49 = vadd.f32 %v2553_v7, %v2417_v22  ;;  %v2147_v57 = vand.u32 2147483647, %v6327_v20  ;;  %vm6348_vm15 = vcmp.lt.f32.partialorder %v2442_v45, 0.0004427343  ;;  %v2235_v52 = vmul.f32 1.442695, %v2177_v50 }
 0x2eb   : > { %v3920_v24 = vpop.eup %3919  ;;  %3931 = vlog2.f32 %v2445_v43  ;;  %v2237_v29 = vmul.f32 1.442695, %v2178_v25  ;;  %v2432_v36 = vmul.f32 %v3912_v12, %v2431_v41  ;;  %v2448_v6 = vmul.f32 -0.5, %v6336_v4  ;;  %v2620_v22 = vld [vmem:[#allocation16 + $0xa8] sm:$0xff]  ;;  %v2075_v50 = vld [vmem:[#allocation13 + $0xa0] sm:$0xff] }
 0x2ec   : > { %v6346_v61 = vpop.eup %3921  ;;  %v2420_v10 = vmul.f32 0.6931472, %v3920_v24  ;;  %v2649_v34 = vmul.f32 %v2617_v46, %v2585_v49  ;;  %v2148_v7 = vand.u32 2147483647, %v6338_v2  ;;  %v2441_v17 = vmul.f32 %v3914_v13, %v2440_v19  ;;  %v2076_v25 = vld [vmem:[#allocation13 + $0xa8] sm:$0xff] }
 0x2ed   : > { %v2454_v33 = vadd.f32 1.0, %v6346_v61  ;;  %v2179_v5 = vsub.f32 0.0, %v2147_v57  ;;  %v2451_v1 = vand.u32 2147483647, %v6336_v4  ;;  %v2457_v47 = vmul.f32 -0.5, %v6346_v61 }
 0x2ee   : > { %v2426_v31 = vsel %vm6331_vm13, %v2423_v8, %v2420_v10  ;;  %v2681_v44 = vadd.f32 %v2649_v34, %v2073_v42  ;;  %v2449_v15 = vadd.f32 1.0, %v2448_v6  ;;  %v2180_v53 = vsub.f32 0.0, %v2148_v7 }
 0x2ef   : > { %v3924_v27 = vpop.eup %3923  ;;  %v2586_v38 = vadd.f32 %v2554_v40, %v2426_v31  ;;  %3933 = vlog2.f32 %v2454_v33  ;;  %v2619_v40 = vld [vmem:[#allocation16 + $0xa0] sm:$0xff]  ;;  %v2239_v11 = vmul.f32 1.442695, %v2179_v5  ;;  %v2458_v49 = vadd.f32 1.0, %v2457_v47 }
 0x2f0   : > { %v3926_v48 = vpop.eup %3925  ;;  %v2429_v18 = vmul.f32 0.6931472, %v3924_v27  ;;  %3935 = vpow2.f32 %v2235_v52  ;;  %v2460_v35 = vand.u32 2147483647, %v6346_v61  ;;  %v2450_v26 = vmul.f32 %v6336_v4, %v2449_v15 }
 0x2f1   : > { %v6359_v23 = vpop.eup %3927  ;;  %v2650_v12 = vmul.f32 %v2618_v37, %v2586_v38  ;;  %v2438_v21 = vmul.f32 0.6931472, %v3926_v48  ;;  %3937 = vpow2.f32 %v2237_v29  ;;  %vm6376_vm0 = vcmp.lt.f32.partialorder %v2451_v1, 0.0004427343  ;;  %v6388_v37 = vld [vmem:[#allocation14 + $0xf0] sm:$0xff] }
 0x2f2   : > { %v6361_v56 = vpop.eup %3929  ;;  %v2435_v13 = vsel %vm6340_vm14, %v2432_v36, %v2429_v18  ;;  %v2463_v16 = vadd.f32 1.0, %v6359_v23  ;;  %v2466_v19 = vmul.f32 -0.5, %v6359_v23  ;;  %v2241_v10 = vmul.f32 1.442695, %v2180_v53  ;;  %v6390_v36 = vld [vmem:[#allocation14 + $0xf8] sm:$0xff]  ;;  %v2621_v38 = vld [vmem:[#allocation16 + $0xb0] sm:$0xff] }
 0x2f3   : > { %v2682_v62 = vadd.f32 %v2650_v12, %v2074_v58  ;;  %v2444_v45 = vsel %vm6348_vm15, %v2441_v17, %v2438_v21  ;;  %v2587_v60 = vadd.f32 %v2555_v63, %v2435_v13  ;;  %v2472_v46 = vadd.f32 1.0, %v6361_v56  ;;  %v2077_v48 = vld [vmem:[#allocation13 + $0xb0] sm:$0xff]  ;;  %v2078_v53 = vld [vmem:[#allocation13 + $0xb8] sm:$0xff] }
 0x2f4   : > { %v2588_v8 = vadd.f32 %v2556_v28, %v2444_v45  ;;  %3939 = vlog2.f32 %v2463_v16  ;;  %v2475_v57 = vmul.f32 -0.5, %v6361_v56  ;;  %v2459_v34 = vmul.f32 %v6346_v61, %v2458_v49 }
 0x2f5   : > { %v3375_v41 = vpack.c.bf16 %v2682_v62, %v2681_v44  ;;  %v2651_v24 = vmul.f32 %v2619_v40, %v2587_v60  ;;  %3941 = vlog2.f32 %v2472_v46  ;;  %v3932_v14 = vpop.eup %3931  ;;  %v2560_v33 = vmax.f32 %v6307_v51, 0.0  ;;  %v2622_v44 = vld [vmem:[#allocation16 + $0xb8] sm:$0xff] }
 0x2f6   : > { %v2652_v43 = vmul.f32 %v2620_v22, %v2588_v8  ;;  %3943 = vpow2.f32 %v2239_v11  ;;  %v2447_v52 = vmul.f32 0.6931472, %v3932_v14  ;;  %vm6383_vm1 = vcmp.lt.f32.partialorder %v2460_v35, 0.0004427343  ;;  %v2626_v62 = vld [vmem:[#allocation16 + $0xd8] sm:$0xff] }
 0x2f7   : > { %3418 = vst [vmem:[#allocation25 + $0x48] sm:$0xff] %v3375_v41   ;;  %v2683_v28 = vadd.f32 %v2651_v24, %v2075_v50  ;;  %v2467_v42 = vadd.f32 1.0, %v2466_v19  ;;  %v2561_v31 = vmax.f32 %v6315_v3, 0.0  ;;  %3945 = vpow2.f32 %v2241_v10 }
 0x2f8   : > { %v2684_v59 = vadd.f32 %v2652_v43, %v2076_v25  ;;  %v2453_v61 = vsel %vm6376_vm0, %v2450_v26, %v2447_v52  ;;  %v2469_v17 = vand.u32 2147483647, %v6359_v23  ;;  %v2476_v18 = vadd.f32 1.0, %v2475_v57  ;;  %v2623_v43 = vld [vmem:[#allocation16 + $0xc0] sm:$0xff] }
 0x2f9   : > { %v3934_v29 = vpop.eup %3933  ;;  %v2589_v58 = vadd.f32 %v2557_v55, %v2453_v61  ;;  %v2478_v1 = vand.u32 2147483647, %v6361_v56  ;;  %v2149_v13 = vand.u32 2147483647, %v6388_v37  ;;  %v2150_v40 = vand.u32 2147483647, %v6390_v36 }
 0x2fa   : > { %v6392_v6 = vpop.eup %3935  ;;  %v3380_v7 = vpack.c.bf16 %v2684_v59, %v2683_v28  ;;  %v2456_v27 = vmul.f32 0.6931472, %v3934_v29  ;;  %v2468_v15 = vmul.f32 %v6359_v23, %v2467_v42  ;;  %vm6411_vm2 = vcmp.lt.f32.partialorder %v2469_v17, 0.0004427343  ;;  %v2079_v59 = vld [vmem:[#allocation13 + $0xc0] sm:$0xff] }
 0x2fb   : > { %v6397_v5 = vpop.eup %3937  ;;  %v2481_v47 = vadd.f32 1.0, %v6392_v6  ;;  %v2653_v55 = vmul.f32 %v2621_v38, %v2589_v58  ;;  %v2484_v45 = vmul.f32 -0.5, %v6392_v6  ;;  %v2477_v54 = vmul.f32 %v6361_v56, %v2476_v18 }
 0x2fc   : > { %3419 = vst [vmem:[#allocation25 + $0x50] sm:$0xff] %v3380_v7   ;;  %v2462_v12 = vsel %vm6383_vm1, %v2459_v34, %v2456_v27  ;;  %v2490_v21 = vadd.f32 1.0, %v6397_v5  ;;  %v2493_v60 = vmul.f32 -0.5, %v6397_v5  ;;  %vm6420_vm3 = vcmp.lt.f32.partialorder %v2478_v1, 0.0004427343  ;;  %v2624_v34 = vld [vmem:[#allocation16 + $0xc8] sm:$0xff] }
 0x2fd   : > { %v2590_v0 = vadd.f32 %v2558_v39, %v2462_v12  ;;  %3947 = vlog2.f32 %v2481_v47  ;;  %v2685_v11 = vadd.f32 %v2653_v55, %v2077_v48  ;;  %v6418_v39 = vld [vmem:[#allocation19] sm:$0x1]  ;;  %v2487_v49 = vand.u32 2147483647, %v6392_v6 }
 0x2fe   : > { %v3940_v16 = vpop.eup %3939  ;;  %3949 = vlog2.f32 %v2490_v21  ;;  %v2181_v46 = vsub.f32 0.0, %v2149_v13  ;;  %v2182_v41 = vsub.f32 0.0, %v2150_v40  ;;  %v2496_v56 = vand.u32 2147483647, %v6397_v5 }
 0x2ff   : > { %v2654_v22 = vmul.f32 %v2622_v44, %v2590_v0  ;;  %v2465_v50 = vmul.f32 0.6931472, %v3940_v16  ;;  %v3942_v23 = vpop.eup %3941  ;;  %v2485_v63 = vadd.f32 1.0, %v2484_v45  ;;  %v2494_v14 = vadd.f32 1.0, %v2493_v60  ;;  %v2081_v45 = vld [vmem:[#allocation13 + $0xd0] sm:$0xff] }
 0x300   : > { %v3944_v25 = vpop.eup %3943  ;;  %v2474_v19 = vmul.f32 0.6931472, %v3942_v23  ;;  %v2243_v29 = vmul.f32 1.442695, %v2181_v46  ;;  %v2857_v4 = vand.u32 2147483647, %v6418_v39 }
 0x301   : > { %v2686_v24 = vadd.f32 %v2654_v22, %v2078_v53  ;;  %v2471_v35 = vsel %vm6411_vm2, %v2468_v15, %v2465_v50  ;;  %v2499_v28 = vadd.f32 1.0, %v3944_v25  ;;  %v3946_v57 = vpop.eup %3945  ;;  %v2245_v30 = vmul.f32 1.442695, %v2182_v41  ;;  %v2625_v15 = vld [vmem:[#allocation16 + $0xd0] sm:$0xff] }
 0x302   : > { %v2591_v26 = vadd.f32 %v2559_v9, %v2471_v35  ;;  %v2480_v52 = vsel %vm6420_vm3, %v2477_v54, %v2474_v19  ;;  %v2080_v9 = vld [vmem:[#allocation13 + $0xc8] sm:$0xff]  ;;  %vm6435_vm4 = vcmp.lt.f32.partialorder %v2487_v49, 0.0004427343  ;;  %v2562_v27 = vmax.f32 %v6322_v32, 0.0 }
 0x303   : > { %v3385_v10 = vpack.c.bf16 %v2686_v24, %v2685_v11  ;;  %v2592_v42 = vadd.f32 %v2560_v33, %v2480_v52  ;;  %3951 = vlog2.f32 %v2499_v28  ;;  %v2502_v38 = vmul.f32 -0.5, %v3944_v25  ;;  %v2082_v11 = vld [vmem:[#allocation13 + $0xd8] sm:$0xff] }
 0x304   : > { %v2655_v7 = vmul.f32 %v2623_v43, %v2591_v26  ;;  %v2508_v17 = vadd.f32 1.0, %v3946_v57  ;;  %v2486_v18 = vmul.f32 %v6392_v6, %v2485_v63  ;;  %3953 = vpow2.f32 %v2243_v29  ;;  %v2627_v63 = vld [vmem:[#allocation16 + $0xe0] sm:$0xff]  ;;  %v2628_v29 = vld [vmem:[#allocation16 + $0xe8] sm:$0xff] }
 0x305   : > { %3420 = vst [vmem:[#allocation25 + $0x58] sm:$0xff] %v3385_v10   ;;  %v2656_v48 = vmul.f32 %v2624_v34, %v2592_v42  ;;  %v2495_v33 = vmul.f32 %v6397_v5, %v2494_v14  ;;  %vm6442_vm5 = vcmp.lt.f32.partialorder %v2496_v56, 0.0004427343  ;;  %v2858_v47 = vsub.f32 0.0, %v2857_v4 }
 0x306   : > { %v2687_v58 = vadd.f32 %v2655_v7, %v2079_v59  ;;  %3955 = vlog2.f32 %v2508_v17  ;;  %v2511_v32 = vmul.f32 -0.5, %v3946_v57  ;;  %v2503_v40 = vadd.f32 1.0, %v2502_v38 }
 0x307   : > { %v3948_v51 = vpop.eup %3947  ;;  %v2688_v44 = vadd.f32 %v2656_v48, %v2080_v9  ;;  %3957 = vpow2.f32 %v2245_v30  ;;  %v2859_v0 = vmul.f32 1.442695, %v2858_v47  ;;  %v2505_v5 = vand.u32 2147483647, %v3944_v25 }
 0x308   : > { %v3950_v12 = vpop.eup %3949  ;;  %v2483_v21 = vmul.f32 0.6931472, %v3948_v51  ;;  %v2512_v22 = vadd.f32 1.0, %v2511_v32  ;;  %v2504_v54 = vmul.f32 %v3944_v25, %v2503_v40  ;;  %v2514_v23 = vand.u32 2147483647, %v3946_v57 }
 0x309   : > { %v2492_v13 = vmul.f32 0.6931472, %v3950_v12  ;;  %v3390_v55 = vpack.c.bf16 %v2688_v44, %v2687_v58  ;;  %3959 = vpow2.f32 %v2859_v0  ;;  %vm6452_vm6 = vcmp.lt.f32.partialorder %v2505_v5, 0.0004427343  ;;  %v2629_v5 = vld [vmem:[#allocation16 + $0xf0] sm:$0xff] }
 0x30a   : > { %v2489_v6 = vsel %vm6435_vm4, %v2486_v18, %v2483_v21  ;;  %v2563_v41 = vmax.f32 %v6327_v20, 0.0  ;;  %v2513_v19 = vmul.f32 %v3946_v57, %v2512_v22  ;;  %vm6459_vm7 = vcmp.lt.f32.partialorder %v2514_v23, 0.0004427343  ;;  %v2083_v57 = vld [vmem:[#allocation13 + $0xe0] sm:$0xff]  ;;  %v2630_v22 = vld [vmem:[#allocation16 + $0xf8] sm:$0xff] }
 0x30b   : > { %v2498_v16 = vsel %vm6442_vm5, %v2495_v33, %v2492_v13  ;;  %v2593_v53 = vadd.f32 %v2561_v31, %v2489_v6  ;;  %3421 = vst [vmem:[#allocation25 + $0x60] sm:$0xff] %v3390_v55   ;;  %v2564_v26 = vmax.f32 %v6338_v2, 0.0  ;;  %v2084_v2 = vld [vmem:[#allocation13 + $0xe8] sm:$0xff]  ;;  %v2565_v44 = vmax.f32 %v6388_v37, 0.0  ;;  %v2086_v23 = vld [vmem:[#allocation13 + $0xf8] sm:$0xff] }
 0x30c   : > { %v2594_v60 = vadd.f32 %v2562_v27, %v2498_v16  ;;  %v2566_v55 = vmax.f32 %v6390_v36, 0.0  ;;  %v2870_v37 = vmax.f32 %v6418_v39, 0.0  ;;  %v2872_v36 = vld [vmem:[#allocation20] sm:$0x1] }
 0x30d   : > { %v2657_v50 = vmul.f32 %v2625_v15, %v2593_v53  ;;  %v3952_v8 = vpop.eup %3951 }
 0x30e   : > { %v2658_v49 = vmul.f32 %v2626_v62, %v2594_v60  ;;  %v2501_v31 = vmul.f32 0.6931472, %v3952_v8  ;;  %v3954_v24 = vpop.eup %3953 }
 0x30f   : > { %v2689_v3 = vadd.f32 %v2657_v50, %v2081_v45  ;;  %v2517_v14 = vadd.f32 1.0, %v3954_v24  ;;  %v2520_v42 = vmul.f32 -0.5, %v3954_v24  ;;  %v2523_v58 = vand.u32 2147483647, %v3954_v24  ;;  %v2085_v45 = vld [vmem:[#allocation13 + $0xf0] sm:$0xff] }
 0x310   : > { %v2690_v35 = vadd.f32 %v2658_v49, %v2082_v11  ;;  %v3956_v43 = vpop.eup %3955  ;;  %v2507_v56 = vsel %vm6452_vm6, %v2504_v54, %v2501_v31  ;;  %v2855_v31 = vld [vmem:[#allocation17] sm:$0x1] }
 0x311   : > { %v3958_v28 = vpop.eup %3957  ;;  %v2510_v20 = vmul.f32 0.6931472, %v3956_v43  ;;  %v2595_v59 = vadd.f32 %v2563_v41, %v2507_v56  ;;  %3961 = vlog2.f32 %v2517_v14  ;;  %v2521_v17 = vadd.f32 1.0, %v2520_v42 }
 0x312   : > { %v3395_v10 = vpack.c.bf16 %v2690_v35, %v2689_v3  ;;  %v2526_v52 = vadd.f32 1.0, %v3958_v28  ;;  %v2529_v9 = vmul.f32 -0.5, %v3958_v28  ;;  %v2532_v1 = vand.u32 2147483647, %v3958_v28 }
 0x313   : > { %v2516_v34 = vsel %vm6459_vm7, %v2513_v19, %v2510_v20  ;;  %v2659_v4 = vmul.f32 %v2627_v63, %v2595_v59  ;;  %v3960_v7 = vpop.eup %3959  ;;  %v2522_v47 = vmul.f32 %v3954_v24, %v2521_v17  ;;  %vm2524_vm8 = vcmp.lt.f32.partialorder %v2523_v58, 0.0004427343 }
 0x314   : > { %3422 = vst [vmem:[#allocation25 + $0x68] sm:$0xff] %v3395_v10   ;;  %v2596_v30 = vadd.f32 %v2564_v26, %v2516_v34  ;;  %3963 = vlog2.f32 %v2526_v52  ;;  %v2861_v61 = vadd.f32 1.0, %v3960_v7  ;;  %v2864_v18 = vmul.f32 -0.5, %v3960_v7 }
 0x315   : > { %v2691_v38 = vadd.f32 %v2659_v4, %v2083_v57  ;;  %v2530_v51 = vadd.f32 1.0, %v2529_v9  ;;  %v2867_v40 = vand.u32 2147483647, %v3960_v7  ;;  %vm2533_vm9 = vcmp.lt.f32.partialorder %v2532_v1, 0.0004427343 }
 0x316   : > { %v2660_v27 = vmul.f32 %v2628_v29, %v2596_v30  ;;  %3965 = vlog2.f32 %v2861_v61  ;;  %v2865_v21 = vadd.f32 1.0, %v2864_v18 }
 0x317   : > { %v2531_v13 = vmul.f32 %v3958_v28, %v2530_v51  ;;  %vm2868_vm10 = vcmp.lt.f32.partialorder %v2867_v40, 0.0004427343 }
 0x318   : > { %v2692_v48 = vadd.f32 %v2660_v27, %v2084_v2  ;;  %v2866_v53 = vmul.f32 %v3960_v7, %v2865_v21 }
 0x31a   : > { %v3400_v33 = vpack.c.bf16 %v2692_v48, %v2691_v38 }
 0x31b   : > { %v3962_v12 = vpop.eup %3961 }
 0x31c   : > { %3423 = vst [vmem:[#allocation25 + $0x70] sm:$0xff] %v3400_v33   ;;  %v2519_v32 = vmul.f32 0.6931472, %v3962_v12 }
 0x31e   : > { %v3964_v0 = vpop.eup %3963  ;;  %v2525_v6 = vsel %vm2524_vm8, %v2522_v47, %v2519_v32 }
 0x31f   : > { %v2528_v15 = vmul.f32 0.6931472, %v3964_v0  ;;  %v2597_v16 = vadd.f32 %v2565_v44, %v2525_v6 }
 0x320   : > { %v3966_v62 = vpop.eup %3965 }
 0x321   : > { %v2534_v60 = vsel %vm2533_vm9, %v2531_v13, %v2528_v15  ;;  %v2661_v50 = vmul.f32 %v2629_v5, %v2597_v16  ;;  %v2863_v54 = vmul.f32 0.6931472, %v3966_v62 }
 0x322   : > { %v2598_v11 = vadd.f32 %v2566_v55, %v2534_v60 }
 0x323   : > { %v2693_v49 = vadd.f32 %v2661_v50, %v2085_v45  ;;  %v2869_v46 = vsel %vm2868_vm10, %v2866_v53, %v2863_v54 }
 0x324   : > { %v2662_v8 = vmul.f32 %v2630_v22, %v2598_v11  ;;  %v2871_v41 = vadd.f32 %v2870_v37, %v2869_v46 }
 0x326   : > { %v2694_v3 = vadd.f32 %v2662_v8, %v2086_v23  ;;  %v2873_v24 = vmul.f32 %v2872_v36, %v2871_v41 }
 0x328   : > { %v3405_v35 = vpack.c.bf16 %v2694_v3, %v2693_v49  ;;  %v2874_v19 = vadd.f32 %v2873_v24, %v2855_v31 }
 0x32a   : > { %3424 = vst [vmem:[#allocation25 + $0x78] sm:$0xff] %v3405_v35   ;;  %2875 = vst [vmem:[#allocation26] sm:$0x1] %v2874_v19 }
 0x32b PF: > { %s4503_s1 = smov [#allocation23]   ;;  %s3425_s27 = smul.u32 3584, %s4612_s24 }
 0x32c   : > { %s2905_s16 = sshll.u32 %s4503_s1, 4  ;;  %p6858_p6 = scmp.eq.s32.totalorder %s4612_s24, 6  ;;  %s2906_s16 = int_to_ptr.vmem [resolvable:$true] %s2905_s16 }
 0x32d   : > { %s4309_s23 = scalar_lea.vmem %s2906_s16, 64  ;;  %p4316_p9 = scmp.lt.s32.totalorder %s2906_s16, %s2906_s16 }
 0x32e   : > { %p4310_p0 = scmp.ne.s32.totalorder %s2906_s16, %s4309_s23  ;;  %p4317_p1 = scmp.lt.s32.totalorder %s4309_s23, %s4309_s23 }
 0x330   : > { %p4311_p5 = pnand %p4310_p0, %p6858_p6  ;;  %p4318_p10 = por %p4317_p1, %p4316_p9 }
 0x332   : > { %p4312_p3 = pneg %p4311_p5 }
 0x334   : > { %p4319_p13 = pnand %p4318_p10, %p4312_p3 }
 0x336   : > { %4322 = shalt.err (!%p4319_p13)
}
 0x337   : > { %s6859_s3 = sld [smem:[#allocation53_spill]]  ;;  %p6860_p7 = pmov %p6858_p6 }
 0x33d   : > { %s4323_s21 = scalar_lea.hbm %s6859_s3, 64 }
 0x33e   : > { %p4324_p8 = scmp.ne.s32.totalorder %s6859_s3, %s4323_s21  ;;  %p4329_p2 = scmp.lt.u32.totalorder %s4323_s21, %s6859_s3 }
 0x340   : > { %p4325_p11 = pnand %p4324_p8, %p6860_p7 }
 0x342   : > { %p4326_p12 = pneg %p4325_p11 }
 0x344   : > { %p4331_p4 = pnand %p4329_p2, %p4326_p12 }
 0x346   : > { %4334 = shalt.err (!%p4331_p4)
}
 0x347   : > { %p6861_p0 = pmov %p6858_p6  ;;  %s6862_s26 = sld [smem:[#allocation43_spill]] }
 0x348   : > { %s6863_s14 = sld [smem:[#allocation52_spill]]  ;;  %s2891_s13 = sshll.u32 %s5168_s6, 4  ;;  %s6494_s13 = int_to_ptr.vmem [resolvable:$true] %s2891_s13 }
 0x349   : > { %3475 = dma.vmem_to_hbm [thread:$0]  (%p6861_p0), %s2906_s16, 64, %s6859_s3, [#allocation24]  }
 0x34a   : > { %s2877_s12 = scalar_lea.sflag [#allocation4], %s4987_s15  ;;  %s4335_s1 = scalar_lea.vmem %s6494_s13, 3584 }
 0x34b   : > { %p4336_p6 = scmp.ne.s32.totalorder %s6494_s13, %s4335_s1  ;;  %s4504_s23 = smov [#allocation22]  }
 0x34c   : > { %s4339_s9 = sshll.u32 %s4504_s23, 4  ;;  %s4340_s9 = int_to_ptr.vmem [resolvable:$false] %s4339_s9 }
 0x34d   : > { %p6864_p5 = scmp.ne.s32.totalorder %s6862_s26, 0  ;;  %s4341_s16 = scalar_lea.vmem %s4340_s9, 7168 }
 0x34e   : > { %s6491_s7 = scalar_lea.hbm %s6863_s14, %s3425_s27  ;;  %p4342_p1 = scmp.lt.s32.totalorder %s6494_s13, %s4340_s9 }
 0x34f   : > { %p4337_p3 = pnand %p4336_p6, %p6864_p5  ;;  %p4343_p10 = scmp.lt.s32.totalorder %s4341_s16, %s4335_s1 }
 0x351   : > { %p4338_p9 = pneg %p4337_p3  ;;  %p4344_p13 = por %p4343_p10, %p4342_p1 }
 0x353   : > { %p4345_p8 = pnand %p4344_p13, %p4338_p9 }
 0x355   : > { %4348 = shalt.err (!%p4345_p8)
}
 0x356   : > { %s4349_s6 = scalar_lea.hbm %s6491_s7, 3584  ;;  %s4353_s21 = scalar_lea.hbm %s6863_s14, 25088 }
 0x357   : > { %p4350_p7 = scmp.ne.s32.totalorder %s6491_s7, %s4349_s6  ;;  %p4354_p2 = scmp.lt.u32.totalorder %s6491_s7, %s6863_s14 }
 0x358   : > { %p4355_p4 = scmp.lt.u32.totalorder %s4353_s21, %s4349_s6  ;;  %p4357_p6 = scmp.lt.u32.totalorder %s4349_s6, %s6491_s7 }
 0x359   : > { %p4351_p11 = pnand %p4350_p7, %p6864_p5 }
 0x35a   : > { %p4356_p0 = por %p4355_p4, %p4354_p2 }
 0x35b   : > { %p4352_p12 = pneg %p4351_p11 }
 0x35c   : > { %p4358_p3 = por %p4357_p6, %p4356_p0 }
 0x35e   : > { %p4359_p9 = pnand %p4358_p3, %p4352_p12 }
 0x360   : > { %4362 = shalt.err (!%p4359_p9)
}
 0x361   : > { %s4505_s28 = smov 256   ;;  %s4506_s18 = smov 16  }
 0x362   : > { %3473 = dma.vmem_to_hbm [thread:$0]  (%p6864_p5), %s6494_s13, 3584, %s6491_s7, %s2877_s12, %s4505_s28, %s4505_s28, %s4506_s18  }
 0x363   : > { %s4507_s17 = smov [#allocation25]   ;;  %p6865_p10 = scmp.eq.s32.totalorder %s4612_s24, 6 }
 0x364   : > { %s2915_s22 = sshll.u32 %s4507_s17, 4  ;;  %s2916_s22 = int_to_ptr.vmem [resolvable:$true] %s2915_s22 }
 0x365   : > { %s4363_s5 = scalar_lea.vmem %s2916_s22, 2048  ;;  %p4370_p7 = scmp.lt.s32.totalorder %s2916_s22, %s2916_s22 }
 0x366   : > { %p4364_p1 = scmp.ne.s32.totalorder %s2916_s22, %s4363_s5  ;;  %p4371_p11 = scmp.lt.s32.totalorder %s4363_s5, %s4363_s5 }
 0x368   : > { %p4365_p13 = pnand %p4364_p1, %p6865_p10  ;;  %p4372_p12 = por %p4371_p11, %p4370_p7 }
 0x36a   : > { %p4366_p8 = pneg %p4365_p13 }
 0x36c   : > { %p4373_p2 = pnand %p4372_p12, %p4366_p8 }
 0x36e   : > { %4376 = shalt.err (!%p4373_p2)
}
 0x36f   : > { %s6866_s23 = sld [smem:[#allocation54_spill]]  ;;  %p6867_p4 = pmov %p6865_p10 }
 0x375   : > { %s4377_s26 = scalar_lea.hbm %s6866_s23, 2048 }
 0x376   : > { %p4378_p5 = scmp.ne.s32.totalorder %s6866_s23, %s4377_s26  ;;  %p4383_p3 = scmp.lt.u32.totalorder %s4377_s26, %s6866_s23 }
 0x378   : > { %p4379_p0 = pnand %p4378_p5, %p6867_p4 }
 0x37a   : > { %p4380_p6 = pneg %p4379_p0 }
 0x37c   : > { %p4385_p9 = pnand %p4383_p3, %p4380_p6 }
 0x37e   : > { %4388 = shalt.err (!%p4385_p9)
}
 0x37f   : > { %s4508_s9 = smov 64   ;;  %s4509_s16 = smov 4  }
 0x380   : > { %p6868_p1 = pmov %p6867_p4  ;;  %s4510_s30 = smov [#allocation26]  }
 0x381   : > { %s2929_s21 = sshll.u32 %s4510_s30, 4  ;;  %s2930_s21 = int_to_ptr.vmem [resolvable:$true] %s2929_s21 }
 0x382   : > { %3477 = dma.vmem_to_hbm [thread:$0]  (%p6868_p1), %s2916_s22, 2048, %s6866_s23, [#allocation24], %s4508_s9, %s4508_s9, %s4509_s16  }
 0x383   : > { %s4389_s25 = scalar_lea.vmem %s2930_s21, 16  ;;  %p6869_p13 = pmov %p6868_p1 }
 0x384   : > { %p4390_p10 = scmp.ne.s32.totalorder %s2930_s21, %s4389_s25  ;;  %s4395_s4 = scalar_lea.vmem %s2930_s21, 32 }
 0x385   : > { %p4396_p11 = scmp.lt.s32.totalorder %s2930_s21, %s2930_s21  ;;  %p4397_p12 = scmp.lt.s32.totalorder %s4395_s4, %s4389_s25 }
 0x386   : > { %p4391_p8 = pnand %p4390_p10, %p6869_p13 }
 0x387   : > { %p4398_p2 = por %p4397_p12, %p4396_p11 }
 0x388   : > { %p4392_p7 = pneg %p4391_p8 }
 0x38a   : > { %p4399_p5 = pnand %p4398_p2, %p4392_p7 }
 0x38c   : > { %4402 = shalt.err (!%p4399_p5)
}
 0x38d   : > { %s6870_s17 = sld [smem:[#allocation55_spill]]  ;;  %p6871_p0 = pmov %p6868_p1 }
 0x393   : > { %s4403_s5 = scalar_lea.hbm %s6870_s17, 16 }
 0x394   : > { %p4404_p4 = scmp.ne.s32.totalorder %s6870_s17, %s4403_s5  ;;  %p4409_p9 = scmp.lt.u32.totalorder %s4403_s5, %s6870_s17 }
 0x396   : > { %p4405_p6 = pnand %p4404_p4, %p6871_p0 }
 0x398   : > { %p4406_p3 = pneg %p4405_p6 }
 0x39a   : > { %p4411_p1 = pnand %p4409_p9, %p4406_p3 }
 0x39c   : > { %4414 = shalt.err (!%p4411_p1)
}
 0x39d   : > { %p6872_p10 = pmov %p6871_p0  ;;  %p6873_p13 = pmov %p6871_p0 }
 0x39f   : > { %3479 = dma.vmem_to_hbm [thread:$0]  (%p6872_p10), %s2930_s21, 16, %s6870_s17, [#allocation27]  }
 0x3a0   : > { %4460 = dma.done.wait (%p6873_p13), [#allocation24], 2112   ;;  %p6874_p8 = pmov %p6871_p0 }
 0x3a1   : > { %p6875_p7 = pmov %p6871_p0 }
 0x3a2   : > { %4462 = vsyncadd (%p6874_p8), [#allocation24], 4294965184 }
 0x3a3   : > { %4464 = dma.done.wait (%p6875_p7), [#allocation27], 16   ;;  %p6876_p11 = pmov %p6871_p0 }
 0x3a5   : > { %4466 = vsyncadd (%p6876_p11), [#allocation27], 4294967280 }
 0x3a6 PF: > { %s6877_s13 = sld [smem:[#allocation39_spill]]  ;;  %s6878_s12 = sld [smem:[#allocation38_spill]] }
 0x3a7   : > { %s6879_s9 = sld [smem:[#allocation44_spill]] }
 0x3ac   : > { %p3554_p12 = scmp.ge.s32.totalorder %s6877_s13, 2  ;;  %s2953_s16 = sand.u32 1, %s6878_s12  }
 0x3ad   : > { %p6880_p2 = scmp.ne.s32.totalorder %s6879_s9, 0  ;;  %s2954_s6 = scalar_lea.sflag [#allocation4], %s2953_s16 }
 0x3af   : > { %p3526_p5 = pnand %p3554_p12, %p6880_p2 }
 0x3b1   : > { %4468 = dma.done.wait (!%p3526_p5), %s2954_s6, 3584  }
 0x3b2   : > { %4470 = vsyncadd (!%p3526_p5), %s2954_s6, 4294963712  ;;  %s6881_s21 = sld [smem:[#allocation41_spill]]  ;;  %s6882_s27 = sld [smem:[#allocation42_spill]] }
 0x3b3   : > { %s6883_s18 = smov %s4477_s19  ;;  %s6884_s19 = smov %s4481_s20 }
 0x3b8   : > { %p39_p4 = scmp.ge.s32.totalorder %s6881_s21, 9   ;;  %s6885_s20 = smov %s6882_s27 }
 0x3ba   :  { %41 = sbr.rel (!%p39_p4) target bundleno = 26 (0x1a), region = 201 }
 0x3c1   :  { %2959 = vsyncpa [#allocation3], 1 }
 0x3c2   :  { %2961 = vsyncpa [#allocation3 + $0x1], 1 }
 0x3c3   :  { %2962 = vsyncpa [#allocation6], 1 }
 0x3c4   :  { %2964 = vsyncpa [#allocation6 + $0x1], 1 }
 0x3c5   :  { %2965 = vsyncpa [#allocation9], 1 }
 0x3c6   :  { %2966 = vsyncpa [#allocation12], 1 }
 0x3c7   :  { %2967 = vsyncpa [#allocation15], 1 }
 0x3c8   :  { %2968 = vsyncpa [#allocation18], 1 }
 0x3c9   :  { %2969 = vsyncpa [#allocation21], 1 }
 0x3ca   :  { %2970 = vsyncpa [#allocation4], 1 }
 0x3cb   :  { %2972 = vsyncpa [#allocation4 + $0x1], 1 }
 0x3cc   :  { %2973 = vsyncpa [#allocation24], 1 }
 0x3cd   :  { %2974 = vsyncpa [#allocation27], 1 }

</bundles_post_ra>
